<compile_context>
chip_gen: v6e
topology: v6e:2x2x1
jax: 0.10.0
libtpu: 0.0.40
codegen_flags: <defaults>
</compile_context>

<pallas_src>
import jax
import jax.numpy as jnp
from jax import lax
from jax.experimental import pallas as pl
from jax.experimental.pallas import tpu as pltpu

EPS = 1e-5
LANE = 128


def _round_up(x, m):
    return (x + m - 1) // m * m


def _vmem_budget():
    try:
        info = pltpu.get_tpu_info()
        cap = int(getattr(info, "vmem_capacity_bytes", 64 * 1024 * 1024))
    except Exception:
        cap = 64 * 1024 * 1024
    # ~3/4 of physical VMEM: ~96 MiB on v5e/v6e (128 MiB), ~48 MiB on v7x (64 MiB).
    return min(int(cap * 3 // 4), 112 * 1024 * 1024), cap


def _pick_tile_rows(H, W, Ci, Cp, rows_target, vmem_budget):
    """Largest TH dividing H with TH*W % 8 == 0 (or TH == H) that fits budget."""
    def footprint(th):
        rows = th * W
        resident = (2 * H * W * Cp * 2                 # double-buffered conv1 out (bf16)
                    + 2 * 9 * Cp * Cp * 2              # double-buffered conv2 weights
                    + 2 * (H + 2) * (W + 2) * Ci * 2)  # double-buffered padded input
        per_tile = ((th + 2) * (W + 2) * Cp * 2        # pass-2 act halo scratch (bf16)
                    + rows * 9 * Cp * 2                # on-chip patch operand (bf16)
                    + rows * Cp * 4                    # f32 matmul result staging
                    + 2 * rows * Cp * (2 + 4))         # double-buffered tile outputs
        return resident + per_tile

    cands = [th for th in range(1, H + 1)
             if H % th == 0 and ((th * W) % 8 == 0 or th == H)]
    ok = [th for th in cands if th * W <= rows_target and footprint(th) <= vmem_budget]
    if ok:
        return max(ok)
    ok = [th for th in cands if footprint(th) <= vmem_budget]
    return max(ok) if ok else min(cands)


# --------------------- pass 1: conv1 + per-tile BN1 stats ---------------------

def _make_conv1_kernel(TH, W):
    def kernel(x_ref, w_ref, y_ref, st_ref):
        # x_ref : (1, H+2, W+2, Ci) bf16  zero-padded input image (resident per n)
        # w_ref : (9*Ci, Cp)        bf16  taps flattened into the contraction dim
        # y_ref : (1, TH*W, Cp)     bf16  raw conv1 rows for this tile
        # st_ref: (1, 1, 2, Cp)     f32   per-tile [sum, sum_sq]
        ht = pl.program_id(1)
        ci = x_ref.shape[-1]
        cp = w_ref.shape[-1]
        slab = x_ref[0, pl.ds(ht * TH, TH + 2), :, :]            # (TH+2, W+2, Ci)
        # Fold dx then dy taps into the channel (lane) axis -> K = 9*Ci, one matmul.
        cat3 = jnp.concatenate(
            [slab[:, 0:W, :], slab[:, 1:W + 1, :], slab[:, 2:W + 2, :]], axis=-1)
        cat9 = jnp.concatenate(
            [cat3[0:TH], cat3[1:TH + 1], cat3[2:TH + 2]], axis=-1)  # (TH, W, 9*Ci)
        # NOTE: the reshape is layout-preserving when W % 8 == 0 (pad W upstream
        # for widths like 28/14/7 if this kernel is reused at those shapes).
        acc = jnp.dot(cat9.reshape(TH * W, 9 * ci), w_ref[...],
                      preferred_element_type=jnp.float32)           # single MXU pass
        y_bf = acc.astype(jnp.bfloat16)
        y_ref[0] = y_bf
        yf = y_bf.astype(jnp.float32)          # stats of exactly what pass 2 reads
        s0 = jnp.sum(yf, axis=0, keepdims=True)
        s1 = jnp.sum(yf * yf, axis=0, keepdims=True)
        st_ref[...] = jnp.concatenate([s0, s1], axis=0).reshape(1, 1, 2, cp)
    return kernel


# ---------- pass 2: per-tile BN1+ReLU halo slab, conv2, BN2 stats -------------

def _make_conv2_kernel(TH, HT, H, W):
    def kernel(y_ref, w_ref, sc_ref, sh_ref, z_ref, st_ref, act_ref):
        # y_ref  : (1, H, W, Cp)   bf16  raw conv1 output (resident per n, unpadded)
        # w_ref  : (9*Cp, Cp)      bf16
        # sc/sh  : (1, Cp)         f32   BN1 scale / shift (precomputed)
        # z_ref  : (1, TH*W, Cp)   bf16  raw conv2 rows for this tile
        # st_ref : (1, 1, 2, Cp)   f32
        # act_ref: (TH+2, W+2, Cp) bf16  per-tile halo slab of relu(bn1(y))
        ht = pl.program_id(1)
        cp = w_ref.shape[-1]
        sc = sc_ref[0]
        sh = sh_ref[0]

        # Per-tile halo construction: zero the slab, then write only the valid
        # rows.  Two halo rows of BN+ReLU are recomputed per tile; every grid
        # step is self-contained so the ht axis can be 'parallel'.
        act_ref[...] = jnp.zeros(act_ref.shape, act_ref.dtype)

        def fill(dst_row, src_row, nrows):
            y = y_ref[0, pl.ds(src_row, nrows), :, :].astype(jnp.float32)
            a = jnp.maximum(y * sc + sh, 0.0)
            act_ref[pl.ds(dst_row, nrows), pl.ds(1, W), :] = a.astype(jnp.bfloat16)

        if HT == 1:
            fill(1, 0, H)
        else:
            @pl.when(ht == 0)
            def _():
                fill(1, 0, TH + 1)

            @pl.when(ht == HT - 1)
            def _():
                fill(0, H - TH - 1, TH + 1)

            if HT > 2:
                @pl.when(jnp.logical_and(ht > 0, ht < HT - 1))
                def _():
                    fill(0, ht * TH - 1, TH + 2)

        slab = act_ref[...]
        cat3 = jnp.concatenate(
            [slab[:, 0:W, :], slab[:, 1:W + 1, :], slab[:, 2:W + 2, :]], axis=-1)
        cat9 = jnp.concatenate(
            [cat3[0:TH], cat3[1:TH + 1], cat3[2:TH + 2]], axis=-1)  # (TH, W, 9*Cp)
        acc = jnp.dot(cat9.reshape(TH * W, 9 * cp), w_ref[...],
                      preferred_element_type=jnp.float32)
        z_bf = acc.astype(jnp.bfloat16)
        z_ref[0] = z_bf
        zf = z_bf.astype(jnp.float32)
        s0 = jnp.sum(zf, axis=0, keepdims=True)
        s1 = jnp.sum(zf * zf, axis=0, keepdims=True)
        st_ref[...] = jnp.concatenate([s0, s1], axis=0).reshape(1, 1, 2, cp)
    return kernel


# ---------------- pass 3: BN2 + identity shortcut add + ReLU ------------------

def _make_bn_add_relu_kernel(Co, Cp):
    def kernel(z_ref, x_ref, sc_ref, sh_ref, o_ref):
        # z_ref: (1, TR, Cp) bf16 ; x_ref: (1, TR, Co) f32 residual (read in place)
        rows = z_ref.shape[1]
        z = z_ref[0].astype(jnp.float32)
        res = x_ref[0]
        if Cp > Co:  # pad residual to the lane-dense width in VMEM (no HBM copy)
            res = jnp.concatenate(
                [res, jnp.zeros((rows, Cp - Co), jnp.float32)], axis=-1)
        o_ref[0] = jnp.maximum(z * sc_ref[...] + sh_ref[...] + res, 0.0)
    return kernel


# ------------------------------ wrapper glue ---------------------------------

def _finalize_bn(stats, count, gamma_p, beta_p):
    # stats: (N, HT, 2, Cp) per-tile [sum, sum_sq] -> per-channel affine params.
    # NOTE: E[x^2]-E[x]^2 in f32 is fine at these sizes; for very large N*H*W
    # switch to a mean-shifted / Welford-style merge to avoid cancellation.
    s = jnp.sum(stats[:, :, 0, :], axis=(0, 1))
    ss = jnp.sum(stats[:, :, 1, :], axis=(0, 1))
    mean = s / count
    var = jnp.maximum(ss / count - mean * mean, 0.0)       # biased (training) var
    scale = gamma_p * lax.rsqrt(var + EPS)
    shift = beta_p - mean * scale
    return scale.reshape(1, -1), shift.reshape(1, -1)


@jax.jit
def residual_block_forward(x_nchw, params):
    # TODO(synk): stride != 1 downsample shortcut (1x1 conv + BatchNorm) not
    # implemented; this covers the stride=1 / identity-shortcut configuration
    # (the only shape-consistent one with input_channels == output_channels).
    w1, g1, b1 = params["w1"], params["g1"], params["b1"]
    w2, g2, b2 = params["w2"], params["g2"], params["b2"]
    N, Ci, H, W = x_nchw.shape
    Co = w1.shape[-1]
    assert Ci == Co, "identity shortcut requires Cin == Cout"

    Cp = _round_up(Co, LANE)                 # lane-dense output channels
    Hp2, Wp2 = H + 2, W + 2

    vmem_limit, cap = _vmem_budget()
    rows_target = 2048 if cap >= (96 << 20) else 1024   # bigger tiles on v5e/v6e
    TH = _pick_tile_rows(H, W, Ci, Cp, rows_target, int(vmem_limit * 0.7))
    HT = H // TH
    RT = TH * W                                          # GEMM / store rows per tile
    R = N * H * W

    cparams = pltpu.CompilerParams(
        dimension_semantics=("parallel", "parallel"),
        vmem_limit_bytes=vmem_limit)

    # -------- layout prep (no im2col, no activation pad copies) --------
    x_nhwc = jnp.transpose(x_nchw, (0, 2, 3, 1)).astype(jnp.float32)
    x_pad = jnp.pad(x_nhwc, ((0, 0), (1, 1), (1, 1), (0, 0))).astype(jnp.bfloat16)
    x2d = x_nhwc.reshape(N, H * W, Ci)       # residual, read in place (free re-view)

    w1p = jnp.pad(w1, ((0, 0), (0, 0), (0, 0), (0, Cp - Co)))
    w1p = w1p.reshape(9 * Ci, Cp).astype(jnp.bfloat16)    # (dy,dx,c) flattened = K
    w2p = jnp.pad(w2, ((0, 0), (0, 0), (0, Cp - Co), (0, Cp - Co)))
    w2p = w2p.reshape(9 * Cp, Cp).astype(jnp.bfloat16)

    g1p = jnp.pad(g1.reshape(-1), (0, Cp - Co)).astype(jnp.float32)
    b1p = jnp.pad(b1.reshape(-1), (0, Cp - Co)).astype(jnp.float32)
    g2p = jnp.pad(g2.reshape(-1), (0, Cp - Co)).astype(jnp.float32)
    b2p = jnp.pad(b2.reshape(-1), (0, Cp - Co)).astype(jnp.float32)

    # -------- pass 1: conv1 (one K=9*Ci matmul per tile) + BN1 partial stats --
    y2d, stats1 = pl.pallas_call(
        _make_conv1_kernel(TH, W),
        grid=(N, HT),
        in_specs=[
            pl.BlockSpec((1, Hp2, Wp2, Ci), lambda n, ht: (n, 0, 0, 0)),
            pl.BlockSpec((9 * Ci, Cp), lambda n, ht: (0, 0)),
        ],
        out_specs=[
            pl.BlockSpec((1, RT, Cp), lambda n, ht: (n, ht, 0)),
            pl.BlockSpec((1, 1, 2, Cp), lambda n, ht: (n, ht, 0, 0)),
        ],
        out_shape=[
            jax.ShapeDtypeStruct((N, H * W, Cp), jnp.bfloat16),
            jax.ShapeDtypeStruct((N, HT, 2, Cp), jnp.float32),
        ],
        compiler_params=cparams,
    )(x_pad, w1p)

    scale1, shift1 = _finalize_bn(stats1, float(R), g1p, b1p)
    y4d = y2d.reshape(N, H, W, Cp)     # free re-view; NO padded HBM copy of y

    # -------- pass 2: per-tile BN1+ReLU halo slab, conv2, BN2 partial stats ---
    z2d, stats2 = pl.pallas_call(
        _make_conv2_kernel(TH, HT, H, W),
        grid=(N, HT),
        in_specs=[
            pl.BlockSpec((1, H, W, Cp), lambda n, ht: (n, 0, 0, 0)),
            pl.BlockSpec((9 * Cp, Cp), lambda n, ht: (0, 0)),
            pl.BlockSpec((1, Cp), lambda n, ht: (0, 0)),
            pl.BlockSpec((1, Cp), lambda n, ht: (0, 0)),
        ],
        out_specs=[
            pl.BlockSpec((1, RT, Cp), lambda n, ht: (n, ht, 0)),
            pl.BlockSpec((1, 1, 2, Cp), lambda n, ht: (n, ht, 0, 0)),
        ],
        out_shape=[
            jax.ShapeDtypeStruct((N, H * W, Cp), jnp.bfloat16),
            jax.ShapeDtypeStruct((N, HT, 2, Cp), jnp.float32),
        ],
        scratch_shapes=[pltpu.VMEM((TH + 2, Wp2, Cp), jnp.bfloat16)],
        compiler_params=cparams,
    )(y4d, w2p, scale1, shift1)

    scale2, shift2 = _finalize_bn(stats2, float(R), g2p, b2p)

    # -------- pass 3: BN2 + identity shortcut + ReLU (lane-dense row tiles) ---
    out2d = pl.pallas_call(
        _make_bn_add_relu_kernel(Co, Cp),
        grid=(N, HT),
        in_specs=[
            pl.BlockSpec((1, RT, Cp), lambda n, ht: (n, ht, 0)),
            pl.BlockSpec((1, RT, Ci), lambda n, ht: (n, ht, 0)),
            pl.BlockSpec((1, Cp), lambda n, ht: (0, 0)),
            pl.BlockSpec((1, Cp), lambda n, ht: (0, 0)),
        ],
        out_specs=pl.BlockSpec((1, RT, Cp), lambda n, ht: (n, ht, 0)),
        out_shape=jax.ShapeDtypeStruct((N, H * W, Cp), jnp.float32),
        compiler_params=cparams,
    )(z2d, x2d, scale2, shift2)

    out = out2d.reshape(N, H, W, Cp)[..., :Co]
    return jnp.transpose(out, (0, 3, 1, 2))      # back to NCHW


# ---------------- pure-JAX reference for verification -------------------------

def _bn_train_ref(y, g, b):
    mean = jnp.mean(y, axis=(0, 1, 2), keepdims=True)
    var = jnp.mean(jnp.square(y - mean), axis=(0, 1, 2), keepdims=True)
    return ((y - mean) * lax.rsqrt(var + EPS) * g.reshape(1, 1, 1, -1)
            + b.reshape(1, 1, 1, -1))


def reference_forward(x_nchw, params):
    dn = ("NHWC", "HWIO", "NHWC")
    x = jnp.transpose(x_nchw, (0, 2, 3, 1)).astype(jnp.float32)
    y = lax.conv_general_dilated(x, params["w1"], (1, 1), "SAME",
                                 dimension_numbers=dn,
                                 precision=lax.Precision.HIGHEST)
    y = jnp.maximum(_bn_train_ref(y, params["g1"], params["b1"]), 0.0)
    z = lax.conv_general_dilated(y, params["w2"], (1, 1), "SAME",
                                 dimension_numbers=dn,
                                 precision=lax.Precision.HIGHEST)
    z = _bn_train_ref(z, params["g2"], params["b2"])
    z = jnp.maximum(z + x, 0.0)
    return jnp.transpose(z, (0, 3, 1, 2))


if __name__ == "__main__":
    # stride=1 residual block: input_channels == output_channels
    N, C, H, W = 2, 8, 16, 16
    Cout = C

    key = jax.random.PRNGKey(0)
    ks = jax.random.split(key, 7)
    x = jax.random.normal(ks[0], (N, C, H, W), jnp.float32)
    params = {
        # conv weights stored HWIO (3,3,Cin,Cout); bias=False as in the module
        "w1": jax.random.normal(ks[1], (3, 3, C, Cout), jnp.float32) / jnp.sqrt(9.0 * C),
        "g1": 1.0 + 0.1 * jax.random.normal(ks[2], (Cout,), jnp.float32),
        "b1": 0.1 * jax.random.normal(ks[3], (Cout,), jnp.float32),
        "w2": jax.random.normal(ks[4], (3, 3, Cout, Cout), jnp.float32) / jnp.sqrt(9.0 * Cout),
        "g2": 1.0 + 0.1 * jax.random.normal(ks[5], (Cout,), jnp.float32),
        "b2": 0.1 * jax.random.normal(ks[6], (Cout,), jnp.float32),
    }

    out = jax.block_until_ready(residual_block_forward(x, params))
    ref = reference_forward(x, params)

    assert out.shape == (N, Cout, H, W), out.shape
    max_err = float(jnp.max(jnp.abs(out - ref)))
    # bf16 MXU operands + bf16 inter-pass activations vs an f32 HIGHEST-precision
    # reference -> worst-case abs error ~1e-2 at these scales.
    assert jnp.allclose(out, ref, atol=4e-2, rtol=2e-2), f"max abs err = {max_err}"
    print("KERNEL_OK")
</pallas_src>

<mosaic_0001>
module attributes {stable_mosaic.version = 11 : i64} {
  func.func @kernel(%arg0: i32, %arg1: i32, %arg2: memref<1x18x18x8xbf16, #tpu.memory_space<vmem>>, %arg3: memref<72x128xbf16, #tpu.memory_space<vmem>>, %arg4: memref<1x256x128xbf16, #tpu.memory_space<vmem>>, %arg5: memref<1x1x2x128xf32, #tpu.memory_space<vmem>>) attributes {dimension_semantics = [#tpu.dimension_semantics<parallel>, #tpu.dimension_semantics<parallel>], iteration_bounds = array<i64: 2, 1>, scalar_prefetch = 0 : i64, scratch_operands = 0 : i64, tpu.core_type = #tpu.core_type<tc>, window_params = [{transform_indices = @transform_0, window_bounds = array<i64: 1, 18, 18, 8>}, {pipeline_mode = #tpu.pipeline_mode<synchronous>, transform_indices = @transform_1, window_bounds = array<i64: 72, 128>}, {transform_indices = @transform_2, window_bounds = array<i64: 1, 256, 128>}, {transform_indices = @transform_3, window_bounds = array<i64: 1, 1, 2, 128>}]} {
    %c16_i32 = arith.constant 16 : i32
    %0 = arith.muli %arg1, %c16_i32 : i32
    %c0 = arith.constant 0 : index
    %1 = arith.index_cast %0 : i32 to index
    %c0_0 = arith.constant 0 : index
    %c0_1 = arith.constant 0 : index
    %2 = vector.load %arg2[%c0, %1, %c0_0, %c0_1] : memref<1x18x18x8xbf16, #tpu.memory_space<vmem>>, vector<1x18x18x8xbf16>
    %3 = vector.shape_cast %2 : vector<1x18x18x8xbf16> to vector<18x18x8xbf16>
    %4 = vector.extract_strided_slice %3 {offsets = [0, 0, 0], sizes = [18, 16, 8], strides = [1, 1, 1]} : vector<18x18x8xbf16> to vector<18x16x8xbf16>
    %5 = vector.extract_strided_slice %3 {offsets = [0, 1, 0], sizes = [18, 16, 8], strides = [1, 1, 1]} : vector<18x18x8xbf16> to vector<18x16x8xbf16>
    %6 = vector.extract_strided_slice %3 {offsets = [0, 2, 0], sizes = [18, 16, 8], strides = [1, 1, 1]} : vector<18x18x8xbf16> to vector<18x16x8xbf16>
    %7 = tpu.concatenate %4, %5, %6 in 2 : vector<18x16x8xbf16>, vector<18x16x8xbf16>, vector<18x16x8xbf16> -> vector<18x16x24xbf16>
    %8 = vector.extract_strided_slice %7 {offsets = [0, 0, 0], sizes = [16, 16, 24], strides = [1, 1, 1]} : vector<18x16x24xbf16> to vector<16x16x24xbf16>
    %9 = vector.extract_strided_slice %7 {offsets = [1, 0, 0], sizes = [16, 16, 24], strides = [1, 1, 1]} : vector<18x16x24xbf16> to vector<16x16x24xbf16>
    %10 = vector.extract_strided_slice %7 {offsets = [2, 0, 0], sizes = [16, 16, 24], strides = [1, 1, 1]} : vector<18x16x24xbf16> to vector<16x16x24xbf16>
    %11 = tpu.concatenate %8, %9, %10 in 2 : vector<16x16x24xbf16>, vector<16x16x24xbf16>, vector<16x16x24xbf16> -> vector<16x16x72xbf16>
    %12 = vector.shape_cast %11 : vector<16x16x72xbf16> to vector<256x72xbf16>
    %c0_2 = arith.constant 0 : index
    %c0_3 = arith.constant 0 : index
    %13 = vector.load %arg3[%c0_2, %c0_3] : memref<72x128xbf16, #tpu.memory_space<vmem>>, vector<72x128xbf16>
    %cst = arith.constant dense<0.000000e+00> : vector<256x128xf32>
    %14 = tpu.matmul %12, %13, %cst {dimension_numbers = #tpu.dot_dimension_numbers<[1], [0], [0], [1], [0, 0, 1, 1], [], []>} : vector<256x72xbf16>, vector<72x128xbf16>, vector<256x128xf32> -> vector<256x128xf32>
    %15 = arith.truncf %14 : vector<256x128xf32> to vector<256x128xbf16>
    %c0_4 = arith.constant 0 : index
    %c0_5 = arith.constant 0 : index
    %c0_6 = arith.constant 0 : index
    %16 = vector.load %arg4[%c0_4, %c0_5, %c0_6] : memref<1x256x128xbf16, #tpu.memory_space<vmem>>, vector<1x256x128xbf16>
    %17 = vector.shape_cast %16 : vector<1x256x128xbf16> to vector<256x128xbf16>
    %18 = vector.shape_cast %15 : vector<256x128xbf16> to vector<1x256x128xbf16>
    tpu.vector_store %arg4[%c0_4, %c0_5, %c0_6], %18 {strides = array<i32>} : memref<1x256x128xbf16, #tpu.memory_space<vmem>>, vector<1x256x128xbf16>,
    %19 = arith.extf %15 : vector<256x128xbf16> to vector<256x128xf32>
    %cst_7 = arith.constant dense<0.000000e+00> : vector<128xf32>
    %20 = vector.multi_reduction <add>, %19, %cst_7 [0] : vector<256x128xf32> to vector<128xf32>
    %21 = vector.shape_cast %20 : vector<128xf32> to vector<1x128xf32>
    %22 = arith.mulf %19, %19 : vector<256x128xf32>
    %cst_8 = arith.constant dense<0.000000e+00> : vector<128xf32>
    %23 = vector.multi_reduction <add>, %22, %cst_8 [0] : vector<256x128xf32> to vector<128xf32>
    %24 = vector.shape_cast %23 : vector<128xf32> to vector<1x128xf32>
    %25 = tpu.concatenate %21, %24 in 0 : vector<1x128xf32>, vector<1x128xf32> -> vector<2x128xf32>
    %26 = vector.shape_cast %25 : vector<2x128xf32> to vector<1x1x2x128xf32>
    %c0_9 = arith.constant 0 : index
    %c0_10 = arith.constant 0 : index
    %c0_11 = arith.constant 0 : index
    %c0_12 = arith.constant 0 : index
    %27 = vector.load %arg5[%c0_9, %c0_10, %c0_11, %c0_12] : memref<1x1x2x128xf32, #tpu.memory_space<vmem>>, vector<1x1x2x128xf32>
    tpu.vector_store %arg5[%c0_9, %c0_10, %c0_11, %c0_12], %26 {strides = array<i32>} : memref<1x1x2x128xf32, #tpu.memory_space<vmem>>, vector<1x1x2x128xf32>,
    return
  }
  func.func @transform_0(%arg0: i32, %arg1: i32) -> (i32, i32, i32, i32) {
    %c0_i32 = arith.constant 0 : i32
    %c0_i32_0 = arith.constant 0 : i32
    %c0_i32_1 = arith.constant 0 : i32
    %c0_i32_2 = arith.constant 0 : i32
    return %arg0, %c0_i32, %c0_i32_0, %c0_i32_1 : i32, i32, i32, i32
  }
  func.func @transform_1(%arg0: i32, %arg1: i32) -> (i32, i32) {
    %c0_i32 = arith.constant 0 : i32
    %c0_i32_0 = arith.constant 0 : i32
    %c0_i32_1 = arith.constant 0 : i32
    return %c0_i32, %c0_i32_0 : i32, i32
  }
  func.func @transform_2(%arg0: i32, %arg1: i32) -> (i32, i32, i32) {
    %c0_i32 = arith.constant 0 : i32
    %c0_i32_0 = arith.constant 0 : i32
    return %arg0, %arg1, %c0_i32 : i32, i32, i32
  }
  func.func @transform_3(%arg0: i32, %arg1: i32) -> (i32, i32, i32, i32) {
    %c0_i32 = arith.constant 0 : i32
    %c0_i32_0 = arith.constant 0 : i32
    %c0_i32_1 = arith.constant 0 : i32
    return %arg0, %arg1, %c0_i32, %c0_i32_0 : i32, i32, i32, i32
  }
}

module attributes {stable_mosaic.version = 11 : i64} {
  func.func @kernel(%arg0: i32, %arg1: i32, %arg2: memref<1x16x16x128xbf16, #tpu.memory_space<vmem>>, %arg3: memref<1152x128xbf16, #tpu.memory_space<vmem>>, %arg4: memref<1x128xf32, #tpu.memory_space<vmem>>, %arg5: memref<1x128xf32, #tpu.memory_space<vmem>>, %arg6: memref<1x256x128xbf16, #tpu.memory_space<vmem>>, %arg7: memref<1x1x2x128xf32, #tpu.memory_space<vmem>>, %arg8: memref<18x18x128xbf16, #tpu.memory_space<vmem>>) attributes {dimension_semantics = [#tpu.dimension_semantics<parallel>, #tpu.dimension_semantics<parallel>], iteration_bounds = array<i64: 2, 1>, scalar_prefetch = 0 : i64, scratch_operands = 1 : i64, tpu.core_type = #tpu.core_type<tc>, window_params = [{transform_indices = @transform_0, window_bounds = array<i64: 1, 16, 16, 128>}, {pipeline_mode = #tpu.pipeline_mode<synchronous>, transform_indices = @transform_1, window_bounds = array<i64: 1152, 128>}, {pipeline_mode = #tpu.pipeline_mode<synchronous>, transform_indices = @transform_2, window_bounds = array<i64: 1, 128>}, {pipeline_mode = #tpu.pipeline_mode<synchronous>, transform_indices = @transform_3, window_bounds = array<i64: 1, 128>}, {transform_indices = @transform_4, window_bounds = array<i64: 1, 256, 128>}, {transform_indices = @transform_5, window_bounds = array<i64: 1, 1, 2, 128>}]} {
    %c0 = arith.constant 0 : index
    %c0_0 = arith.constant 0 : index
    %0 = vector.load %arg4[%c0, %c0_0] : memref<1x128xf32, #tpu.memory_space<vmem>>, vector<1x128xf32>
    %1 = vector.shape_cast %0 : vector<1x128xf32> to vector<128xf32>
    %c0_1 = arith.constant 0 : index
    %c0_2 = arith.constant 0 : index
    %2 = vector.load %arg5[%c0_1, %c0_2] : memref<1x128xf32, #tpu.memory_space<vmem>>, vector<1x128xf32>
    %3 = vector.shape_cast %2 : vector<1x128xf32> to vector<128xf32>
    %cst = arith.constant 0.000000e+00 : bf16
    %4 = vector.broadcast %cst : bf16 to vector<18x18x128xbf16>
    %c0_3 = arith.constant 0 : index
    %c0_4 = arith.constant 0 : index
    %c0_5 = arith.constant 0 : index
    %5 = vector.load %arg8[%c0_3, %c0_4, %c0_5] : memref<18x18x128xbf16, #tpu.memory_space<vmem>>, vector<18x18x128xbf16>
    tpu.vector_store %arg8[%c0_3, %c0_4, %c0_5], %4 {strides = array<i32>} : memref<18x18x128xbf16, #tpu.memory_space<vmem>>, vector<18x18x128xbf16>,
    %c0_6 = arith.constant 0 : index
    %c0_7 = arith.constant 0 : index
    %c0_8 = arith.constant 0 : index
    %c0_9 = arith.constant 0 : index
    %6 = vector.load %arg2[%c0_6, %c0_7, %c0_8, %c0_9] : memref<1x16x16x128xbf16, #tpu.memory_space<vmem>>, vector<1x16x16x128xbf16>
    %7 = vector.shape_cast %6 : vector<1x16x16x128xbf16> to vector<16x16x128xbf16>
    %8 = arith.extf %7 : vector<16x16x128xbf16> to vector<16x16x128xf32>
    %9 = vector.shape_cast %1 : vector<128xf32> to vector<1x1x128xf32>
    %10 = vector.broadcast %9 : vector<1x1x128xf32> to vector<16x16x128xf32>
    %11 = arith.mulf %8, %10 : vector<16x16x128xf32>
    %12 = vector.shape_cast %3 : vector<128xf32> to vector<1x1x128xf32>
    %13 = vector.broadcast %12 : vector<1x1x128xf32> to vector<16x16x128xf32>
    %14 = arith.addf %11, %13 : vector<16x16x128xf32>
    %cst_10 = arith.constant 0.000000e+00 : f32
    %15 = vector.broadcast %cst_10 : f32 to vector<16x16x128xf32>
    %16 = arith.maximumf %14, %15 : vector<16x16x128xf32>
    %17 = arith.truncf %16 : vector<16x16x128xf32> to vector<16x16x128xbf16>
    %c1 = arith.constant 1 : index
    %c1_11 = arith.constant 1 : index
    %c0_12 = arith.constant 0 : index
    %18 = vector.load %arg8[%c1, %c1_11, %c0_12] : memref<18x18x128xbf16, #tpu.memory_space<vmem>>, vector<16x16x128xbf16>
    tpu.vector_store %arg8[%c1, %c1_11, %c0_12], %17 {strides = array<i32>} : memref<18x18x128xbf16, #tpu.memory_space<vmem>>, vector<16x16x128xbf16>,
    %c0_13 = arith.constant 0 : index
    %c0_14 = arith.constant 0 : index
    %c0_15 = arith.constant 0 : index
    %19 = vector.load %arg8[%c0_13, %c0_14, %c0_15] : memref<18x18x128xbf16, #tpu.memory_space<vmem>>, vector<18x18x128xbf16>
    %20 = vector.extract_strided_slice %19 {offsets = [0, 0, 0], sizes = [18, 16, 128], strides = [1, 1, 1]} : vector<18x18x128xbf16> to vector<18x16x128xbf16>
    %21 = vector.extract_strided_slice %19 {offsets = [0, 1, 0], sizes = [18, 16, 128], strides = [1, 1, 1]} : vector<18x18x128xbf16> to vector<18x16x128xbf16>
    %22 = vector.extract_strided_slice %19 {offsets = [0, 2, 0], sizes = [18, 16, 128], strides = [1, 1, 1]} : vector<18x18x128xbf16> to vector<18x16x128xbf16>
    %23 = tpu.concatenate %20, %21, %22 in 2 : vector<18x16x128xbf16>, vector<18x16x128xbf16>, vector<18x16x128xbf16> -> vector<18x16x384xbf16>
    %24 = vector.extract_strided_slice %23 {offsets = [0, 0, 0], sizes = [16, 16, 384], strides = [1, 1, 1]} : vector<18x16x384xbf16> to vector<16x16x384xbf16>
    %25 = vector.extract_strided_slice %23 {offsets = [1, 0, 0], sizes = [16, 16, 384], strides = [1, 1, 1]} : vector<18x16x384xbf16> to vector<16x16x384xbf16>
    %26 = vector.extract_strided_slice %23 {offsets = [2, 0, 0], sizes = [16, 16, 384], strides = [1, 1, 1]} : vector<18x16x384xbf16> to vector<16x16x384xbf16>
    %27 = tpu.concatenate %24, %25, %26 in 2 : vector<16x16x384xbf16>, vector<16x16x384xbf16>, vector<16x16x384xbf16> -> vector<16x16x1152xbf16>
    %28 = vector.shape_cast %27 : vector<16x16x1152xbf16> to vector<256x1152xbf16>
    %c0_16 = arith.constant 0 : index
    %c0_17 = arith.constant 0 : index
    %29 = vector.load %arg3[%c0_16, %c0_17] : memref<1152x128xbf16, #tpu.memory_space<vmem>>, vector<1152x128xbf16>
    %cst_18 = arith.constant dense<0.000000e+00> : vector<256x128xf32>
    %30 = tpu.matmul %28, %29, %cst_18 {dimension_numbers = #tpu.dot_dimension_numbers<[1], [0], [0], [1], [0, 0, 1, 1], [], []>} : vector<256x1152xbf16>, vector<1152x128xbf16>, vector<256x128xf32> -> vector<256x128xf32>
    %31 = arith.truncf %30 : vector<256x128xf32> to vector<256x128xbf16>
    %c0_19 = arith.constant 0 : index
    %c0_20 = arith.constant 0 : index
    %c0_21 = arith.constant 0 : index
    %32 = vector.load %arg6[%c0_19, %c0_20, %c0_21] : memref<1x256x128xbf16, #tpu.memory_space<vmem>>, vector<1x256x128xbf16>
    %33 = vector.shape_cast %32 : vector<1x256x128xbf16> to vector<256x128xbf16>
    %34 = vector.shape_cast %31 : vector<256x128xbf16> to vector<1x256x128xbf16>
    tpu.vector_store %arg6[%c0_19, %c0_20, %c0_21], %34 {strides = array<i32>} : memref<1x256x128xbf16, #tpu.memory_space<vmem>>, vector<1x256x128xbf16>,
    %35 = arith.extf %31 : vector<256x128xbf16> to vector<256x128xf32>
    %cst_22 = arith.constant dense<0.000000e+00> : vector<128xf32>
    %36 = vector.multi_reduction <add>, %35, %cst_22 [0] : vector<256x128xf32> to vector<128xf32>
    %37 = vector.shape_cast %36 : vector<128xf32> to vector<1x128xf32>
    %38 = arith.mulf %35, %35 : vector<256x128xf32>
    %cst_23 = arith.constant dense<0.000000e+00> : vector<128xf32>
    %39 = vector.multi_reduction <add>, %38, %cst_23 [0] : vector<256x128xf32> to vector<128xf32>
    %40 = vector.shape_cast %39 : vector<128xf32> to vector<1x128xf32>
    %41 = tpu.concatenate %37, %40 in 0 : vector<1x128xf32>, vector<1x128xf32> -> vector<2x128xf32>
    %42 = vector.shape_cast %41 : vector<2x128xf32> to vector<1x1x2x128xf32>
    %c0_24 = arith.constant 0 : index
    %c0_25 = arith.constant 0 : index
    %c0_26 = arith.constant 0 : index
    %c0_27 = arith.constant 0 : index
    %43 = vector.load %arg7[%c0_24, %c0_25, %c0_26, %c0_27] : memref<1x1x2x128xf32, #tpu.memory_space<vmem>>, vector<1x1x2x128xf32>
    tpu.vector_store %arg7[%c0_24, %c0_25, %c0_26, %c0_27], %42 {strides = array<i32>} : memref<1x1x2x128xf32, #tpu.memory_space<vmem>>, vector<1x1x2x128xf32>,
    return
  }
  func.func @transform_0(%arg0: i32, %arg1: i32) -> (i32, i32, i32, i32) {
    %c0_i32 = arith.constant 0 : i32
    %c0_i32_0 = arith.constant 0 : i32
    %c0_i32_1 = arith.constant 0 : i32
    %c0_i32_2 = arith.constant 0 : i32
    return %arg0, %c0_i32, %c0_i32_0, %c0_i32_1 : i32, i32, i32, i32
  }
  func.func @transform_1(%arg0: i32, %arg1: i32) -> (i32, i32) {
    %c0_i32 = arith.constant 0 : i32
    %c0_i32_0 = arith.constant 0 : i32
    %c0_i32_1 = arith.constant 0 : i32
    return %c0_i32, %c0_i32_0 : i32, i32
  }
  func.func @transform_2(%arg0: i32, %arg1: i32) -> (i32, i32) {
    %c0_i32 = arith.constant 0 : i32
    %c0_i32_0 = arith.constant 0 : i32
    %c0_i32_1 = arith.constant 0 : i32
    return %c0_i32, %c0_i32_0 : i32, i32
  }
  func.func @transform_3(%arg0: i32, %arg1: i32) -> (i32, i32) {
    %c0_i32 = arith.constant 0 : i32
    %c0_i32_0 = arith.constant 0 : i32
    %c0_i32_1 = arith.constant 0 : i32
    return %c0_i32, %c0_i32_0 : i32, i32
  }
  func.func @transform_4(%arg0: i32, %arg1: i32) -> (i32, i32, i32) {
    %c0_i32 = arith.constant 0 : i32
    %c0_i32_0 = arith.constant 0 : i32
    return %arg0, %arg1, %c0_i32 : i32, i32, i32
  }
  func.func @transform_5(%arg0: i32, %arg1: i32) -> (i32, i32, i32, i32) {
    %c0_i32 = arith.constant 0 : i32
    %c0_i32_0 = arith.constant 0 : i32
    %c0_i32_1 = arith.constant 0 : i32
    return %arg0, %arg1, %c0_i32, %c0_i32_0 : i32, i32, i32, i32
  }
}

module attributes {stable_mosaic.version = 11 : i64} {
  func.func @kernel(%arg0: i32, %arg1: i32, %arg2: memref<1x256x128xbf16, #tpu.memory_space<vmem>>, %arg3: memref<1x256x8xf32, #tpu.memory_space<vmem>>, %arg4: memref<1x128xf32, #tpu.memory_space<vmem>>, %arg5: memref<1x128xf32, #tpu.memory_space<vmem>>, %arg6: memref<1x256x128xf32, #tpu.memory_space<vmem>>) attributes {dimension_semantics = [#tpu.dimension_semantics<parallel>, #tpu.dimension_semantics<parallel>], iteration_bounds = array<i64: 2, 1>, scalar_prefetch = 0 : i64, scratch_operands = 0 : i64, tpu.core_type = #tpu.core_type<tc>, window_params = [{transform_indices = @transform_0, window_bounds = array<i64: 1, 256, 128>}, {transform_indices = @transform_1, window_bounds = array<i64: 1, 256, 8>}, {pipeline_mode = #tpu.pipeline_mode<synchronous>, transform_indices = @transform_2, window_bounds = array<i64: 1, 128>}, {pipeline_mode = #tpu.pipeline_mode<synchronous>, transform_indices = @transform_3, window_bounds = array<i64: 1, 128>}, {transform_indices = @transform_4, window_bounds = array<i64: 1, 256, 128>}]} {
    %c0 = arith.constant 0 : index
    %c0_0 = arith.constant 0 : index
    %c0_1 = arith.constant 0 : index
    %0 = vector.load %arg2[%c0, %c0_0, %c0_1] : memref<1x256x128xbf16, #tpu.memory_space<vmem>>, vector<1x256x128xbf16>
    %1 = vector.shape_cast %0 : vector<1x256x128xbf16> to vector<256x128xbf16>
    %2 = arith.extf %1 : vector<256x128xbf16> to vector<256x128xf32>
    %c0_2 = arith.constant 0 : index
    %c0_3 = arith.constant 0 : index
    %c0_4 = arith.constant 0 : index
    %3 = vector.load %arg3[%c0_2, %c0_3, %c0_4] : memref<1x256x8xf32, #tpu.memory_space<vmem>>, vector<1x256x8xf32>
    %4 = vector.shape_cast %3 : vector<1x256x8xf32> to vector<256x8xf32>
    %cst = arith.constant 0.000000e+00 : f32
    %5 = vector.broadcast %cst : f32 to vector<256x120xf32>
    %6 = tpu.concatenate %4, %5 in 1 : vector<256x8xf32>, vector<256x120xf32> -> vector<256x128xf32>
    %c0_5 = arith.constant 0 : index
    %c0_6 = arith.constant 0 : index
    %7 = vector.load %arg4[%c0_5, %c0_6] : memref<1x128xf32, #tpu.memory_space<vmem>>, vector<1x128xf32>
    %8 = vector.broadcast %7 : vector<1x128xf32> to vector<256x128xf32>
    %9 = arith.mulf %2, %8 : vector<256x128xf32>
    %c0_7 = arith.constant 0 : index
    %c0_8 = arith.constant 0 : index
    %10 = vector.load %arg5[%c0_7, %c0_8] : memref<1x128xf32, #tpu.memory_space<vmem>>, vector<1x128xf32>
    %11 = vector.broadcast %10 : vector<1x128xf32> to vector<256x128xf32>
    %12 = arith.addf %9, %11 : vector<256x128xf32>
    %13 = arith.addf %12, %6 : vector<256x128xf32>
    %cst_9 = arith.constant 0.000000e+00 : f32
    %14 = vector.broadcast %cst_9 : f32 to vector<256x128xf32>
    %15 = arith.maximumf %13, %14 : vector<256x128xf32>
    %c0_10 = arith.constant 0 : index
    %c0_11 = arith.constant 0 : index
    %c0_12 = arith.constant 0 : index
    %16 = vector.load %arg6[%c0_10, %c0_11, %c0_12] : memref<1x256x128xf32, #tpu.memory_space<vmem>>, vector<1x256x128xf32>
    %17 = vector.shape_cast %16 : vector<1x256x128xf32> to vector<256x128xf32>
    %18 = vector.shape_cast %15 : vector<256x128xf32> to vector<1x256x128xf32>
    tpu.vector_store %arg6[%c0_10, %c0_11, %c0_12], %18 {strides = array<i32>} : memref<1x256x128xf32, #tpu.memory_space<vmem>>, vector<1x256x128xf32>,
    return
  }
  func.func @transform_0(%arg0: i32, %arg1: i32) -> (i32, i32, i32) {
    %c0_i32 = arith.constant 0 : i32
    %c0_i32_0 = arith.constant 0 : i32
    return %arg0, %arg1, %c0_i32 : i32, i32, i32
  }
  func.func @transform_1(%arg0: i32, %arg1: i32) -> (i32, i32, i32) {
    %c0_i32 = arith.constant 0 : i32
    %c0_i32_0 = arith.constant 0 : i32
    return %arg0, %arg1, %c0_i32 : i32, i32, i32
  }
  func.func @transform_2(%arg0: i32, %arg1: i32) -> (i32, i32) {
    %c0_i32 = arith.constant 0 : i32
    %c0_i32_0 = arith.constant 0 : i32
    %c0_i32_1 = arith.constant 0 : i32
    return %c0_i32, %c0_i32_0 : i32, i32
  }
  func.func @transform_3(%arg0: i32, %arg1: i32) -> (i32, i32) {
    %c0_i32 = arith.constant 0 : i32
    %c0_i32_0 = arith.constant 0 : i32
    %c0_i32_1 = arith.constant 0 : i32
    return %c0_i32, %c0_i32_0 : i32, i32
  }
  func.func @transform_4(%arg0: i32, %arg1: i32) -> (i32, i32, i32) {
    %c0_i32 = arith.constant 0 : i32
    %c0_i32_0 = arith.constant 0 : i32
    return %arg0, %arg1, %c0_i32 : i32, i32, i32
  }
}

</mosaic_0001>

<bundles_post_ra>
// kernel: residual_block_forward.5
= control target key start
LH: loop header
LB: loop body
LE: loop exit
PB: predicated region body
PF: predicated region fallthrough
CT: control target
= control target key end

     0   :  { %s851_s15 = smov 0   ;;  %s853_s16 = smov 0   ;;  %s1087_s0 = inlined_call_operand.vmem [shape: bf16[2,256,128], index: 0, kind: input, shape index: {}]   ;;  %s1088_s1 = inlined_call_operand.vmem [shape: f32[2,256,8], index: 1, kind: input, shape index: {}]   ;;  %s1089_s2 = inlined_call_operand.vmem [shape: f32[1,128], index: 2, kind: input, shape index: {}]   ;;  %s1090_s3 = inlined_call_operand.vmem [shape: f32[1,128], index: 3, kind: input, shape index: {}]   ;;  %s1091_s4 = inlined_call_operand.vmem [shape: f32[2,256,128], index: 4, kind: output, shape index: {}]  }
   0x1   :  { %s855_s17 = smov 0  }
   0x2 LB: > { %s26_s18 = sadd.s32 1, %s820_s16  ;;  %p685_p0 = scmp.ge.s32.totalorder %s824_s17, 1  ;;  %s824_s17 = sphi %s855_s17, %s14_s17   ;;  %s820_s16 = sphi %s853_s16, %s1093_s16   ;;  %s816_s15 = sphi %s851_s15, %s1092_s15  }
   0x3   : > { %p28_p1 = scmp.ge.s32.totalorder %s26_s18, 2  ;;  %p200_p2 = scmp.lt.s32.totalorder %s824_s17, 3 }
   0x5   : > { %s1095_s18 = smov (%p28_p1, %s26_s18), 0  ;;  %p201_p3 = pnand %p685_p0, %p200_p2 }
   0x6   : > { %p244_p4 = scmp.lt.s32.totalorder (!%p201_p3), %s816_s15, 1 }
   0x7   : > { %204 = sbr.rel (%p201_p3) target bundleno = 70 (0x46), region = 36 }
   0xc   : > { %s1097_s15 = smov (!%p244_p4, %s816_s15), 1  ;;  %vm369_vm0 = vcmask 64512   ;;  %v888_v0 = vld [vmem:[%s1089_s2] ss:$0 sm:$0xff] }
   0xd   : > { %s696_s19 = sshll.u32 %s1097_s15, 7  ;;  %s697_s20 = sshll.u32 %s1097_s15, 8  ;;  %v895_v3 = vld [vmem:[%s1090_s3] ss:$0 sm:$0xff] }
   0xe   : > { %s876_s23 = scalar_lea.vmem %s1087_s0, %s696_s19  ;;  %s883_s26 = scalar_lea.vmem %s1088_s1, %s697_s20 }
   0xf   : > { %v700_v1 = vld [vmem:[%s876_s23] sm:$0xff]   ;;  %v338_v4 = vld [vmem:[%s883_s26 + $0x8] sm:$0xff]  ;;  %v339_v10 = vld [vmem:[%s883_s26 + $0x10] sm:$0xff]  ;;  %s931_s7 = scalar_lea.vmem %s1091_s4, %s697_s20 }
  0x10   : > { %v337_v2 = vld [vmem:[%s883_s26] sm:$0xff]  ;;  %v701_v5 = vunpack.c.l.bf16 %v700_v1  ;;  %v702_v7 = vunpack.c.h.bf16 %v700_v1  ;;  %v371_v8 = vsel %vm369_vm0, %v338_v4, 0.0  ;;  %v763_v9 = vld [vmem:[%s876_s23 + $0x8] sm:$0xff]   ;;  %v340_v11 = vld [vmem:[%s883_s26 + $0x18] sm:$0xff]  ;;  %v372_v13 = vsel %vm369_vm0, %v339_v10, 0.0 }
  0x11   : > { %v370_v6 = vsel %vm369_vm0, %v337_v2, 0.0  ;;  %v705_v12 = vunpack.c.l.bf16 %v763_v9  ;;  %v706_v14 = vunpack.c.h.bf16 %v763_v9  ;;  %v373_v15 = vsel %vm369_vm0, %v340_v11, 0.0  ;;  %v764_v16 = vld [vmem:[%s876_s23 + $0x10] sm:$0xff]   ;;  %v341_v17 = vld [vmem:[%s883_s26 + $0x20] sm:$0xff]  ;;  %v342_v18 = vld [vmem:[%s883_s26 + $0x28] sm:$0xff] }
  0x12   : > { %v409_v19 = vmul.f32 %v701_v5, %v888_v0  ;;  %v410_v20 = vmul.f32 %v702_v7, %v888_v0  ;;  %v709_v21 = vunpack.c.l.bf16 %v764_v16  ;;  %v374_v22 = vsel %vm369_vm0, %v341_v17, 0.0  ;;  %v765_v23 = vld [vmem:[%s876_s23 + $0x18] sm:$0xff]   ;;  %v343_v24 = vld [vmem:[%s883_s26 + $0x30] sm:$0xff]  ;;  %v766_v46 = vld [vmem:[%s876_s23 + $0x20] sm:$0xff]  }
  0x13   : > { %v411_v25 = vmul.f32 %v705_v12, %v888_v0  ;;  %v412_v26 = vmul.f32 %v706_v14, %v888_v0  ;;  %v710_v27 = vunpack.c.h.bf16 %v764_v16  ;;  %v375_v28 = vsel %vm369_vm0, %v342_v18, 0.0  ;;  %v344_v41 = vld [vmem:[%s883_s26 + $0x38] sm:$0xff]  ;;  %v345_v51 = vld [vmem:[%s883_s26 + $0x40] sm:$0xff]  ;;  %v346_v52 = vld [vmem:[%s883_s26 + $0x48] sm:$0xff] }
  0x14   : > { %v448_v29 = vadd.f32 %v895_v3, %v409_v19  ;;  %v449_v30 = vadd.f32 %v895_v3, %v410_v20  ;;  %v413_v31 = vmul.f32 %v709_v21, %v888_v0  ;;  %v713_v32 = vunpack.c.l.bf16 %v765_v23  ;;  %v767_v57 = vld [vmem:[%s876_s23 + $0x28] sm:$0xff]   ;;  %v347_v62 = vld [vmem:[%s883_s26 + $0x50] sm:$0xff]  ;;  %v348_v63 = vld [vmem:[%s883_s26 + $0x58] sm:$0xff] }
  0x15   : > { %v450_v33 = vadd.f32 %v895_v3, %v411_v25  ;;  %v451_v34 = vadd.f32 %v895_v3, %v412_v26  ;;  %v414_v35 = vmul.f32 %v710_v27, %v888_v0  ;;  %v376_v36 = vsel %vm369_vm0, %v343_v24, 0.0  ;;  %v349_v11 = vld [vmem:[%s883_s26 + $0x60] sm:$0xff]  ;;  %v350_v20 = vld [vmem:[%s883_s26 + $0x68] sm:$0xff]  ;;  %v769_v25 = vld [vmem:[%s876_s23 + $0x38] sm:$0xff]  }
  0x16   : > { %v480_v37 = vadd.f32 %v448_v29, %v370_v6  ;;  %v481_v38 = vadd.f32 %v449_v30, %v371_v8  ;;  %v452_v39 = vadd.f32 %v895_v3, %v413_v31  ;;  %v415_v40 = vmul.f32 %v713_v32, %v888_v0  ;;  %v768_v6 = vld [vmem:[%s876_s23 + $0x30] sm:$0xff]  }
  0x17   : > { %v482_v42 = vadd.f32 %v450_v33, %v372_v13  ;;  %v483_v43 = vadd.f32 %v451_v34, %v373_v15  ;;  %v453_v44 = vadd.f32 %v895_v3, %v414_v35  ;;  %v714_v45 = vunpack.c.h.bf16 %v765_v23 }
  0x18   : > { %v512_v47 = vmax.f32 %v480_v37, 0.0  ;;  %v513_v48 = vmax.f32 %v481_v38, 0.0  ;;  %v484_v49 = vadd.f32 %v452_v39, %v374_v22  ;;  %v454_v50 = vadd.f32 %v895_v3, %v415_v40  ;;  %v351_v38 = vld [vmem:[%s883_s26 + $0x70] sm:$0xff]  ;;  %v770_v39 = vld [vmem:[%s876_s23 + $0x40] sm:$0xff]  }
  0x19   : > { %v514_v53 = vmax.f32 %v482_v42, 0.0  ;;  %v515_v54 = vmax.f32 %v483_v43, 0.0  ;;  %v485_v55 = vadd.f32 %v453_v44, %v375_v28  ;;  %v377_v56 = vsel %vm369_vm0, %v344_v41, 0.0  ;;  %v352_v43 = vld [vmem:[%s883_s26 + $0x78] sm:$0xff] }
  0x1a   : > { %544 = vst [vmem:[%s931_s7] sm:$0xff] %v512_v47  ;;  %545 = vst [vmem:[%s931_s7 + $0x8] sm:$0xff] %v513_v48  ;;  %v516_v58 = vmax.f32 %v484_v49, 0.0  ;;  %v486_v59 = vadd.f32 %v454_v50, %v376_v36  ;;  %v416_v60 = vmul.f32 %v714_v45, %v888_v0  ;;  %v717_v61 = vunpack.c.l.bf16 %v766_v46  ;;  %v353_v48 = vld [vmem:[%s883_s26 + $0x80] sm:$0xff] }
  0x1b   : > { %546 = vst [vmem:[%s931_s7 + $0x10] sm:$0xff] %v514_v53  ;;  %547 = vst [vmem:[%s931_s7 + $0x18] sm:$0xff] %v515_v54  ;;  %v517_v1 = vmax.f32 %v485_v55, 0.0  ;;  %v378_v2 = vsel %vm369_vm0, %v345_v51, 0.0  ;;  %v718_v4 = vunpack.c.h.bf16 %v766_v46  ;;  %v379_v5 = vsel %vm369_vm0, %v346_v52, 0.0  ;;  %v354_v53 = vld [vmem:[%s883_s26 + $0x88] sm:$0xff] }
  0x1c   : > { %548 = vst [vmem:[%s931_s7 + $0x20] sm:$0xff] %v516_v58  ;;  %v518_v7 = vmax.f32 %v486_v59, 0.0  ;;  %v455_v8 = vadd.f32 %v895_v3, %v416_v60  ;;  %v417_v9 = vmul.f32 %v717_v61, %v888_v0  ;;  %v721_v10 = vunpack.c.l.bf16 %v767_v57  ;;  %v771_v54 = vld [vmem:[%s876_s23 + $0x48] sm:$0xff]   ;;  %v355_v59 = vld [vmem:[%s883_s26 + $0x90] sm:$0xff] }
  0x1d   : > { %549 = vst [vmem:[%s931_s7 + $0x28] sm:$0xff] %v517_v1  ;;  %v418_v12 = vmul.f32 %v718_v4, %v888_v0  ;;  %v380_v13 = vsel %vm369_vm0, %v347_v62, 0.0  ;;  %v722_v14 = vunpack.c.h.bf16 %v767_v57  ;;  %v381_v15 = vsel %vm369_vm0, %v348_v63, 0.0  ;;  %v772_v1 = vld [vmem:[%s876_s23 + $0x50] sm:$0xff]  }
  0x1e   : > { %550 = vst [vmem:[%s931_s7 + $0x30] sm:$0xff] %v518_v7  ;;  %v487_v16 = vadd.f32 %v455_v8, %v377_v56  ;;  %v456_v17 = vadd.f32 %v895_v3, %v417_v9  ;;  %v419_v18 = vmul.f32 %v721_v10, %v888_v0  ;;  %v725_v19 = vunpack.c.l.bf16 %v768_v6  ;;  %v356_v7 = vld [vmem:[%s883_s26 + $0x98] sm:$0xff] }
  0x1f   : > { %v457_v21 = vadd.f32 %v895_v3, %v418_v12  ;;  %v420_v22 = vmul.f32 %v722_v14, %v888_v0  ;;  %v382_v23 = vsel %vm369_vm0, %v349_v11, 0.0  ;;  %v726_v24 = vunpack.c.h.bf16 %v768_v6 }
  0x20   : > { %v519_v26 = vmax.f32 %v487_v16, 0.0  ;;  %v488_v27 = vadd.f32 %v456_v17, %v378_v2  ;;  %v458_v28 = vadd.f32 %v895_v3, %v419_v18  ;;  %v421_v29 = vmul.f32 %v725_v19, %v888_v0  ;;  %v357_v16 = vld [vmem:[%s883_s26 + $0xa0] sm:$0xff] }
  0x21   : > { %v489_v30 = vadd.f32 %v457_v21, %v379_v5  ;;  %v459_v31 = vadd.f32 %v895_v3, %v420_v22  ;;  %v383_v32 = vsel %vm369_vm0, %v350_v20, 0.0  ;;  %v422_v33 = vmul.f32 %v726_v24, %v888_v0  ;;  %v773_v21 = vld [vmem:[%s876_s23 + $0x58] sm:$0xff]  }
  0x22   : > { %551 = vst [vmem:[%s931_s7 + $0x38] sm:$0xff] %v519_v26  ;;  %v520_v34 = vmax.f32 %v488_v27, 0.0  ;;  %v490_v35 = vadd.f32 %v458_v28, %v380_v13  ;;  %v460_v36 = vadd.f32 %v895_v3, %v421_v29  ;;  %v729_v37 = vunpack.c.l.bf16 %v769_v25  ;;  %v358_v26 = vld [vmem:[%s883_s26 + $0xa8] sm:$0xff] }
  0x23   : > { %v521_v40 = vmax.f32 %v489_v30, 0.0  ;;  %v491_v41 = vadd.f32 %v459_v31, %v381_v15  ;;  %v461_v42 = vadd.f32 %v895_v3, %v422_v33  ;;  %v730_v47 = vunpack.c.h.bf16 %v769_v25 }
  0x24   : > { %552 = vst [vmem:[%s931_s7 + $0x40] sm:$0xff] %v520_v34  ;;  %v522_v44 = vmax.f32 %v490_v35, 0.0  ;;  %v492_v45 = vadd.f32 %v460_v36, %v382_v23  ;;  %v423_v46 = vmul.f32 %v729_v37, %v888_v0  ;;  %v384_v51 = vsel %vm369_vm0, %v351_v38, 0.0  ;;  %v359_v35 = vld [vmem:[%s883_s26 + $0xb0] sm:$0xff]  ;;  %v774_v36 = vld [vmem:[%s876_s23 + $0x60] sm:$0xff]  }
  0x25   : > { %553 = vst [vmem:[%s931_s7 + $0x48] sm:$0xff] %v521_v40  ;;  %v523_v49 = vmax.f32 %v491_v41, 0.0  ;;  %v493_v50 = vadd.f32 %v461_v42, %v383_v32  ;;  %v733_v52 = vunpack.c.l.bf16 %v770_v39  ;;  %v385_v57 = vsel %vm369_vm0, %v352_v43, 0.0  ;;  %v360_v41 = vld [vmem:[%s883_s26 + $0xb8] sm:$0xff] }
  0x26   : > { %554 = vst [vmem:[%s931_s7 + $0x50] sm:$0xff] %v522_v44  ;;  %v524_v55 = vmax.f32 %v492_v45, 0.0  ;;  %v462_v56 = vadd.f32 %v895_v3, %v423_v46  ;;  %v424_v58 = vmul.f32 %v730_v47, %v888_v0  ;;  %v386_v61 = vsel %vm369_vm0, %v353_v48, 0.0  ;;  %v361_v46 = vld [vmem:[%s883_s26 + $0xc0] sm:$0xff] }
  0x27   : > { %555 = vst [vmem:[%s931_s7 + $0x58] sm:$0xff] %v523_v49  ;;  %v525_v60 = vmax.f32 %v493_v50, 0.0  ;;  %v425_v62 = vmul.f32 %v733_v52, %v888_v0  ;;  %v734_v63 = vunpack.c.h.bf16 %v770_v39  ;;  %v387_v5 = vsel %vm369_vm0, %v354_v53, 0.0  ;;  %v775_v52 = vld [vmem:[%s876_s23 + $0x68] sm:$0xff]  }
  0x28   : > { %556 = vst [vmem:[%s931_s7 + $0x60] sm:$0xff] %v524_v55  ;;  %v494_v2 = vadd.f32 %v462_v56, %v384_v51  ;;  %v463_v4 = vadd.f32 %v895_v3, %v424_v58  ;;  %v737_v6 = vunpack.c.l.bf16 %v771_v54  ;;  %v388_v10 = vsel %vm369_vm0, %v355_v59, 0.0  ;;  %v362_v51 = vld [vmem:[%s883_s26 + $0xc8] sm:$0xff] }
  0x29   : > { %557 = vst [vmem:[%s931_s7 + $0x68] sm:$0xff] %v525_v60  ;;  %v464_v8 = vadd.f32 %v895_v3, %v425_v62  ;;  %v426_v9 = vmul.f32 %v734_v63, %v888_v0  ;;  %v738_v11 = vunpack.c.h.bf16 %v771_v54  ;;  %v741_v15 = vunpack.c.l.bf16 %v772_v1  ;;  %v776_v62 = vld [vmem:[%s876_s23 + $0x70] sm:$0xff]  }
  0x2a   : > { %v526_v12 = vmax.f32 %v494_v2, 0.0  ;;  %v495_v13 = vadd.f32 %v463_v4, %v385_v57  ;;  %v427_v14 = vmul.f32 %v737_v6, %v888_v0  ;;  %v389_v19 = vsel %vm369_vm0, %v356_v7, 0.0 }
  0x2b   : > { %v496_v17 = vadd.f32 %v464_v8, %v386_v61  ;;  %v465_v18 = vadd.f32 %v895_v3, %v426_v9  ;;  %v428_v20 = vmul.f32 %v738_v11, %v888_v0  ;;  %v429_v24 = vmul.f32 %v741_v15, %v888_v0  ;;  %v363_v61 = vld [vmem:[%s883_s26 + $0xd0] sm:$0xff]  ;;  %v364_v9 = vld [vmem:[%s883_s26 + $0xd8] sm:$0xff] }
  0x2c   : > { %558 = vst [vmem:[%s931_s7 + $0x70] sm:$0xff] %v526_v12  ;;  %v527_v22 = vmax.f32 %v495_v13, 0.0  ;;  %v466_v23 = vadd.f32 %v895_v3, %v427_v14  ;;  %v742_v25 = vunpack.c.h.bf16 %v772_v1  ;;  %v390_v30 = vsel %vm369_vm0, %v357_v16, 0.0  ;;  %v365_v14 = vld [vmem:[%s883_s26 + $0xe0] sm:$0xff] }
  0x2d   : > { %v528_v27 = vmax.f32 %v496_v17, 0.0  ;;  %v497_v28 = vadd.f32 %v465_v18, %v387_v5  ;;  %v467_v29 = vadd.f32 %v895_v3, %v428_v20  ;;  %v468_v32 = vadd.f32 %v895_v3, %v429_v24  ;;  %v366_v24 = vld [vmem:[%s883_s26 + $0xe8] sm:$0xff] }
  0x2e   : > { %559 = vst [vmem:[%s931_s7 + $0x78] sm:$0xff] %v527_v22  ;;  %v498_v31 = vadd.f32 %v466_v23, %v388_v10  ;;  %v430_v33 = vmul.f32 %v742_v25, %v888_v0  ;;  %v745_v34 = vunpack.c.l.bf16 %v773_v21  ;;  %v391_v39 = vsel %vm369_vm0, %v358_v26, 0.0 }
  0x2f   : > { %560 = vst [vmem:[%s931_s7 + $0x80] sm:$0xff] %v528_v27  ;;  %v529_v37 = vmax.f32 %v497_v28, 0.0  ;;  %v499_v38 = vadd.f32 %v467_v29, %v389_v19  ;;  %v746_v40 = vunpack.c.h.bf16 %v773_v21  ;;  %v500_v43 = vadd.f32 %v468_v32, %v390_v30  ;;  %v777_v19 = vld [vmem:[%s876_s23 + $0x78] sm:$0xff]  }
  0x30   : > { %v530_v42 = vmax.f32 %v498_v31, 0.0  ;;  %v469_v44 = vadd.f32 %v895_v3, %v430_v33  ;;  %v431_v45 = vmul.f32 %v745_v34, %v888_v0  ;;  %v392_v48 = vsel %vm369_vm0, %v359_v35, 0.0  ;;  %v367_v33 = vld [vmem:[%s883_s26 + $0xf0] sm:$0xff] }
  0x31   : > { %561 = vst [vmem:[%s931_s7 + $0x88] sm:$0xff] %v529_v37  ;;  %v531_v47 = vmax.f32 %v499_v38, 0.0  ;;  %v432_v49 = vmul.f32 %v746_v40, %v888_v0  ;;  %v749_v50 = vunpack.c.l.bf16 %v774_v36  ;;  %v532_v53 = vmax.f32 %v500_v43, 0.0  ;;  %v368_v38 = vld [vmem:[%s883_s26 + $0xf8] sm:$0xff] }
  0x32   : > { %562 = vst [vmem:[%s931_s7 + $0x90] sm:$0xff] %v530_v42  ;;  %v501_v54 = vadd.f32 %v469_v44, %v391_v39  ;;  %v470_v55 = vadd.f32 %v895_v3, %v431_v45  ;;  %v393_v56 = vsel %vm369_vm0, %v360_v41, 0.0  ;;  %v394_v58 = vsel %vm369_vm0, %v361_v46, 0.0 }
  0x33   : > { %563 = vst [vmem:[%s931_s7 + $0x98] sm:$0xff] %v531_v47  ;;  %v471_v57 = vadd.f32 %v895_v3, %v432_v49  ;;  %v433_v59 = vmul.f32 %v749_v50, %v888_v0  ;;  %v750_v60 = vunpack.c.h.bf16 %v774_v36  ;;  %564 = vst [vmem:[%s931_s7 + $0xa0] sm:$0xff] %v532_v53  ;;  %v395_v2 = vsel %vm369_vm0, %v362_v51, 0.0 }
  0x34   : > { %v533_v63 = vmax.f32 %v501_v54, 0.0  ;;  %v502_v1 = vadd.f32 %v470_v55, %v392_v48  ;;  %v753_v4 = vunpack.c.l.bf16 %v775_v52  ;;  %v754_v8 = vunpack.c.h.bf16 %v775_v52 }
  0x35   : > { %v503_v5 = vadd.f32 %v471_v57, %v393_v56  ;;  %v472_v6 = vadd.f32 %v895_v3, %v433_v59  ;;  %v434_v7 = vmul.f32 %v750_v60, %v888_v0  ;;  %v396_v11 = vsel %vm369_vm0, %v363_v61, 0.0 }
  0x36   : > { %565 = vst [vmem:[%s931_s7 + $0xa8] sm:$0xff] %v533_v63  ;;  %v534_v10 = vmax.f32 %v502_v1, 0.0  ;;  %v435_v12 = vmul.f32 %v753_v4, %v888_v0  ;;  %v757_v13 = vunpack.c.l.bf16 %v776_v62  ;;  %v436_v18 = vmul.f32 %v754_v8, %v888_v0 }
  0x37   : > { %v535_v15 = vmax.f32 %v503_v5, 0.0  ;;  %v504_v16 = vadd.f32 %v472_v6, %v394_v58  ;;  %v473_v17 = vadd.f32 %v895_v3, %v434_v7  ;;  %v397_v21 = vsel %vm369_vm0, %v364_v9, 0.0 }
  0x38   : > { %566 = vst [vmem:[%s931_s7 + $0xb0] sm:$0xff] %v534_v10  ;;  %v474_v20 = vadd.f32 %v895_v3, %v435_v12  ;;  %v437_v22 = vmul.f32 %v757_v13, %v888_v0  ;;  %v758_v23 = vunpack.c.h.bf16 %v776_v62  ;;  %v475_v27 = vadd.f32 %v895_v3, %v436_v18 }
  0x39   : > { %567 = vst [vmem:[%s931_s7 + $0xb8] sm:$0xff] %v535_v15  ;;  %v536_v25 = vmax.f32 %v504_v16, 0.0  ;;  %v505_v26 = vadd.f32 %v473_v17, %v395_v2  ;;  %v398_v28 = vsel %vm369_vm0, %v365_v14, 0.0  ;;  %v761_v32 = vunpack.c.l.bf16 %v777_v19 }
  0x3a   : > { %v506_v29 = vadd.f32 %v474_v20, %v396_v11  ;;  %v476_v30 = vadd.f32 %v895_v3, %v437_v22  ;;  %v438_v31 = vmul.f32 %v758_v23, %v888_v0  ;;  %v507_v35 = vadd.f32 %v475_v27, %v397_v21 }
  0x3b   : > { %568 = vst [vmem:[%s931_s7 + $0xc0] sm:$0xff] %v536_v25  ;;  %v537_v34 = vmax.f32 %v505_v26, 0.0  ;;  %v399_v36 = vsel %vm369_vm0, %v366_v24, 0.0  ;;  %v762_v37 = vunpack.c.h.bf16 %v777_v19  ;;  %v439_v42 = vmul.f32 %v761_v32, %v888_v0 }
  0x3c   : > { %v538_v39 = vmax.f32 %v506_v29, 0.0  ;;  %v508_v40 = vadd.f32 %v476_v30, %v398_v28  ;;  %v477_v41 = vadd.f32 %v895_v3, %v438_v31  ;;  %v539_v43 = vmax.f32 %v507_v35, 0.0 }
  0x3d   : > { %569 = vst [vmem:[%s931_s7 + $0xc8] sm:$0xff] %v537_v34  ;;  %v400_v44 = vsel %vm369_vm0, %v367_v33, 0.0  ;;  %v440_v45 = vmul.f32 %v762_v37, %v888_v0  ;;  %v478_v48 = vadd.f32 %v895_v3, %v439_v42  ;;  %v401_v49 = vsel %vm369_vm0, %v368_v38, 0.0 }
  0x3e   : > { %570 = vst [vmem:[%s931_s7 + $0xd0] sm:$0xff] %v538_v39  ;;  %v540_v46 = vmax.f32 %v508_v40, 0.0  ;;  %v509_v47 = vadd.f32 %v477_v41, %v399_v36  ;;  %571 = vst [vmem:[%s931_s7 + $0xd8] sm:$0xff] %v539_v43 }
  0x3f   : > { %v479_v50 = vadd.f32 %v895_v3, %v440_v45  ;;  %v510_v52 = vadd.f32 %v478_v48, %v400_v44 }
  0x40   : > { %572 = vst [vmem:[%s931_s7 + $0xe0] sm:$0xff] %v540_v46  ;;  %v541_v51 = vmax.f32 %v509_v47, 0.0 }
  0x41   : > { %v511_v53 = vadd.f32 %v479_v50, %v401_v49  ;;  %v542_v54 = vmax.f32 %v510_v52, 0.0 }
  0x42   : > { %573 = vst [vmem:[%s931_s7 + $0xe8] sm:$0xff] %v541_v51 }
  0x43   : > { %v543_v55 = vmax.f32 %v511_v53, 0.0  ;;  %574 = vst [vmem:[%s931_s7 + $0xf0] sm:$0xff] %v542_v54 }
  0x45   : > { %575 = vst [vmem:[%s931_s7 + $0xf8] sm:$0xff] %v543_v55 }
  0x46 PF: > { %s14_s17 = sadd.s32 1, %s824_s17   ;;  %s1092_s15 = smov %s820_s16 }
  0x47   : > { %p11_p5 = scmp.ge.s32.totalorder %s14_s17, 4   ;;  %s1093_s16 = smov %s1095_s18 }
  0x49   :  { %13 = sbr.rel (!%p11_p5) target bundleno = 2 (0x2), region = 69 }

// kernel: residual_block_forward.3
= control target key start
LH: loop header
LB: loop body
LE: loop exit
PB: predicated region body
PF: predicated region fallthrough
CT: control target
= control target key end

     0   :  { %s2061_s12 = smov 0   ;;  %s2063_s13 = smov 0   ;;  %s2559_s0 = inlined_call_operand.vmem [shape: bf16[2,18,18,8], index: 0, kind: input, shape index: {}]   ;;  %s2560_s1 = inlined_call_operand.vmem [shape: bf16[72,128], index: 1, kind: input, shape index: {}]   ;;  %s2561_s2 = inlined_call_operand.vmem [shape: bf16[2,256,128], index: 2, kind: output, shape index: {0}]   ;;  %s2562_s3 = inlined_call_operand.vmem [shape: f32[2,1,2,128], index: 3, kind: output, shape index: {1}]  }
   0x1   :  { %s2065_s14 = smov 0  }
   0x2 LB: > { %s26_s15 = sadd.s32 1, %s2031_s13  ;;  %p1644_p0 = scmp.ge.s32.totalorder %s2035_s14, 1  ;;  %s2035_s14 = sphi %s2065_s14, %s14_s14   ;;  %s2031_s13 = sphi %s2063_s13, %s2564_s13   ;;  %s2027_s12 = sphi %s2061_s12, %s2563_s12  }
   0x3   : > { %p28_p1 = scmp.ge.s32.totalorder %s26_s15, 2  ;;  %p156_p2 = scmp.lt.s32.totalorder %s2035_s14, 3 }
   0x5   : > { %s2566_s15 = smov (%p28_p1, %s26_s15), 0  ;;  %p157_p3 = pnand %p1644_p0, %p156_p2 }
   0x6   : > { %p191_p4 = scmp.lt.s32.totalorder (!%p157_p3), %s2027_s12, 1  ;;  %s2037_s20 = smov (!%p157_p3), 16  }
   0x7   : > { %160 = sbr.rel (%p157_p3) target bundleno = 552 (0x228), region = 28  ;;  %s2038_s21 = smov (!%p157_p3), 8  }
   0x8   : > { %s2039_s5 = smov (!%p157_p3), 24   ;;  %s2040_s6 = smov (!%p157_p3), 48  }
   0xc   : > { %s2568_s12 = smov (!%p191_p4, %s2027_s12), 1  ;;  %vm669_vm0 = vcmask 1046528   ;;  %vm416_vm1 = vsmask.f32 7424  ;;  %vm1050_vm2 = vcmask 1043456   ;;  %vm760_vm3 = vcmask 64512  }
   0xd   : > { %s1943_s16 = smul.u32 216, %s2568_s12  ;;  %vm797_vm4 = vcmask 130048   ;;  %vm915_vm5 = vcmask 195584   ;;  %vm948_vm6 = vcmask 392192   ;;  %vm1017_vm7 = vcmask 588800   ;;  %s1740_s7 = sshll.u32 %s2568_s12, 7 }
   0xe   : > { %s2528_s10 = scalar_lea.vmem %s2561_s2, %s1740_s7  ;;  %s1648_s11 = sshll.u32 %s2568_s12, 1  ;;  %vm1513_vm8 = vcmask 1040384  }
   0xf   : > { %s2085_s19 = scalar_lea.vmem %s2559_s0, %s1943_s16  ;;  %s212_s18 = scalar_lea.vmem %s2562_s3, %s1648_s11 }
  0x10   : > { %v2088_v0 = vld [vmem:[%s2085_s19 + $0x18] sm:$0xff]   ;;  %v1973_v1 = vld [vmem:[%s2085_s19 + $0x20] ss:$0 sps:$4 sm:$0x11]   ;;  %v2092_v2 = vld [vmem:[%s2085_s19 + $0xc] sm:$0xff]  }
  0x11   : > { %v676_v3 = vrot.slane %v2088_v0, 1  ;;  %v677_v4 = vrot.slane %v1973_v1, 1  ;;  %v1975_v5 = vld [vmem:[%s2085_s19 + $0x14] ss:$0 sps:$4 sm:$0x11]   ;;  %v673_v7 = vrot.slane %v2092_v2, 1 }
  0x12   : > { %v2097_v6 = vld [vmem:[%s2085_s19 + $0x30] sm:$0xff]   ;;  %v2101_v8 = vld [vmem:[%s2085_s19 + $0x24] sm:$0xff]   ;;  %v674_v10 = vrot.slane %v1975_v5, 1  ;;  %v1977_v11 = vld [vmem:[%s2085_s19 + $0x38] ss:$0 sps:$4 sm:$0x11]  }
  0x13   : > { %v678_v9 = vsel %vm669_vm0, %v676_v3, %v677_v4  ;;  %v682_v12 = vrot.slane %v2097_v6, 1  ;;  %v679_v13 = vrot.slane %v2101_v8, 1  ;;  %v683_v15 = vrot.slane %v1977_v11, 1  ;;  %v1979_v16 = vld [vmem:[%s2085_s19 + $0x2c] ss:$0 sps:$4 sm:$0x11]  }
  0x14   : > { %728 = vrot.lane.b32.xlu0 %v678_v9, %s2037_s20  ;;  %v675_v14 = vsel %vm669_vm0, %v673_v7, %v674_v10  ;;  %v680_v18 = vrot.slane %v1979_v16, 1  ;;  %v2113_v19 = vld [vmem:[%s2085_s19 + $0x3c] sm:$0xff]   ;;  %v1981_v20 = vld [vmem:[%s2085_s19 + $0x44] ss:$0 sps:$4 sm:$0x11]   ;;  %v430_v21 = vshrl.u32 %v2092_v2, 16 }
  0x15   : > { %726 = vrot.lane.b32.xlu1 %v675_v14, %s2037_s20  ;;  %v684_v17 = vsel %vm669_vm0, %v682_v12, %v683_v15  ;;  %v432_v22 = vshll.u32 %v2092_v2, 16  ;;  %v437_v23 = vshll.u32 %v1975_v5, 16  ;;  %v454_v24 = vshrl.u32 %v2101_v8, 16  ;;  %v2126_v34 = vld [vmem:[%s2085_s19 + $0x48] sm:$0xff]   ;;  %v2141_v52 = vld [vmem:[%s2085_s19 + $0x54] sm:$0xff]   ;;  %v2153_v7 = vld [vmem:[%s2085_s19 + $0x60] sm:$0xff]  }
  0x16   : > { %v456_v25 = vshll.u32 %v2101_v8, 16  ;;  %v681_v26 = vsel %vm669_vm0, %v679_v13, %v680_v18  ;;  %v685_v27 = vrot.slane %v2113_v19, 1  ;;  %v686_v28 = vrot.slane %v1981_v20, 1  ;;  %v2131_v39 = vld [vmem:[%s2085_s19 + $0x50] ss:$0 sps:$4 sm:$0x11]  }
  0x17   : > { %v461_v29 = vshll.u32 %v1979_v16, 16  ;;  %v434_v30 = vrot.slane %v432_v22, 1  ;;  %v439_v31 = vrot.slane %v437_v23, 1  ;;  %v442_v33 = vshrl.u32 %v2088_v0, 16  ;;  %v2161_v13 = vld [vmem:[%s2085_s19 + $0x6c] sm:$0xff]  }
  0x18   : > { %732 = vrot.lane.b32.xlu0 %v684_v17, %s2037_s20  ;;  %v458_v32 = vrot.slane %v456_v25, 1  ;;  %v687_v35 = vsel %vm669_vm0, %v685_v27, %v686_v28  ;;  %v444_v37 = vshll.u32 %v2088_v0, 16  ;;  %v449_v38 = vshll.u32 %v1973_v1, 16  ;;  %v1985_v53 = vld [vmem:[%s2085_s19 + $0x5c] ss:$0 sps:$4 sm:$0x11]  }
  0x19   : > { %730 = vrot.lane.b32.xlu1 %v681_v26, %s2037_s20  ;;  %v463_v36 = vrot.slane %v461_v29, 1  ;;  %v435_v40 = vor.u32 %v434_v30, %v430_v21  ;;  %v478_v42 = vshrl.u32 %v2113_v19, 16  ;;  %v480_v43 = vshll.u32 %v2113_v19, 16  ;;  %v2156_v9 = vld [vmem:[%s2085_s19 + $0x68] ss:$0 sps:$4 sm:$0x11]  }
  0x1a   : > { %v459_v41 = vor.u32 %v458_v32, %v454_v24  ;;  %v446_v44 = vrot.slane %v444_v37, 1  ;;  %v451_v45 = vrot.slane %v449_v38, 1  ;;  %v485_v46 = vshll.u32 %v1981_v20, 16  ;;  %v1989_v23 = vld [vmem:[%s2085_s19 + $0x74] ss:$0 sps:$4 sm:$0x11]  }
  0x1b   : > { %v466_v47 = vshrl.u32 %v2097_v6, 16  ;;  %v440_v48 = vsel %vm416_vm1, %v435_v40, %v439_v31  ;;  %v482_v50 = vrot.slane %v480_v43, 1  ;;  %v468_v51 = vshll.u32 %v2097_v6, 16  ;;  %v2175_v30 = vld [vmem:[%s2085_s19 + $0x78] sm:$0xff]  }
  0x1c   : > { %v464_v49 = vsel %vm416_vm1, %v459_v41, %v463_v36  ;;  %635 = vrot.lane.b32.xlu0 %v440_v48, %s2038_s21  ;;  %v447_v54 = vor.u32 %v446_v44, %v442_v33  ;;  %v487_v55 = vrot.slane %v485_v46, 1  ;;  %v473_v56 = vshll.u32 %v1977_v11, 16  ;;  %v2181_v36 = vld [vmem:[%s2085_s19 + $0x84] sm:$0xff]   ;;  %v2185_v38 = vld [vmem:[%s2085_s19 + $0x80] ss:$0 sps:$4 sm:$0x11]  }
  0x1d   : > { %734 = vrot.lane.b32.xlu1 %v687_v35, %s2037_s20  ;;  %v490_v57 = vshrl.u32 %v2126_v34, 16  ;;  %v483_v58 = vor.u32 %v482_v50, %v478_v42  ;;  %v470_v59 = vrot.slane %v468_v51, 1  ;;  %v492_v60 = vshll.u32 %v2126_v34, 16  ;;  %v1993_v43 = vld [vmem:[%s2085_s19 + $0x8c] ss:$0 sps:$4 sm:$0x11]  }
  0x1e   : > { %v497_v61 = vshll.u32 %v2131_v39, 16  ;;  %v452_v62 = vsel %vm416_vm1, %v447_v54, %v451_v45  ;;  %v475_v63 = vrot.slane %v473_v56, 1  ;;  %v502_v1 = vshrl.u32 %v2141_v52, 16 }
  0x1f   : > { %v504_v3 = vshll.u32 %v2141_v52, 16  ;;  %v471_v4 = vor.u32 %v470_v59, %v466_v47  ;;  %v494_v5 = vrot.slane %v492_v60, 1  ;;  %v488_v10 = vsel %vm416_vm1, %v483_v58, %v487_v55  ;;  %v2202_v58 = vld [vmem:[%s2085_s19 + $0x90] sm:$0xff]   ;;  %v2205_v59 = vld [vmem:[%s2085_s19 + $0x9c] sm:$0xff]  }
  0x20   : > { %637 = vrot.lane.b32.xlu0 %v452_v62, %s2038_s21  ;;  %v509_v12 = vshll.u32 %v1985_v53, 16  ;;  %v499_v16 = vrot.slane %v497_v61, 1  ;;  %v688_v17 = vrot.slane %v2126_v34, 1  ;;  %v689_v21 = vrot.slane %v2131_v39, 1 }
  0x21   : > { %639 = vrot.lane.b32.xlu1 %v464_v49, %s2038_s21  ;;  %v506_v11 = vrot.slane %v504_v3, 1  ;;  %v476_v14 = vsel %vm416_vm1, %v471_v4, %v475_v63  ;;  %v495_v15 = vor.u32 %v494_v5, %v490_v57  ;;  %v691_v22 = vrot.slane %v2141_v52, 1  ;;  %v1997_v5 = vld [vmem:[%s2085_s19 + $0xa4] ss:$0 sps:$4 sm:$0x11]  }
  0x22   : > { %v511_v20 = vrot.slane %v509_v12, 1  ;;  %v692_v24 = vrot.slane %v1985_v53, 1  ;;  %v516_v25 = vshll.u32 %v2153_v7, 16  ;;  %v526_v27 = vshrl.u32 %v2161_v13, 16 }
  0x23   : > { %v507_v18 = vor.u32 %v506_v11, %v502_v1  ;;  %v528_v28 = vshll.u32 %v2161_v13, 16  ;;  %v533_v29 = vshll.u32 %v1989_v23, 16  ;;  %v500_v31 = vsel %vm416_vm1, %v495_v15, %v499_v16  ;;  %v1995_v12 = vld [vmem:[%s2085_s19 + $0x98] ss:$0 sps:$4 sm:$0x11]  }
  0x24   : > { %641 = vrot.lane.b32.xlu0 %v476_v14, %s2038_s21  ;;  %v514_v32 = vshrl.u32 %v2153_v7, 16  ;;  %v518_v33 = vrot.slane %v516_v25, 1  ;;  %v521_v35 = vshll.u32 %v2156_v9, 16  ;;  %v690_v39 = vsel %vm669_vm0, %v688_v17, %v689_v21  ;;  %v2228_v25 = vld [vmem:[%s2085_s19 + $0xb4] sm:$0xff]  }
  0x25   : > { %643 = vrot.lane.b32.xlu1 %v488_v10, %s2038_s21  ;;  %v512_v26 = vsel %vm416_vm1, %v507_v18, %v511_v20  ;;  %v530_v37 = vrot.slane %v528_v28, 1  ;;  %v693_v40 = vsel %vm669_vm0, %v691_v22, %v692_v24  ;;  %v535_v42 = vrot.slane %v533_v29, 1  ;;  %v2221_v20 = vld [vmem:[%s2085_s19 + $0xa8] sm:$0xff]  }
  0x26   : > { %v519_v44 = vor.u32 %v518_v33, %v514_v32  ;;  %v523_v45 = vrot.slane %v521_v35, 1  ;;  %v540_v46 = vshll.u32 %v2175_v30, 16  ;;  %v552_v47 = vshll.u32 %v2181_v36, 16  ;;  %v2001_v33 = vld [vmem:[%s2085_s19 + $0xbc] ss:$0 sps:$4 sm:$0x11]  }
  0x27   : > { %v531_v41 = vor.u32 %v530_v37, %v526_v27  ;;  %v694_v48 = vrot.slane %v2153_v7, 1  ;;  %v695_v49 = vrot.slane %v2156_v9, 1  ;;  %v697_v50 = vrot.slane %v2161_v13, 1 }
  0x28   : > { %645 = vrot.lane.b32.xlu0 %v500_v31, %s2038_s21  ;;  %v545_v51 = vshll.u32 %v2185_v38, 16  ;;  %v557_v53 = vshll.u32 %v1993_v43, 16  ;;  %v698_v55 = vrot.slane %v1989_v23, 1  ;;  %v550_v56 = vshrl.u32 %v2181_v36, 16 }
  0x29   : > { %647 = vrot.lane.b32.xlu1 %v512_v26, %s2038_s21  ;;  %v536_v54 = vsel %vm416_vm1, %v531_v41, %v535_v42  ;;  %v554_v57 = vrot.slane %v552_v47, 1  ;;  %v524_v60 = vsel %vm416_vm1, %v519_v44, %v523_v45  ;;  %v538_v61 = vshrl.u32 %v2175_v30, 16  ;;  %v2233_v31 = vld [vmem:[%s2085_s19 + $0xb0] ss:$0 sps:$4 sm:$0x11]  }
  0x2a   : > { %v542_v62 = vrot.slane %v540_v46, 1  ;;  %v547_v63 = vrot.slane %v545_v51, 1  ;;  %v559_v1 = vrot.slane %v557_v53, 1  ;;  %v699_v3 = vsel %vm669_vm0, %v697_v50, %v698_v55  ;;  %v2250_v53 = vld [vmem:[%s2085_s19] sm:$0xff]  }
  0x2b   : > { %v555_v4 = vor.u32 %v554_v57, %v550_v56  ;;  %v576_v9 = vshll.u32 %v2205_v59, 16  ;;  %v696_v10 = vsel %vm669_vm0, %v694_v48, %v695_v49  ;;  %v564_v14 = vshll.u32 %v2202_v58, 16  ;;  %v2255_v57 = vld [vmem:[%s2085_s19 + $0xc0] sm:$0xff]  }
  0x2c   : > { %736 = vrot.lane.b32.xlu0 %v690_v39, %s2037_s20  ;;  %v543_v11 = vor.u32 %v542_v62, %v538_v61  ;;  %v700_v15 = vrot.slane %v2175_v30, 1  ;;  %v701_v16 = vrot.slane %v2185_v38, 1  ;;  %v703_v17 = vrot.slane %v2181_v36, 1  ;;  %v2005_v61 = vld [vmem:[%s2085_s19 + $0xd4] ss:$0 sps:$4 sm:$0x11]  }
  0x2d   : > { %738 = vrot.lane.b32.xlu1 %v693_v40, %s2037_s20  ;;  %v704_v18 = vrot.slane %v1993_v43, 1  ;;  %v560_v21 = vsel %vm416_vm1, %v555_v4, %v559_v1  ;;  %v574_v22 = vshrl.u32 %v2205_v59, 16  ;;  %v578_v23 = vrot.slane %v576_v9, 1  ;;  %v2007_v9 = vld [vmem:[%s2085_s19 + $0x8] ss:$0 sps:$4 sm:$0x11]  }
  0x2e   : > { %v581_v24 = vshll.u32 %v1997_v5, 16  ;;  %v548_v26 = vsel %vm416_vm1, %v543_v11, %v547_v63  ;;  %v562_v27 = vshrl.u32 %v2202_v58, 16  ;;  %v566_v28 = vrot.slane %v564_v14, 1  ;;  %v2003_v14 = vld [vmem:[%s2085_s19 + $0xc8] ss:$0 sps:$4 sm:$0x11]  }
  0x2f   : > { %v569_v29 = vshll.u32 %v1995_v12, 16  ;;  %v588_v32 = vshll.u32 %v2221_v20, 16  ;;  %v705_v35 = vsel %vm669_vm0, %v703_v17, %v704_v18  ;;  %v579_v37 = vor.u32 %v578_v23, %v574_v22 }
  0x30   : > { %649 = vrot.lane.b32.xlu0 %v524_v60, %s2038_s21  ;;  %v583_v38 = vrot.slane %v581_v24, 1  ;;  %v600_v39 = vshll.u32 %v2228_v25, 16  ;;  %v702_v40 = vsel %vm669_vm0, %v700_v15, %v701_v16  ;;  %v567_v41 = vor.u32 %v566_v28, %v562_v27  ;;  %v2258_v60 = vld [vmem:[%s2085_s19 + $0xcc] sm:$0xff]  }
  0x31   : > { %651 = vrot.lane.b32.xlu1 %v536_v54, %s2038_s21  ;;  %v571_v42 = vrot.slane %v569_v29, 1  ;;  %v709_v43 = vrot.slane %v2205_v59, 1  ;;  %v710_v44 = vrot.slane %v1997_v5, 1  ;;  %v586_v45 = vshrl.u32 %v2221_v20, 16 }
  0x32   : > { %v590_v46 = vrot.slane %v588_v32, 1  ;;  %v593_v47 = vshll.u32 %v2233_v31, 16  ;;  %v584_v48 = vsel %vm416_vm1, %v579_v37, %v583_v38  ;;  %v598_v49 = vshrl.u32 %v2228_v25, 16 }
  0x33   : > { %v602_v50 = vrot.slane %v600_v39, 1  ;;  %v605_v51 = vshll.u32 %v2001_v33, 16  ;;  %v572_v54 = vsel %vm416_vm1, %v567_v41, %v571_v42  ;;  %v706_v55 = vrot.slane %v2202_v58, 1 }
  0x34   : > { %740 = vrot.lane.b32.xlu0 %v696_v10, %s2037_s20  ;;  %v707_v56 = vrot.slane %v1995_v12, 1  ;;  %v711_v62 = vsel %vm669_vm0, %v709_v43, %v710_v44  ;;  %v591_v63 = vor.u32 %v590_v46, %v586_v45  ;;  %v595_v1 = vrot.slane %v593_v47, 1 }
  0x35   : > { %742 = vrot.lane.b32.xlu1 %v699_v3, %s2037_s20  ;;  %v721_v3 = vrot.slane %v2258_v60, 1  ;;  %v603_v4 = vor.u32 %v602_v50, %v598_v49  ;;  %v607_v5 = vrot.slane %v605_v51, 1  ;;  %v420_v10 = vshll.u32 %v2250_v53, 16 }
  0x36   : > { %v722_v11 = vrot.slane %v2005_v61, 1  ;;  %v708_v12 = vsel %vm669_vm0, %v706_v55, %v707_v56  ;;  %v612_v15 = vshll.u32 %v2255_v57, 16  ;;  %v712_v16 = vrot.slane %v2221_v20, 1 }
  0x37   : > { %v596_v18 = vsel %vm416_vm1, %v591_v63, %v595_v1  ;;  %v715_v22 = vrot.slane %v2228_v25, 1  ;;  %v716_v23 = vrot.slane %v2001_v33, 1  ;;  %v608_v24 = vsel %vm416_vm1, %v603_v4, %v607_v5  ;;  %v2011_v5 = vld [vmem:[%s2560_s1 + $0x8] sm:$0xff]  }
  0x38   : > { %653 = vrot.lane.b32.xlu0 %v548_v26, %s2038_s21  ;;  %v723_v17 = vsel %vm669_vm0, %v721_v3, %v722_v11  ;;  %v418_v26 = vshrl.u32 %v2250_v53, 16  ;;  %v422_v27 = vrot.slane %v420_v10, 1  ;;  %v425_v28 = vshll.u32 %v2007_v9, 16  ;;  %v2010_v3 = vld [vmem:[%s2560_s1 + $0x10] sm:$0xff]   ;;  %v2012_v10 = vld [vmem:[%s2560_s1] sm:$0xff]  }
  0x39   : > { %655 = vrot.lane.b32.xlu1 %v560_v21, %s2038_s21  ;;  %v713_v21 = vrot.slane %v2233_v31, 1  ;;  %v610_v29 = vshrl.u32 %v2255_v57, 16  ;;  %v614_v32 = vrot.slane %v612_v15, 1  ;;  %v624_v37 = vshll.u32 %v2258_v60, 16 }
  0x3a   : > { %v717_v33 = vsel %vm669_vm0, %v715_v22, %v716_v23  ;;  %v622_v38 = vshrl.u32 %v2258_v60, 16  ;;  %v423_v39 = vor.u32 %v422_v27, %v418_v26  ;;  %v629_v44 = vshll.u32 %v2005_v61, 16  ;;  %v2008_v61 = vld [vmem:[%s2560_s1 + $0x20] ss:$0 sps:$4 sm:$0xff]  }
  0x3b   : > { %v714_v31 = vsel %vm669_vm0, %v712_v16, %v713_v21  ;;  %v615_v41 = vor.u32 %v614_v32, %v610_v29  ;;  %v626_v43 = vrot.slane %v624_v37, 1  ;;  %v718_v46 = vrot.slane %v2255_v57, 1  ;;  %1941 = vmatprep.subr.msk.bf16.mxu0 %vm1050_vm2, %v2008_v61  ;;  %1942 = vmatprep.subr.msk.bf16.mxu1 %vm1050_vm2, %v2008_v61 }
  0x3c   : > { %744 = vrot.lane.b32.xlu0 %v702_v40, %s2037_s20  ;;  %v427_v40 = vrot.slane %v425_v28, 1  ;;  %v719_v47 = vrot.slane %v2003_v14, 1  ;;  %v631_v50 = vrot.slane %v629_v44, 1  ;;  %v670_v55 = vrot.slane %v2250_v53, 1 }
  0x3d   : > { %746 = vrot.lane.b32.xlu1 %v705_v35, %s2037_s20  ;;  %v617_v35 = vshll.u32 %v2003_v14, 16  ;;  %v627_v49 = vor.u32 %v626_v43, %v622_v38  ;;  %v671_v56 = vrot.slane %v2007_v9, 1  ;;  %v1052_v63 = vsel %vm1050_vm2, %v2008_v61, 0 }
  0x3e   : > { %v428_v45 = vsel %vm416_vm1, %v423_v39, %v427_v40  ;;  %v720_v51 = vsel %vm669_vm0, %v718_v46, %v719_v47  ;;  %1890 = vmatpush3.bf16.msra.mxu0 %v1052_v63  ;;  %1936 = vmatpush3.bf16.msra.mxu1 %v1052_v63 }
  0x3f   : > { %v619_v42 = vrot.slane %v617_v35, 1  ;;  %v672_v1 = vsel %vm669_vm0, %v670_v55, %v671_v56 }
  0x40   : > { %657 = vrot.lane.b32.xlu0 %v572_v54, %s2038_s21  ;;  %v632_v54 = vsel %vm416_vm1, %v627_v49, %v631_v50 }
  0x41   : > { %659 = vrot.lane.b32.xlu1 %v584_v48, %s2038_s21  ;;  %v620_v48 = vsel %vm416_vm1, %v615_v41, %v619_v42 }
  0x44   : > { %748 = vrot.lane.b32.xlu0 %v708_v12, %s2037_s20 }
  0x45   : > { %750 = vrot.lane.b32.xlu1 %v711_v62, %s2037_s20  ;;  %v2009_v62 = vld [vmem:[%s2560_s1 + $0x18] sm:$0xff]  }
  0x46   : > { %1891 = vmatprep.subr.bf16.mxu0 %v2009_v62  ;;  %1932 = vmatprep.subr.bf16.mxu1 %v2009_v62 }
  0x47   : > { %1892 = vmatpush3.bf16.msra.mxu0 %v2009_v62  ;;  %1937 = vmatpush3.bf16.msra.mxu1 %v2009_v62 }
  0x48   : > { %661 = vrot.lane.b32.xlu0 %v596_v18, %s2038_s21  ;;  %1893 = vmatprep.subr.bf16.mxu0 %v2010_v3 }
  0x49   : > { %663 = vrot.lane.b32.xlu1 %v608_v24, %s2038_s21  ;;  %1933 = vmatprep.subr.bf16.mxu1 %v2010_v3 }
  0x4b   : > { %1894 = vmatpush3.bf16.msra.mxu0 %v2010_v3  ;;  %1938 = vmatpush3.bf16.msra.mxu1 %v2010_v3 }
  0x4c   : > { %752 = vrot.lane.b32.xlu0 %v714_v31, %s2037_s20  ;;  %1895 = vmatprep.subr.bf16.mxu0 %v2011_v5 }
  0x4d   : > { %754 = vrot.lane.b32.xlu1 %v717_v33, %s2037_s20  ;;  %1934 = vmatprep.subr.bf16.mxu1 %v2011_v5 }
  0x4f   : > { %1896 = vmatpush3.bf16.msra.mxu0 %v2011_v5  ;;  %1939 = vmatpush3.bf16.msra.mxu1 %v2011_v5 }
  0x50   : > { %665 = vrot.lane.b32.xlu0 %v620_v48, %s2038_s21  ;;  %1897 = vmatprep.subr.bf16.mxu0 %v2012_v10 }
  0x51   : > { %633 = vrot.lane.b32.xlu1 %v428_v45, %s2038_s21  ;;  %1935 = vmatprep.subr.bf16.mxu1 %v2012_v10 }
  0x53   : > { %1898 = vmatpush3.bf16.msra.mxu0 %v2012_v10  ;;  %1940 = vmatpush3.bf16.msra.mxu1 %v2012_v10 }
  0x54   : > { %667 = vrot.lane.b32.xlu0 %v632_v54, %s2038_s21 }
  0x55   : > { %756 = vrot.lane.b32.xlu1 %v720_v51, %s2037_s20 }
  0x58   : > { %724 = vrot.lane.b32.xlu0 %v672_v1, %s2037_s20 }
  0x59   : > { %758 = vrot.lane.b32.xlu1 %v723_v17, %s2037_s20 }
  0x86   : > { %v729_v4 = vpop.permute.xlu0 %728 }
  0x87   : > { %v727_v9 = vpop.permute.xlu1 %726 }
  0x8a   : > { %v733_v11 = vpop.permute.xlu0 %732 }
  0x8b   : > { %v731_v12 = vpop.permute.xlu1 %730 }
  0x8e   : > { %v636_v15 = vpop.permute.xlu0 %635 }
  0x8f   : > { %v735_v14 = vpop.permute.xlu1 %734  ;;  %v764_v16 = vsel %vm760_vm3, %v2092_v2, %v636_v15 }
  0x90   : > { %v2319_v17 = vsel %vm797_vm4, %v764_v16, %v727_v9 }
  0x91   : > { %850 = vrot.lane.b32.xlu0 %v2319_v17, %s2039_s5 }
  0x92   : > { %v638_v21 = vpop.permute.xlu0 %637 }
  0x93   : > { %v640_v18 = vpop.permute.xlu1 %639  ;;  %v766_v22 = vsel %vm760_vm3, %v2088_v0, %v638_v21 }
  0x94   : > { %v2326_v23 = vsel %vm797_vm4, %v766_v22, %v729_v4  ;;  %v768_v24 = vsel %vm760_vm3, %v2101_v8, %v640_v18 }
  0x95   : > { %883 = vrot.lane.b32.xlu0 %v2326_v23, %s2040_s6  ;;  %852 = vrot.lane.b32.xlu1 %v2326_v23, %s2039_s5  ;;  %v2335_v27 = vsel %vm797_vm4, %v768_v24, %v731_v12 }
  0x96   : > { %v642_v26 = vpop.permute.xlu0 %641 }
  0x97   : > { %v644_v2 = vpop.permute.xlu1 %643  ;;  %v770_v0 = vsel %vm760_vm3, %v2097_v6, %v642_v26 }
  0x98   : > { %v2344_v29 = vsel %vm797_vm4, %v770_v0, %v733_v11  ;;  %v772_v32 = vsel %vm760_vm3, %v2113_v19, %v644_v2 }
  0x99   : > { %854 = vrot.lane.b32.xlu0 %v2335_v27, %s2039_s5  ;;  %885 = vrot.lane.b32.xlu1 %v2335_v27, %s2040_s6  ;;  %v2353_v37 = vsel %vm797_vm4, %v772_v32, %v735_v14 }
  0x9a   : > { %v646_v28 = vpop.permute.xlu0 %645 }
  0x9b   : > { %v648_v8 = vpop.permute.xlu1 %647  ;;  %v774_v31 = vsel %vm760_vm3, %v2126_v34, %v646_v28 }
  0x9c   : > { %v776_v39 = vsel %vm760_vm3, %v2141_v52, %v648_v8 }
  0x9d   : > { %887 = vrot.lane.b32.xlu0 %v2344_v29, %s2040_s6  ;;  %856 = vrot.lane.b32.xlu1 %v2344_v29, %s2039_s5 }
  0x9e   : > { %v737_v35 = vpop.permute.xlu0 %736 }
  0x9f   : > { %v739_v6 = vpop.permute.xlu1 %738  ;;  %v2362_v38 = vsel %vm797_vm4, %v774_v31, %v737_v35 }
  0xa0   : > { %v2371_v41 = vsel %vm797_vm4, %v776_v39, %v739_v6 }
  0xa1   : > { %858 = vrot.lane.b32.xlu0 %v2353_v37, %s2039_s5  ;;  %889 = vrot.lane.b32.xlu1 %v2353_v37, %s2040_s6 }
  0xa2   : > { %v650_v33 = vpop.permute.xlu0 %649 }
  0xa3   : > { %v652_v19 = vpop.permute.xlu1 %651  ;;  %v778_v42 = vsel %vm760_vm3, %v2153_v7, %v650_v33 }
  0xa4   : > { %v780_v45 = vsel %vm760_vm3, %v2161_v13, %v652_v19 }
  0xa5   : > { %891 = vrot.lane.b32.xlu0 %v2362_v38, %s2040_s6  ;;  %860 = vrot.lane.b32.xlu1 %v2362_v38, %s2039_s5 }
  0xa6   : > { %v741_v40 = vpop.permute.xlu0 %740 }
  0xa7   : > { %v743_v34 = vpop.permute.xlu1 %742  ;;  %v2380_v44 = vsel %vm797_vm4, %v778_v42, %v741_v40 }
  0xa8   : > { %v2389_v47 = vsel %vm797_vm4, %v780_v45, %v743_v34 }
  0xa9   : > { %862 = vrot.lane.b32.xlu0 %v2371_v41, %s2039_s5  ;;  %893 = vrot.lane.b32.xlu1 %v2371_v41, %s2040_s6 }
  0xaa   : > { %v654_v43 = vpop.permute.xlu0 %653 }
  0xab   : > { %v656_v52 = vpop.permute.xlu1 %655  ;;  %v782_v48 = vsel %vm760_vm3, %v2175_v30, %v654_v43 }
  0xac   : > { %v784_v51 = vsel %vm760_vm3, %v2181_v36, %v656_v52 }
  0xad   : > { %895 = vrot.lane.b32.xlu0 %v2380_v44, %s2040_s6  ;;  %864 = vrot.lane.b32.xlu1 %v2380_v44, %s2039_s5 }
  0xae   : > { %v745_v46 = vpop.permute.xlu0 %744 }
  0xaf   : > { %v747_v7 = vpop.permute.xlu1 %746  ;;  %v2398_v50 = vsel %vm797_vm4, %v782_v48, %v745_v46 }
  0xb0   : > { %v2407_v55 = vsel %vm797_vm4, %v784_v51, %v747_v7 }
  0xb1   : > { %866 = vrot.lane.b32.xlu0 %v2389_v47, %s2039_s5  ;;  %897 = vrot.lane.b32.xlu1 %v2389_v47, %s2040_s6 }
  0xb2   : > { %v658_v49 = vpop.permute.xlu0 %657 }
  0xb3   : > { %v660_v13 = vpop.permute.xlu1 %659  ;;  %v786_v56 = vsel %vm760_vm3, %v2202_v58, %v658_v49 }
  0xb4   : > { %v788_v63 = vsel %vm760_vm3, %v2205_v59, %v660_v13 }
  0xb5   : > { %899 = vrot.lane.b32.xlu0 %v2398_v50, %s2040_s6  ;;  %868 = vrot.lane.b32.xlu1 %v2398_v50, %s2039_s5 }
  0xb6   : > { %v749_v54 = vpop.permute.xlu0 %748 }
  0xb7   : > { %v751_v30 = vpop.permute.xlu1 %750  ;;  %v2416_v62 = vsel %vm797_vm4, %v786_v56, %v749_v54 }
  0xb8   : > { %v2425_v3 = vsel %vm797_vm4, %v788_v63, %v751_v30 }
  0xb9   : > { %870 = vrot.lane.b32.xlu0 %v2407_v55, %s2039_s5  ;;  %901 = vrot.lane.b32.xlu1 %v2407_v55, %s2040_s6 }
  0xba   : > { %v662_v61 = vpop.permute.xlu0 %661 }
  0xbb   : > { %v664_v36 = vpop.permute.xlu1 %663  ;;  %v790_v4 = vsel %vm760_vm3, %v2221_v20, %v662_v61 }
  0xbc   : > { %v792_v10 = vsel %vm760_vm3, %v2228_v25, %v664_v36 }
  0xbd   : > { %903 = vrot.lane.b32.xlu0 %v2416_v62, %s2040_s6  ;;  %872 = vrot.lane.b32.xlu1 %v2416_v62, %s2039_s5 }
  0xbe   : > { %v753_v1 = vpop.permute.xlu0 %752 }
  0xbf   : > { %v755_v58 = vpop.permute.xlu1 %754  ;;  %v2434_v9 = vsel %vm797_vm4, %v790_v4, %v753_v1 }
  0xc0   : > { %v2447_v15 = vsel %vm797_vm4, %v792_v10, %v755_v58 }
  0xc1   : > { %874 = vrot.lane.b32.xlu0 %v2425_v3, %s2039_s5  ;;  %905 = vrot.lane.b32.xlu1 %v2425_v3, %s2040_s6 }
  0xc2   : > { %v666_v5 = vpop.permute.xlu0 %665 }
  0xc3   : > { %v634_v59 = vpop.permute.xlu1 %633  ;;  %v794_v12 = vsel %vm760_vm3, %v2255_v57, %v666_v5 }
  0xc4   : > { %v762_v16 = vsel %vm760_vm3, %v2250_v53, %v634_v59 }
  0xc5   : > { %907 = vrot.lane.b32.xlu0 %v2434_v9, %s2040_s6  ;;  %876 = vrot.lane.b32.xlu1 %v2434_v9, %s2039_s5 }
  0xc6   : > { %v668_v11 = vpop.permute.xlu0 %667 }
  0xc7   : > { %v757_v20 = vpop.permute.xlu1 %756  ;;  %v796_v14 = vsel %vm760_vm3, %v2258_v60, %v668_v11 }
  0xc8   : > { %v831_v21 = vsel %vm797_vm4, %v794_v12, %v757_v20 }
  0xc9   : > { %878 = vrot.lane.b32.xlu0 %v2447_v15, %s2039_s5  ;;  %909 = vrot.lane.b32.xlu1 %v2447_v15, %s2040_s6 }
  0xca   : > { %v725_v18 = vpop.permute.xlu0 %724 }
  0xcb   : > { %v759_v25 = vpop.permute.xlu1 %758  ;;  %v799_v60 = vsel %vm797_vm4, %v762_v16, %v725_v18 }
  0xcc   : > { %v833_v57 = vsel %vm797_vm4, %v796_v14, %v759_v25 }
  0xcd   : > { %911 = vrot.lane.b32.xlu0 %v831_v21, %s2040_s6  ;;  %880 = vrot.lane.b32.xlu1 %v831_v21, %s2039_s5 }
  0xd1   : > { %913 = vrot.lane.b32.xlu1 %v833_v57, %s2040_s6 }
 0x103   : > { %v851_v22 = vpop.permute.xlu0 %850 }
 0x104   : > { %v917_v24 = vsel %vm915_vm5, %v799_v60, %v851_v22 }
 0x107   : > { %v884_v53 = vpop.permute.xlu0 %883  ;;  %v853_v2 = vpop.permute.xlu1 %852 }
 0x108   : > { %v950_v26 = vsel %vm948_vm6, %v917_v24, %v884_v53  ;;  %v919_v0 = vsel %vm915_vm5, %v2319_v17, %v853_v2 }
 0x109   : > { %1899 = vmatprep.mubr.msk.bf16.mxu0 %vm1017_vm7, %v950_v26 }
 0x10b   : > { %v855_v8 = vpop.permute.xlu0 %854  ;;  %v886_v28 = vpop.permute.xlu1 %885 }
 0x10c   : > { %v952_v32 = vsel %vm948_vm6, %v919_v0, %v886_v28  ;;  %v921_v6 = vsel %vm915_vm5, %v2326_v23, %v855_v8 }
 0x10d   : > { %1900 = vmatmul.mubr.msk.bf16.vlgmr.msra.gmra.mxu0 %vm1017_vm7, %v952_v32 }
 0x10f   : > { %v888_v35 = vpop.permute.xlu0 %887  ;;  %v857_v31 = vpop.permute.xlu1 %856 }
 0x110   : > { %v954_v19 = vsel %vm948_vm6, %v921_v6, %v888_v35  ;;  %v923_v33 = vsel %vm915_vm5, %v2335_v27, %v857_v31 }
 0x111   : > { %1903 = vmatprep.mubr.msk.bf16.mxu0 %vm1017_vm7, %v954_v19 }
 0x113   : > { %v859_v39 = vpop.permute.xlu0 %858  ;;  %v890_v17 = vpop.permute.xlu1 %889 }
 0x114   : > { %v956_v34 = vsel %vm948_vm6, %v923_v33, %v890_v17  ;;  %v925_v40 = vsel %vm915_vm5, %v2344_v29, %v859_v39 }
 0x115   : > { %1904 = vmatmul.mubr.msk.bf16.gmra.mxu0 %vm1017_vm7, %v956_v34 }
 0x117   : > { %v892_v42 = vpop.permute.xlu0 %891  ;;  %v861_v23 = vpop.permute.xlu1 %860 }
 0x118   : > { %v958_v52 = vsel %vm948_vm6, %v925_v40, %v892_v42  ;;  %v927_v43 = vsel %vm915_vm5, %v2353_v37, %v861_v23 }
 0x119   : > { %1907 = vmatprep.mubr.msk.bf16.mxu0 %vm1017_vm7, %v958_v52 }
 0x11b   : > { %v863_v45 = vpop.permute.xlu0 %862  ;;  %v894_v27 = vpop.permute.xlu1 %893 }
 0x11c   : > { %v960_v7 = vsel %vm948_vm6, %v927_v43, %v894_v27  ;;  %v929_v46 = vsel %vm915_vm5, %v2362_v38, %v863_v45 }
 0x11d   : > { %1908 = vmatmul.mubr.msk.bf16.gmra.mxu0 %vm1017_vm7, %v960_v7 }
 0x11f   : > { %v896_v48 = vpop.permute.xlu0 %895  ;;  %v865_v29 = vpop.permute.xlu1 %864 }
 0x120   : > { %v962_v13 = vsel %vm948_vm6, %v929_v46, %v896_v48  ;;  %v931_v49 = vsel %vm915_vm5, %v2371_v41, %v865_v29 }
 0x121   : > { %1911 = vmatprep.mubr.msk.bf16.mxu0 %vm1017_vm7, %v962_v13 }
 0x123   : > { %v867_v51 = vpop.permute.xlu0 %866  ;;  %v898_v37 = vpop.permute.xlu1 %897 }
 0x124   : > { %v964_v30 = vsel %vm948_vm6, %v931_v49, %v898_v37  ;;  %v933_v54 = vsel %vm915_vm5, %v2380_v44, %v867_v51 }
 0x125   : > { %1912 = vmatmul.mubr.msk.bf16.gmra.mxu0 %vm1017_vm7, %v964_v30 }
 0x127   : > { %v900_v56 = vpop.permute.xlu0 %899  ;;  %v869_v38 = vpop.permute.xlu1 %868 }
 0x128   : > { %v966_v36 = vsel %vm948_vm6, %v933_v54, %v900_v56  ;;  %v935_v61 = vsel %vm915_vm5, %v2389_v47, %v869_v38 }
 0x129   : > { %1915 = vmatprep.mubr.msk.bf16.mxu1 %vm1017_vm7, %v966_v36 }
 0x12b   : > { %v871_v63 = vpop.permute.xlu0 %870  ;;  %v902_v41 = vpop.permute.xlu1 %901 }
 0x12c   : > { %v968_v58 = vsel %vm948_vm6, %v935_v61, %v902_v41  ;;  %v937_v1 = vsel %vm915_vm5, %v2398_v50, %v871_v63 }
 0x12d   : > { %1916 = vmatmul.mubr.msk.bf16.vlgmr.msra.gmra.mxu1 %vm1017_vm7, %v968_v58 }
 0x12f   : > { %v904_v4 = vpop.permute.xlu0 %903  ;;  %v873_v44 = vpop.permute.xlu1 %872 }
 0x130   : > { %v970_v59 = vsel %vm948_vm6, %v937_v1, %v904_v4  ;;  %v939_v5 = vsel %vm915_vm5, %v2407_v55, %v873_v44 }
 0x131   : > { %1919 = vmatprep.mubr.msk.bf16.mxu1 %vm1017_vm7, %v970_v59 }
 0x133   : > { %v875_v10 = vpop.permute.xlu0 %874  ;;  %v906_v47 = vpop.permute.xlu1 %905 }
 0x134   : > { %v972_v20 = vsel %vm948_vm6, %v939_v5, %v906_v47  ;;  %v941_v11 = vsel %vm915_vm5, %v2416_v62, %v875_v10 }
 0x135   : > { %1920 = vmatmul.mubr.msk.bf16.gmra.mxu1 %vm1017_vm7, %v972_v20 }
 0x137   : > { %v908_v12 = vpop.permute.xlu0 %907  ;;  %v877_v50 = vpop.permute.xlu1 %876 }
 0x138   : > { %v974_v14 = vsel %vm948_vm6, %v941_v11, %v908_v12  ;;  %v943_v25 = vsel %vm915_vm5, %v2425_v3, %v877_v50 }
 0x139   : > { %1923 = vmatprep.mubr.msk.bf16.mxu1 %vm1017_vm7, %v974_v14 }
 0x13b   : > { %v879_v55 = vpop.permute.xlu0 %878  ;;  %v910_v16 = vpop.permute.xlu1 %909 }
 0x13c   : > { %v976_v18 = vsel %vm948_vm6, %v943_v25, %v910_v16  ;;  %v945_v21 = vsel %vm915_vm5, %v2434_v9, %v879_v55 }
 0x13d   : > { %1924 = vmatmul.mubr.msk.bf16.gmra.mxu1 %vm1017_vm7, %v976_v18 }
 0x13f   : > { %v912_v62 = vpop.permute.xlu0 %911  ;;  %v881_v57 = vpop.permute.xlu1 %880 }
 0x140   : > { %v978_v60 = vsel %vm948_vm6, %v945_v21, %v912_v62  ;;  %v947_v22 = vsel %vm915_vm5, %v2447_v15, %v881_v57 }
 0x141   : > { %1927 = vmatprep.mubr.msk.bf16.mxu1 %vm1017_vm7, %v978_v60 }
 0x143   : > { %v914_v24 = vpop.permute.xlu1 %913 }
 0x144   : > { %v980_v3 = vsel %vm948_vm6, %v947_v22, %v914_v24 }
 0x145   : > { %1928 = vmatmul.mubr.msk.bf16.gmra.mxu1 %vm1017_vm7, %v980_v3 }
 0x1cd   : > { %v1901_v53 = vpop.f32.mrf.mxu0 }
 0x1cf   : > { %v1088_v2 = vpop.f32.mrf.mxu0 }
 0x1d1   : > { %v1902_v9 = vpop.f32.mrf.mxu0 }
 0x1d2   : > { %v1216_v26 = vpack.c.bf16 %v1902_v9, %v1901_v53 }
 0x1d3   : > { %v1091_v0 = vpop.f32.mrf.mxu0 }
 0x1d4   : > { %1853 = vst [vmem:[%s2528_s10 + $0x8] sm:$0xff] %v1216_v26   ;;  %v1215_v15 = vpack.c.bf16 %v1091_v0, %v1088_v2  ;;  %v1377_v28 = vunpack.c.l.bf16 %v1216_v26  ;;  %v1378_v39 = vunpack.c.h.bf16 %v1216_v26 }
 0x1d5   : > { %v1905_v8 = vpop.f32.mrf.mxu0 }
 0x1d6   : > { %1777 = vst [vmem:[%s2528_s10] sm:$0xff] %v1215_v15   ;;  %v1375_v32 = vunpack.c.l.bf16 %v1215_v15  ;;  %v1376_v6 = vunpack.c.h.bf16 %v1215_v15  ;;  %v1446_v34 = vmul.f32 %v1377_v28, %v1377_v28  ;;  %v1447_v7 = vmul.f32 %v1378_v39, %v1378_v39 }
 0x1d7   : > { %v1104_v35 = vpop.f32.mrf.mxu0 }
 0x1d8   : > { %v1407_v31 = vadd.f32 %v1376_v6, %v1375_v32  ;;  %v1444_v19 = vmul.f32 %v1375_v32, %v1375_v32  ;;  %v1445_v33 = vmul.f32 %v1376_v6, %v1376_v6 }
 0x1d9   : > { %v1906_v17 = vpop.f32.mrf.mxu0 }
 0x1da   : > { %v1408_v40 = vadd.f32 %v1407_v31, %v1377_v28  ;;  %v1476_v42 = vadd.f32 %v1445_v33, %v1444_v19  ;;  %v1218_v23 = vpack.c.bf16 %v1906_v17, %v1905_v8 }
 0x1db   : > { %v1107_v52 = vpop.f32.mrf.mxu0 }
 0x1dc   : > { %v1477_v43 = vadd.f32 %v1476_v42, %v1446_v34  ;;  %1855 = vst [vmem:[%s2528_s10 + $0x18] sm:$0xff] %v1218_v23   ;;  %v1217_v45 = vpack.c.bf16 %v1107_v52, %v1104_v35  ;;  %v1409_v29 = vadd.f32 %v1408_v40, %v1378_v39  ;;  %v1381_v49 = vunpack.c.l.bf16 %v1218_v23 }
 0x1dd   : > { %v1909_v27 = vpop.f32.mrf.mxu0  ;;  %v1382_v54 = vunpack.c.h.bf16 %v1218_v23 }
 0x1de   : > { %1854 = vst [vmem:[%s2528_s10 + $0x10] sm:$0xff] %v1217_v45   ;;  %v1379_v46 = vunpack.c.l.bf16 %v1217_v45  ;;  %v1380_v48 = vunpack.c.h.bf16 %v1217_v45  ;;  %v1478_v30 = vadd.f32 %v1477_v43, %v1447_v7  ;;  %v1450_v58 = vmul.f32 %v1381_v49, %v1381_v49 }
 0x1df   : > { %v1120_v13 = vpop.f32.mrf.mxu0  ;;  %v1451_v5 = vmul.f32 %v1382_v54, %v1382_v54 }
 0x1e0   : > { %v1410_v51 = vadd.f32 %v1409_v29, %v1379_v46  ;;  %v1448_v37 = vmul.f32 %v1379_v46, %v1379_v46  ;;  %v1449_v36 = vmul.f32 %v1380_v48, %v1380_v48 }
 0x1e1   : > { %v1910_v56 = vpop.f32.mrf.mxu0 }
 0x1e2   : > { %v1411_v38 = vadd.f32 %v1410_v51, %v1380_v48  ;;  %v1479_v61 = vadd.f32 %v1478_v30, %v1448_v37  ;;  %v1220_v63 = vpack.c.bf16 %v1910_v56, %v1909_v27 }
 0x1e3   : > { %v1123_v41 = vpop.f32.mrf.mxu0 }
 0x1e4   : > { %v1412_v1 = vadd.f32 %v1411_v38, %v1381_v49  ;;  %v1480_v4 = vadd.f32 %v1479_v61, %v1449_v36  ;;  %1857 = vst [vmem:[%s2528_s10 + $0x28] sm:$0xff] %v1220_v63   ;;  %v1219_v44 = vpack.c.bf16 %v1123_v41, %v1120_v13  ;;  %v1385_v14 = vunpack.c.l.bf16 %v1220_v63 }
 0x1e5   : > { %v1913_v59 = vpop.f32.mrf.mxu0  ;;  %v1386_v21 = vunpack.c.h.bf16 %v1220_v63 }
 0x1e6   : > { %v1481_v10 = vadd.f32 %v1480_v4, %v1450_v58  ;;  %v1413_v47 = vadd.f32 %v1412_v1, %v1382_v54  ;;  %1856 = vst [vmem:[%s2528_s10 + $0x20] sm:$0xff] %v1219_v44   ;;  %v1383_v20 = vunpack.c.l.bf16 %v1219_v44  ;;  %v1384_v11 = vunpack.c.h.bf16 %v1219_v44 }
 0x1e7   : > { %v1136_v12 = vpop.f32.mrf.mxu0  ;;  %v1454_v3 = vmul.f32 %v1385_v14, %v1385_v14  ;;  %v1455_v0 = vmul.f32 %v1386_v21, %v1386_v21 }
 0x1e8   : > { %v1482_v50 = vadd.f32 %v1481_v10, %v1451_v5  ;;  %v1414_v25 = vadd.f32 %v1413_v47, %v1383_v20  ;;  %v1452_v55 = vmul.f32 %v1383_v20, %v1383_v20  ;;  %v1453_v57 = vmul.f32 %v1384_v11, %v1384_v11 }
 0x1e9   : > { %v1914_v16 = vpop.f32.mrf.mxu0 }
 0x1ea   : > { %v1222_v18 = vpack.c.bf16 %v1914_v16, %v1913_v59  ;;  %v1415_v62 = vadd.f32 %v1414_v25, %v1384_v11  ;;  %v1483_v60 = vadd.f32 %v1482_v50, %v1452_v55 }
 0x1eb   : > { %v1139_v22 = vpop.f32.mrf.mxu0 }
 0x1ec   : > { %1859 = vst [vmem:[%s2528_s10 + $0x38] sm:$0xff] %v1222_v18   ;;  %v1221_v24 = vpack.c.bf16 %v1139_v22, %v1136_v12  ;;  %v1416_v53 = vadd.f32 %v1415_v62, %v1385_v14  ;;  %v1484_v2 = vadd.f32 %v1483_v60, %v1453_v57  ;;  %v1389_v35 = vunpack.c.l.bf16 %v1222_v18 }
 0x1ed   : > { %v1917_v9 = vpop.f32.mrf.mxu1  ;;  %v1390_v17 = vunpack.c.h.bf16 %v1222_v18 }
 0x1ee   : > { %1858 = vst [vmem:[%s2528_s10 + $0x30] sm:$0xff] %v1221_v24   ;;  %v1387_v26 = vunpack.c.l.bf16 %v1221_v24  ;;  %v1485_v15 = vadd.f32 %v1484_v2, %v1454_v3  ;;  %v1388_v8 = vunpack.c.h.bf16 %v1221_v24  ;;  %v1417_v28 = vadd.f32 %v1416_v53, %v1386_v21 }
 0x1ef   : > { %v1152_v32 = vpop.f32.mrf.mxu1  ;;  %v1458_v43 = vmul.f32 %v1389_v35, %v1389_v35  ;;  %v1459_v48 = vmul.f32 %v1390_v17, %v1390_v17 }
 0x1f0   : > { %v1456_v6 = vmul.f32 %v1387_v26, %v1387_v26  ;;  %v1418_v31 = vadd.f32 %v1417_v28, %v1387_v26  ;;  %v1486_v19 = vadd.f32 %v1485_v15, %v1455_v0  ;;  %v1457_v40 = vmul.f32 %v1388_v8, %v1388_v8 }
 0x1f1   : > { %v1918_v33 = vpop.f32.mrf.mxu1 }
 0x1f2   : > { %v1224_v39 = vpack.c.bf16 %v1918_v33, %v1917_v9  ;;  %v1419_v34 = vadd.f32 %v1418_v31, %v1388_v8  ;;  %v1487_v42 = vadd.f32 %v1486_v19, %v1456_v6 }
 0x1f3   : > { %v1155_v23 = vpop.f32.mrf.mxu1 }
 0x1f4   : > { %1861 = vst [vmem:[%s2528_s10 + $0x48] sm:$0xff] %v1224_v39   ;;  %v1223_v52 = vpack.c.bf16 %v1155_v23, %v1152_v32  ;;  %v1420_v45 = vadd.f32 %v1419_v34, %v1389_v35  ;;  %v1488_v27 = vadd.f32 %v1487_v42, %v1457_v40  ;;  %v1393_v30 = vunpack.c.l.bf16 %v1224_v39 }
 0x1f5   : > { %v1921_v7 = vpop.f32.mrf.mxu1  ;;  %v1394_v61 = vunpack.c.h.bf16 %v1224_v39 }
 0x1f6   : > { %1860 = vst [vmem:[%s2528_s10 + $0x40] sm:$0xff] %v1223_v52   ;;  %v1391_v46 = vunpack.c.l.bf16 %v1223_v52  ;;  %v1489_v29 = vadd.f32 %v1488_v27, %v1458_v43  ;;  %v1392_v13 = vunpack.c.h.bf16 %v1223_v52  ;;  %v1421_v49 = vadd.f32 %v1420_v45, %v1390_v17 }
 0x1f7   : > { %v1168_v51 = vpop.f32.mrf.mxu1  ;;  %v1462_v44 = vmul.f32 %v1393_v30, %v1393_v30  ;;  %v1463_v20 = vmul.f32 %v1394_v61, %v1394_v61 }
 0x1f8   : > { %v1460_v37 = vmul.f32 %v1391_v46, %v1391_v46  ;;  %v1422_v54 = vadd.f32 %v1421_v49, %v1391_v46  ;;  %v1490_v56 = vadd.f32 %v1489_v29, %v1459_v48  ;;  %v1461_v41 = vmul.f32 %v1392_v13, %v1392_v13 }
 0x1f9   : > { %v1922_v38 = vpop.f32.mrf.mxu1 }
 0x1fa   : > { %v1226_v36 = vpack.c.bf16 %v1922_v38, %v1921_v7  ;;  %v1423_v63 = vadd.f32 %v1422_v54, %v1392_v13  ;;  %v1491_v58 = vadd.f32 %v1490_v56, %v1460_v37 }
 0x1fb   : > { %v1171_v1 = vpop.f32.mrf.mxu1 }
 0x1fc   : > { %1863 = vst [vmem:[%s2528_s10 + $0x58] sm:$0xff] %v1226_v36   ;;  %v1225_v4 = vpack.c.bf16 %v1171_v1, %v1168_v51  ;;  %v1424_v59 = vadd.f32 %v1423_v63, %v1393_v30  ;;  %v1492_v5 = vadd.f32 %v1491_v58, %v1461_v41  ;;  %v1397_v55 = vunpack.c.l.bf16 %v1226_v36 }
 0x1fd   : > { %v1925_v10 = vpop.f32.mrf.mxu1  ;;  %v1398_v57 = vunpack.c.h.bf16 %v1226_v36 }
 0x1fe   : > { %1862 = vst [vmem:[%s2528_s10 + $0x50] sm:$0xff] %v1225_v4   ;;  %v1395_v47 = vunpack.c.l.bf16 %v1225_v4  ;;  %v1493_v11 = vadd.f32 %v1492_v5, %v1462_v44  ;;  %v1396_v12 = vunpack.c.h.bf16 %v1225_v4  ;;  %v1425_v50 = vadd.f32 %v1424_v59, %v1394_v61 }
 0x1ff   : > { %v1184_v14 = vpop.f32.mrf.mxu1  ;;  %v1466_v2 = vmul.f32 %v1397_v55, %v1397_v55  ;;  %v1467_v8 = vmul.f32 %v1398_v57, %v1398_v57 }
 0x200   : > { %v1464_v25 = vmul.f32 %v1395_v47, %v1395_v47  ;;  %v1426_v16 = vadd.f32 %v1425_v50, %v1395_v47  ;;  %v1494_v18 = vadd.f32 %v1493_v11, %v1463_v20  ;;  %v1465_v22 = vmul.f32 %v1396_v12, %v1396_v12 }
 0x201   : > { %v1926_v21 = vpop.f32.mrf.mxu1 }
 0x202   : > { %v1228_v62 = vpack.c.bf16 %v1926_v21, %v1925_v10  ;;  %v1427_v60 = vadd.f32 %v1426_v16, %v1396_v12  ;;  %v1495_v24 = vadd.f32 %v1494_v18, %v1464_v25 }
 0x203   : > { %v1187_v3 = vpop.f32.mrf.mxu1 }
 0x204   : > { %1865 = vst [vmem:[%s2528_s10 + $0x68] sm:$0xff] %v1228_v62   ;;  %v1227_v53 = vpack.c.bf16 %v1187_v3, %v1184_v14  ;;  %v1428_v9 = vadd.f32 %v1427_v60, %v1397_v55  ;;  %v1496_v26 = vadd.f32 %v1495_v24, %v1465_v22  ;;  %v1401_v19 = vunpack.c.l.bf16 %v1228_v62 }
 0x205   : > { %v1929_v0 = vpop.f32.mrf.mxu1  ;;  %v1402_v40 = vunpack.c.h.bf16 %v1228_v62 }
 0x206   : > { %1864 = vst [vmem:[%s2528_s10 + $0x60] sm:$0xff] %v1227_v53   ;;  %v1399_v15 = vunpack.c.l.bf16 %v1227_v53  ;;  %v1497_v28 = vadd.f32 %v1496_v26, %v1466_v2  ;;  %v1400_v32 = vunpack.c.h.bf16 %v1227_v53  ;;  %v1429_v6 = vadd.f32 %v1428_v9, %v1398_v57 }
 0x207   : > { %v1200_v35 = vpop.f32.mrf.mxu1  ;;  %v1470_v27 = vmul.f32 %v1401_v19, %v1401_v19  ;;  %v1471_v29 = vmul.f32 %v1402_v40, %v1402_v40 }
 0x208   : > { %v1468_v31 = vmul.f32 %v1399_v15, %v1399_v15  ;;  %v1430_v33 = vadd.f32 %v1429_v6, %v1399_v15  ;;  %v1498_v39 = vadd.f32 %v1497_v28, %v1467_v8  ;;  %v1469_v23 = vmul.f32 %v1400_v32, %v1400_v32 }
 0x209   : > { %v1930_v17 = vpop.f32.mrf.mxu1 }
 0x20a   : > { %v1230_v34 = vpack.c.bf16 %v1930_v17, %v1929_v0  ;;  %v1431_v42 = vadd.f32 %v1430_v33, %v1400_v32  ;;  %v1499_v52 = vadd.f32 %v1498_v39, %v1468_v31 }
 0x20b   : > { %v1203_v43 = vpop.f32.mrf.mxu1 }
 0x20c   : > { %1867 = vst [vmem:[%s2528_s10 + $0x78] sm:$0xff] %v1230_v34   ;;  %v1229_v45 = vpack.c.bf16 %v1203_v43, %v1200_v35  ;;  %v1432_v7 = vadd.f32 %v1431_v42, %v1401_v19  ;;  %v1500_v46 = vadd.f32 %v1499_v52, %v1469_v23  ;;  %v1405_v30 = vunpack.c.l.bf16 %v1230_v34 }
 0x20d   : > { %v1406_v38 = vunpack.c.h.bf16 %v1230_v34 }
 0x20e   : > { %1866 = vst [vmem:[%s2528_s10 + $0x70] sm:$0xff] %v1229_v45   ;;  %v1403_v48 = vunpack.c.l.bf16 %v1229_v45  ;;  %v1501_v13 = vadd.f32 %v1500_v46, %v1470_v27  ;;  %v1404_v49 = vunpack.c.h.bf16 %v1229_v45  ;;  %v1433_v51 = vadd.f32 %v1432_v7, %v1402_v40 }
 0x20f   : > { %v1474_v41 = vmul.f32 %v1405_v30, %v1405_v30  ;;  %v1475_v4 = vmul.f32 %v1406_v38, %v1406_v38 }
 0x210   : > { %v1472_v37 = vmul.f32 %v1403_v48, %v1403_v48  ;;  %v1434_v54 = vadd.f32 %v1433_v51, %v1403_v48  ;;  %v1502_v56 = vadd.f32 %v1501_v13, %v1471_v29  ;;  %v1473_v61 = vmul.f32 %v1404_v49, %v1404_v49 }
 0x212   : > { %v1435_v36 = vadd.f32 %v1434_v54, %v1404_v49  ;;  %v1503_v63 = vadd.f32 %v1502_v56, %v1472_v37 }
 0x214   : > { %v1436_v58 = vadd.f32 %v1435_v36, %v1405_v30  ;;  %v1504_v1 = vadd.f32 %v1503_v63, %v1473_v61 }
 0x216   : > { %v1437_v44 = vadd.f32 %v1436_v58, %v1406_v38  ;;  %v1505_v59 = vadd.f32 %v1504_v1, %v1474_v41 }
 0x218   : > { %v1438_v5 = vrot.slane %v1437_v44, 4  ;;  %v1506_v10 = vadd.f32 %v1505_v59, %v1475_v4 }
 0x21a   : > { %v1439_v47 = vadd.f32 %v1438_v5, %v1437_v44  ;;  %v1507_v20 = vrot.slane %v1506_v10, 4 }
 0x21c   : > { %v1440_v11 = vrot.slane %v1439_v47, 2  ;;  %v1508_v12 = vadd.f32 %v1507_v20, %v1506_v10 }
 0x21e   : > { %v1441_v50 = vadd.f32 %v1440_v11, %v1439_v47  ;;  %v1509_v14 = vrot.slane %v1508_v12, 2 }
 0x220   : > { %v1442_v25 = vrot.slane %v1441_v50, 1  ;;  %v1510_v55 = vadd.f32 %v1509_v14, %v1508_v12 }
 0x222   : > { %v1511_v16 = vrot.slane %v1510_v55, 1  ;;  %v1443_v18 = vadd.f32 %v1442_v25, %v1441_v50 }
 0x224   : > { %v1512_v21 = vadd.f32 %v1511_v16, %v1510_v55 }
 0x226   : > { %v1514_v62 = vsel %vm1513_vm8, %v1443_v18, %v1512_v21 }
 0x227   : > { %1515 = vst [vmem:[%s212_s18] sm:$0x3] %v1514_v62 }
 0x228 PF: > { %s14_s14 = sadd.s32 1, %s2035_s14   ;;  %s2563_s12 = smov %s2031_s13 }
 0x229   : > { %p11_p5 = scmp.ge.s32.totalorder %s14_s14, 4   ;;  %s2564_s13 = smov %s2566_s15 }
 0x22b   :  { %13 = sbr.rel (!%p11_p5) target bundleno = 2 (0x2), region = 71 }

// kernel: residual_block_forward.4
= control target key start
LH: loop header
LB: loop body
LE: loop exit
PB: predicated region body
PF: predicated region fallthrough
CT: control target
= control target key end

     0   :  { %s4524_s18 = smov 0   ;;  %s4526_s19 = smov 0   ;;  %s5882_s0 = inlined_call_operand.vmem [shape: bf16[2,16,16,128], index: 0, kind: input, shape index: {}]   ;;  %s5883_s1 = inlined_call_operand.vmem [shape: bf16[1152,128], index: 1, kind: input, shape index: {}]   ;;  %s5884_s2 = inlined_call_operand.vmem [shape: f32[1,128], index: 2, kind: input, shape index: {}]   ;;  %s5885_s3 = inlined_call_operand.vmem [shape: f32[1,128], index: 3, kind: input, shape index: {}]   ;;  %s5886_s4 = inlined_call_operand.vmem [shape: bf16[2,256,128], index: 4, kind: output, shape index: {0}]   ;;  %s5887_s5 = inlined_call_operand.vmem [shape: f32[2,1,2,128], index: 5, kind: output, shape index: {1}]  }
   0x1   :  { %s4528_s20 = smov 0  }
   0x2 LB: > { %s28_s21 = sadd.s32 1, %s4487_s19  ;;  %p3365_p0 = scmp.ge.s32.totalorder %s4491_s20, 1  ;;  %s4491_s20 = sphi %s4528_s20, %s16_s20   ;;  %s4487_s19 = sphi %s4526_s19, %s5919_s19   ;;  %s4483_s18 = sphi %s4524_s18, %s5918_s18  }
   0x3   : > { %p30_p1 = scmp.ge.s32.totalorder %s28_s21, 2  ;;  %p206_p2 = scmp.lt.s32.totalorder %s4491_s20, 3 }
   0x5   : > { %s5921_s21 = smov (%p30_p1, %s28_s21), 0  ;;  %p207_p3 = pnand %p3365_p0, %p206_p2 }
   0x7   : > { %210 = sbr.rel (%p207_p3) target bundleno = 590 (0x24e), region = 36 }
   0xc   : > { %v4348_v0 = vld [vmem:[%s5883_s1 + $0x78] sm:$0xff]   ;;  %v4493_v2 = vmov 0   ;;  %v4350_v3 = vld [vmem:[%s5883_s1 + $0x70] sm:$0xff]   ;;  %v4352_v5 = vld [vmem:[%s5883_s1 + $0x68] sm:$0xff]   ;;  %p245_p4 = scmp.lt.s32.totalorder %s4483_s18, 1  ;;  %vm1484_vm0 = vcmask 1046528  }
   0xd   : > { %v4349_v1 = vld [vmem:[%s5883_s1 + $0x38] sm:$0xff]   ;;  %270 = vst [vmem:[#allocation2] sm:$0xf] %v4493_v2  ;;  %271 = vst [vmem:[#allocation2 + $0x4] sm:$0xf] %v4493_v2  ;;  %3787 = vmatprep.subr.bf16.mxu0 %v4348_v0  ;;  %4307 = vmatprep.subr.bf16.mxu1 %v4348_v0  ;;  %v4351_v4 = vld [vmem:[%s5883_s1 + $0x30] sm:$0xff]  }
   0xe   : > { %272 = vst [vmem:[#allocation2 + $0x8] sm:$0x1] %v4493_v2  ;;  %273 = vst [vmem:[#allocation2 + $0xc] sm:$0xf] %v4493_v2  ;;  %3788 = vmatpush3.bf16.msra.mxu0 %v4349_v1  ;;  %4315 = vmatpush3.bf16.msra.mxu1 %v4349_v1  ;;  %v4353_v6 = vld [vmem:[%s5883_s1 + $0x28] sm:$0xff]   ;;  %v4354_v7 = vld [vmem:[%s5883_s1 + $0x60] sm:$0xff]  }
   0xf   : > { %274 = vst [vmem:[#allocation2 + $0x10] sm:$0xf] %v4493_v2  ;;  %275 = vst [vmem:[#allocation2 + $0x14] sm:$0x1] %v4493_v2  ;;  %3789 = vmatprep.subr.bf16.mxu0 %v4350_v3  ;;  %4308 = vmatprep.subr.bf16.mxu1 %v4350_v3  ;;  %s5923_s18 = smov (!%p245_p4, %s4483_s18), 1  ;;  %v4355_v8 = vld [vmem:[%s5883_s1 + $0x20] sm:$0xff]  }
  0x10   : > { %276 = vst [vmem:[#allocation2 + $0x18] sm:$0xf] %v4493_v2  ;;  %277 = vst [vmem:[#allocation2 + $0x1c] sm:$0xf] %v4493_v2  ;;  %v4356_v9 = vld [vmem:[%s5883_s1 + $0x58] sm:$0xff]   ;;  %s3547_s15 = sshll.u32 %s5923_s18, 7 }
  0x11   : > { %278 = vst [vmem:[#allocation2 + $0x20] sm:$0x1] %v4493_v2  ;;  %279 = vst [vmem:[#allocation2 + $0x24] sm:$0xf] %v4493_v2  ;;  %v4357_v10 = vld [vmem:[%s5883_s1 + $0x18] sm:$0xff]   ;;  %v4358_v11 = vld [vmem:[%s5883_s1 + $0x50] sm:$0xff]   ;;  %s4587_s26 = scalar_lea.vmem %s5882_s0, %s3547_s15  ;;  %s5756_s24 = scalar_lea.vmem %s5886_s4, %s3547_s15 }
  0x12   : > { %280 = vst [vmem:[#allocation2 + $0x28] sm:$0xf] %v4493_v2  ;;  %281 = vst [vmem:[#allocation2 + $0x2c] sm:$0x1] %v4493_v2  ;;  %3790 = vmatpush3.bf16.msra.mxu0 %v4351_v4  ;;  %4316 = vmatpush3.bf16.msra.mxu1 %v4351_v4  ;;  %v3767_v14 = vld [vmem:[%s4587_s26 + $0x58] sm:$0xff]   ;;  %v4359_v15 = vld [vmem:[%s5883_s1 + $0x10] sm:$0xff]  }
  0x13   : > { %282 = vst [vmem:[#allocation2 + $0x30] sm:$0xf] %v4493_v2  ;;  %283 = vst [vmem:[#allocation2 + $0x34] sm:$0xf] %v4493_v2  ;;  %3791 = vmatprep.subr.bf16.mxu0 %v4352_v5  ;;  %4309 = vmatprep.subr.bf16.mxu1 %v4352_v5  ;;  %v4600_v19 = vld [vmem:[%s5884_s2] ss:$0 sm:$0xff]  ;;  %v3659_v22 = vunpack.c.l.bf16 %v3767_v14  ;;  %v3660_v23 = vunpack.c.h.bf16 %v3767_v14 }
  0x14   : > { %284 = vst [vmem:[#allocation2 + $0x38] sm:$0x1] %v4493_v2  ;;  %285 = vst [vmem:[#allocation2 + $0x3c] sm:$0xf] %v4493_v2  ;;  %v4589_v12 = vld [vmem:[#allocation2] sm:$0xff]   ;;  %v4360_v20 = vld [vmem:[%s5883_s1 + $0x48] sm:$0xff]  }
  0x15   : > { %286 = vst [vmem:[#allocation2 + $0x40] sm:$0xf] %v4493_v2  ;;  %287 = vst [vmem:[#allocation2 + $0x44] sm:$0x1] %v4493_v2  ;;  %v1251_v16 = vshrl.u32 %v4589_v12, 16  ;;  %v1253_v17 = vshll.u32 %v4589_v12, 16  ;;  %v416_v27 = vmul.f32 %v3659_v22, %v4600_v19  ;;  %v417_v28 = vmul.f32 %v3660_v23, %v4600_v19 }
  0x16   : > { %288 = vst [vmem:[#allocation2 + $0x48] sm:$0xf] %v4493_v2  ;;  %289 = vst [vmem:[#allocation2 + $0x4c] sm:$0xf] %v4493_v2  ;;  %3792 = vmatpush3.bf16.msra.mxu0 %v4353_v6  ;;  %4317 = vmatpush3.bf16.msra.mxu1 %v4353_v6  ;;  %v4608_v26 = vld [vmem:[%s5885_s3] ss:$0 sm:$0xff] }
  0x17   : > { %290 = vst [vmem:[#allocation2 + $0x50] sm:$0x1] %v4493_v2  ;;  %291 = vst [vmem:[#allocation2 + $0x54] sm:$0xf] %v4493_v2  ;;  %3793 = vmatprep.subr.bf16.mxu0 %v4354_v7  ;;  %4310 = vmatprep.subr.bf16.mxu1 %v4354_v7  ;;  %v1255_v24 = vrot.slane %v1253_v17, 1  ;;  %v1485_v29 = vrot.slane %v4589_v12, 1  ;;  %v454_v33 = vadd.f32 %v4608_v26, %v416_v27 }
  0x18   : > { %292 = vst [vmem:[#allocation2 + $0x58] sm:$0xf] %v4493_v2  ;;  %293 = vst [vmem:[#allocation2 + $0x5c] sm:$0x1] %v4493_v2  ;;  %vm1249_vm1 = vsmask.f32 7424  ;;  %v455_v34 = vadd.f32 %v4608_v26, %v417_v28 }
  0x19   : > { %294 = vst [vmem:[#allocation2 + $0x60] sm:$0xf] %v4493_v2  ;;  %295 = vst [vmem:[#allocation2 + $0x64] sm:$0xf] %v4493_v2  ;;  %v4361_v30 = vld [vmem:[%s5883_s1 + $0x8] sm:$0xff]   ;;  %v1256_v31 = vor.u32 %v1255_v24, %v1251_v16  ;;  %v4362_v32 = vld [vmem:[%s5883_s1 + $0x40] sm:$0xff]  }
  0x1a   : > { %296 = vst [vmem:[#allocation2 + $0x68] sm:$0x1] %v4493_v2  ;;  %297 = vst [vmem:[#allocation2 + $0x6c] sm:$0xf] %v4493_v2  ;;  %3794 = vmatpush3.bf16.msra.mxu0 %v4355_v8  ;;  %4318 = vmatpush3.bf16.msra.mxu1 %v4355_v8  ;;  %vm592_vm2 = vsmask.f32 256 }
  0x1b   : > { %298 = vst [vmem:[#allocation2 + $0x70] sm:$0xf] %v4493_v2  ;;  %299 = vst [vmem:[#allocation2 + $0x74] sm:$0x1] %v4493_v2  ;;  %3795 = vmatprep.subr.bf16.mxu0 %v4356_v9  ;;  %4311 = vmatprep.subr.bf16.mxu1 %v4356_v9  ;;  %v3614_v35 = vld [vmem:[%s4587_s26] sm:$0xff]   ;;  %v486_v41 = vmax.f32 %v454_v33, 0.0 }
  0x1c   : > { %300 = vst [vmem:[#allocation2 + $0x78] sm:$0xf] %v4493_v2  ;;  %301 = vst [vmem:[#allocation2 + $0x7c] sm:$0xf] %v4493_v2  ;;  %vm593_vm3 = vsmask.f32 4368  ;;  %v3615_v38 = vunpack.c.l.bf16 %v3614_v35  ;;  %v3616_v39 = vunpack.c.h.bf16 %v3614_v35 }
  0x1d   : > { %302 = vst [vmem:[#allocation2 + $0x80] sm:$0x1] %v4493_v2  ;;  %303 = vst [vmem:[#allocation2 + $0x84] sm:$0xf] %v4493_v2  ;;  %v4363_v40 = vld [vmem:[%s5883_s1] sm:$0xff]   ;;  %v487_v42 = vmax.f32 %v455_v34, 0.0  ;;  %v3571_v46 = vpack.c.bf16 %v486_v41, %v486_v41 }
  0x1e   : > { %304 = vst [vmem:[#allocation2 + $0x88] sm:$0xf] %v4493_v2  ;;  %305 = vst [vmem:[#allocation2 + $0x8c] sm:$0x1] %v4493_v2  ;;  %3796 = vmatpush3.bf16.msra.mxu0 %v4357_v10  ;;  %4319 = vmatpush3.bf16.msra.mxu1 %v4357_v10  ;;  %v4368_v43 = vld [vmem:[%s5883_s1 + $0xf8] sm:$0xff]   ;;  %v394_v44 = vmul.f32 %v3615_v38, %v4600_v19  ;;  %v395_v45 = vmul.f32 %v3616_v39, %v4600_v19  ;;  %vm916_vm4 = vcmask 1043456  }
  0x1f   : > { %306 = vst [vmem:[#allocation2 + $0x90] sm:$0xf] %v4493_v2  ;;  %307 = vst [vmem:[#allocation2 + $0x94] sm:$0xf] %v4493_v2  ;;  %3797 = vmatprep.subr.bf16.mxu0 %v4358_v11  ;;  %4312 = vmatprep.subr.bf16.mxu1 %v4358_v11  ;;  %v3572_v47 = vpack.c.bf16 %v487_v42, %v487_v42  ;;  %v4369_v48 = vld [vmem:[%s5883_s1 + $0x178] sm:$0xff]   ;;  %vm923_vm6 = vcmask 1040384  }
  0x20   : > { %308 = vst [vmem:[#allocation2 + $0x98] sm:$0x1] %v4493_v2  ;;  %309 = vst [vmem:[#allocation2 + $0x9c] sm:$0xf] %v4493_v2  ;;  %vm917_vm5 = vsmask.f32 7938  ;;  %v432_v49 = vadd.f32 %v4608_v26, %v394_v44  ;;  %v433_v50 = vadd.f32 %v4608_v26, %v395_v45 }
  0x21   : > { %310 = vst [vmem:[#allocation2 + $0xa0] sm:$0xf] %v4493_v2  ;;  %311 = vst [vmem:[#allocation2 + $0xa4] sm:$0x1] %v4493_v2  ;;  %v3768_v51 = vld [vmem:[%s4587_s26 + $0x60] sm:$0xff]   ;;  %v783_v52 = vshrl.u32 %v3571_v46, 16 }
  0x22   : > { %312 = vst [vmem:[#allocation2 + $0xa8] sm:$0xf] %v4493_v2  ;;  %313 = vst [vmem:[#allocation2 + $0xac] sm:$0xf] %v4493_v2  ;;  %3798 = vmatpush3.bf16.msra.mxu0 %v4359_v15  ;;  %4320 = vmatpush3.bf16.msra.mxu1 %v4359_v15  ;;  %v786_v53 = vshll.u32 %v3571_v46, 16  ;;  %v791_v54 = vshrl.u32 %v3572_v47, 16  ;;  %v3663_v60 = vunpack.c.l.bf16 %v3768_v51  ;;  %v3664_v61 = vunpack.c.h.bf16 %v3768_v51 }
  0x23   : > { %314 = vst [vmem:[#allocation2 + $0xb0] sm:$0x1] %v4493_v2  ;;  %315 = vst [vmem:[#allocation2 + $0xb4] sm:$0xf] %v4493_v2  ;;  %3799 = vmatprep.subr.bf16.mxu0 %v4360_v20  ;;  %4313 = vmatprep.subr.bf16.mxu1 %v4360_v20  ;;  %v794_v55 = vshll.u32 %v3572_v47, 16  ;;  %v4373_v56 = vld [vmem:[%s5883_s1 + $0x138] sm:$0xff]  }
  0x24   : > { %316 = vst [vmem:[#allocation2 + $0xb8] sm:$0xf] %v4493_v2  ;;  %317 = vst [vmem:[#allocation2 + $0xbc] sm:$0x1] %v4493_v2  ;;  %v464_v58 = vmax.f32 %v432_v49, 0.0  ;;  %v465_v59 = vmax.f32 %v433_v50, 0.0  ;;  %v418_v6 = vmul.f32 %v3663_v60, %v4600_v19  ;;  %v419_v7 = vmul.f32 %v3664_v61, %v4600_v19 }
  0x25   : > { %318 = vst [vmem:[#allocation2 + $0xc0] sm:$0xf] %v4493_v2  ;;  %319 = vst [vmem:[#allocation2 + $0xc4] sm:$0xf] %v4493_v2  ;;  %v785_v62 = vrot.slane %v783_v52, 7  ;;  %v793_v63 = vrot.slane %v791_v54, 7 }
  0x26   : > { %320 = vst [vmem:[#allocation2 + $0xc8] sm:$0x1] %v4493_v2  ;;  %321 = vst [vmem:[#allocation2 + $0xcc] sm:$0xf] %v4493_v2  ;;  %3800 = vmatpush3.bf16.msra.mxu0 %v4361_v30  ;;  %4321 = vmatpush3.bf16.msra.mxu1 %v4361_v30  ;;  %v998_v1 = vld [vmem:[#allocation2 + $0x90] sm:$0xf]  ;;  %v3549_v4 = vpack.c.bf16 %v464_v58, %v464_v58  ;;  %v3550_v5 = vpack.c.bf16 %v465_v59, %v465_v59 }
  0x27   : > { %322 = vst [vmem:[#allocation2 + $0xd0] sm:$0xf] %v4493_v2  ;;  %323 = vst [vmem:[#allocation2 + $0xd4] sm:$0x1] %v4493_v2  ;;  %3801 = vmatprep.subr.bf16.mxu0 %v4362_v32  ;;  %4314 = vmatprep.subr.bf16.mxu1 %v4362_v32  ;;  %v1002_v2 = vld [vmem:[#allocation2 + $0x98] sm:$0x1]  ;;  %v788_v8 = vor.u32 %v786_v53, %v785_v62  ;;  %v796_v10 = vor.u32 %v794_v55, %v793_v63 }
  0x28   : > { %v4365_v13 = vld [vmem:[#allocation2 + $0x8] ss:$0 sps:$4 sm:$0x11]   ;;  %vm4645_vm7 = vmor %vm592_vm2, %vm593_vm3  ;;  %v789_v9 = vrot.slane %v785_v62, 4  ;;  %v798_v11 = vrot.slane %v793_v63, 4  ;;  %v596_v14 = vshrl.u32 %v3549_v4, 16  ;;  %v456_v23 = vadd.f32 %v4608_v26, %v418_v6 }
  0x29   : > { %v1258_v18 = vshll.u32 %v4365_v13, 16  ;;  %v1486_v21 = vrot.slane %v4365_v13, 1  ;;  %vm4651_vm8 = vmand %vm916_vm4, %vm917_vm5  ;;  %v3757_v13 = vld [vmem:[%s4587_s26 + $0x8] sm:$0xff]   ;;  %v599_v15 = vshll.u32 %v3549_v4, 16  ;;  %v604_v16 = vshrl.u32 %v3550_v5, 16  ;;  %v4383_v24 = vld [vmem:[%s5883_s1 + $0x170] sm:$0xff]  }
  0x2a   : > { %3802 = vmatpush3.bf16.msra.mxu0 %v4363_v40  ;;  %4322 = vmatpush3.bf16.msra.mxu1 %v4363_v40  ;;  %vm4657_vm9 = vmand %vm923_vm6, %vm592_vm2  ;;  %v607_v17 = vshll.u32 %v3550_v5, 16  ;;  %v999_v20 = vsel %vm4651_vm8, %v788_v8, %v998_v1  ;;  %v925_v22 = vld [vmem:[#allocation2 + $0x14] sm:$0x1]  ;;  %v457_v28 = vadd.f32 %v4608_v26, %v419_v7  ;;  %v488_v30 = vmax.f32 %v456_v23, 0.0  ;;  %v3769_v38 = vld [vmem:[%s4587_s26 + $0x68] sm:$0xff]   ;;  %s3370_s15 = sshll.u32 %s5923_s18, 1 }
  0x2b   : > { %v1260_v25 = vrot.slane %v1258_v18, 1  ;;  %v4623_v36 = vsel %vm1484_vm0, %v1485_v29, %v1486_v21  ;;  %3899 = vmatprep.subr.bf16.mxu1 %v4368_v43  ;;  %4011 = vmatprep.subr.bf16.mxu0 %v4369_v48  ;;  %v797_v18 = vsel %vm4645_vm7, %v789_v9, %v796_v10  ;;  %v1003_v21 = vsel %vm4657_vm9, %v798_v11, %v1002_v2  ;;  %v3758_v47 = vld [vmem:[%s4587_s26 + $0x10] sm:$0xff]   ;;  %s266_s28 = scalar_lea.vmem %s5887_s5, %s3370_s15 }
  0x2c   : > { %1000 = vst [vmem:[#allocation2 + $0x90] sm:$0xf] %v999_v20  ;;  %1001 = vst [vmem:[#allocation2 + $0x94] sm:$0xf] %v797_v18  ;;  %v606_v27 = vrot.slane %v604_v16, 7  ;;  %v3619_v29 = vunpack.c.l.bf16 %v3757_v13  ;;  %v489_v39 = vmax.f32 %v457_v28, 0.0  ;;  %v3573_v40 = vpack.c.bf16 %v488_v30, %v488_v30 }
  0x2d   : > { %v1261_v37 = vsel %vm1249_vm1, %v1256_v31, %v1260_v25  ;;  %1004 = vst [vmem:[#allocation2 + $0x98] sm:$0x1] %v1003_v21  ;;  %v598_v25 = vrot.slane %v596_v14, 7  ;;  %v3620_v31 = vunpack.c.h.bf16 %v3757_v13  ;;  %v3667_v46 = vunpack.c.l.bf16 %v3769_v38  ;;  %v1009_v14 = vld [vmem:[#allocation2 + $0xa4] sm:$0x1]  ;;  %v4372_v30 = vld [vmem:[%s5883_s1 + $0xb8] sm:$0xff]  }
  0x2e   : > { %2165 = vmatprep.mubr.bf16.mxu0 %v1261_v37  ;;  %v609_v34 = vor.u32 %v607_v17, %v606_v27  ;;  %v611_v35 = vrot.slane %v606_v27, 4  ;;  %v4385_v37 = vld [vmem:[%s5883_s1 + $0x130] sm:$0xff]   ;;  %v396_v41 = vmul.f32 %v3619_v29, %v4600_v19  ;;  %v3574_v48 = vpack.c.bf16 %v489_v39, %v489_v39 }
  0x2f   : > { %2166 = vmatmul.mubr.bf16.vlgmr.msra.gmra.mxu0 %v4589_v12  ;;  %v919_v12 = vld [vmem:[#allocation2 + $0xc] sm:$0xf]  ;;  %v601_v32 = vor.u32 %v599_v15, %v598_v25  ;;  %v602_v33 = vrot.slane %v598_v25, 4  ;;  %v397_v42 = vmul.f32 %v3620_v31, %v4600_v19  ;;  %v800_v49 = vshrl.u32 %v3573_v40, 16  ;;  %v4696_v17 = vld [vmem:[%s4587_s26 + $0x70] sm:$0xff]  }
  0x30   : > { %4012 = vmatpush3.bf16.msra.mxu0 %v4373_v56  ;;  %v926_v45 = vsel %vm4657_vm9, %v611_v35, %v925_v22  ;;  %v803_v50 = vshll.u32 %v3573_v40, 16  ;;  %v434_v51 = vadd.f32 %v4608_v26, %v396_v41  ;;  %v3668_v53 = vunpack.c.h.bf16 %v3769_v38  ;;  %v1005_v56 = vld [vmem:[#allocation2 + $0x9c] sm:$0xf]  ;;  %v4374_v39 = vld [vmem:[%s5883_s1 + $0xf0] sm:$0xff]   ;;  %v928_v41 = vld [vmem:[#allocation2 + $0x18] sm:$0xf] }
  0x31   : > { %4013 = vmatprep.subr.bf16.mxu0 %v4383_v24  ;;  %v610_v43 = vsel %vm4645_vm7, %v602_v33, %v609_v34  ;;  %v920_v44 = vsel %vm4651_vm8, %v601_v32, %v919_v12  ;;  %927 = vst [vmem:[#allocation2 + $0x14] sm:$0x1] %v926_v45  ;;  %v435_v52 = vadd.f32 %v4608_v26, %v397_v42  ;;  %v3623_v55 = vunpack.c.l.bf16 %v3758_v47  ;;  %v4397_v34 = vld [vmem:[%s5883_s1 + $0x168] sm:$0xff]   ;;  %v4440_v57 = vld [vmem:[%s5883_s1 + $0x230] sm:$0xff]  }
  0x32   : > { %921 = vst [vmem:[#allocation2 + $0xc] sm:$0xf] %v920_v44  ;;  %922 = vst [vmem:[#allocation2 + $0x10] sm:$0xf] %v610_v43  ;;  %v420_v54 = vmul.f32 %v3667_v46, %v4600_v19  ;;  %v3624_v58 = vunpack.c.h.bf16 %v3758_v47  ;;  %v802_v61 = vrot.slane %v800_v49, 7  ;;  %v808_v62 = vshrl.u32 %v3574_v48, 16 }
  0x33   : > { %v4366_v59 = vld [vmem:[#allocation2 + $0x90] sm:$0xff]   ;;  %v421_v63 = vmul.f32 %v3668_v53, %v4600_v19  ;;  %v811_v2 = vshll.u32 %v3574_v48, 16  ;;  %v466_v4 = vmax.f32 %v434_v51, 0.0  ;;  %v467_v5 = vmax.f32 %v435_v52, 0.0 }
  0x34   : > { %4014 = vmatpush3.bf16.msra.mxu0 %v4385_v37  ;;  %v4367_v60 = vld [vmem:[#allocation2 + $0x98] ss:$0 sps:$4 sm:$0x11]   ;;  %v458_v1 = vadd.f32 %v4608_v26, %v420_v54  ;;  %v398_v6 = vmul.f32 %v3623_v55, %v4600_v19  ;;  %v1395_v7 = vshrl.u32 %v4366_v59, 16  ;;  %v1397_v8 = vshll.u32 %v4366_v59, 16  ;;  %v4375_v55 = vld [vmem:[%s5883_s1 + $0xb0] sm:$0xff]  }
  0x35   : > { %v1402_v9 = vshll.u32 %v4367_v60, 16  ;;  %v805_v10 = vor.u32 %v803_v50, %v802_v61  ;;  %v806_v11 = vrot.slane %v802_v61, 4  ;;  %v810_v13 = vrot.slane %v808_v62, 7  ;;  %4015 = vmatprep.subr.bf16.mxu0 %v4397_v34  ;;  %v4378_v62 = vld [vmem:[%s5883_s1 + $0xe8] sm:$0xff]  }
  0x36   : > { %v3551_v15 = vpack.c.bf16 %v466_v4, %v466_v4  ;;  %v3552_v16 = vpack.c.bf16 %v467_v5, %v467_v5  ;;  %v1399_v18 = vrot.slane %v1397_v8, 1  ;;  %v459_v12 = vadd.f32 %v4608_v26, %v421_v63 }
  0x37   : > { %v1404_v20 = vrot.slane %v1402_v9, 1  ;;  %v1006_v21 = vsel %vm4651_vm8, %v805_v10, %v1005_v56  ;;  %v813_v24 = vor.u32 %v811_v2, %v810_v13  ;;  %v399_v25 = vmul.f32 %v3624_v58, %v4600_v19  ;;  %v932_v56 = vld [vmem:[#allocation2 + $0x20] sm:$0x1]  ;;  %v4750_v10 = vld [vmem:[%s4587_s26 + $0x18] sm:$0xff]  }
  0x38   : > { %v4703_v23 = vld [vmem:[#allocation2 + $0x14] ss:$0 sps:$4 sm:$0x11]   ;;  %1007 = vst [vmem:[#allocation2 + $0x9c] sm:$0xf] %v1006_v21  ;;  %v4707_v27 = vadd.f32 %v4608_v26, %v398_v6  ;;  %v3671_v28 = vunpack.c.l.bf16 %v4696_v17  ;;  %v1400_v29 = vor.u32 %v1399_v18, %v1395_v7  ;;  %v815_v31 = vrot.slane %v810_v13, 4 }
  0x39   : > { %v4701_v22 = vld [vmem:[#allocation2 + $0xc] sm:$0xff]   ;;  %v613_v32 = vshrl.u32 %v3551_v15, 16  ;;  %v616_v33 = vshll.u32 %v3551_v15, 16  ;;  %v1270_v38 = vshll.u32 %v4703_v23, 16  ;;  %v814_v40 = vsel %vm4645_vm7, %v806_v11, %v813_v24  ;;  %v1012_v18 = vld [vmem:[#allocation2 + $0xa8] sm:$0xf] }
  0x3a   : > { %v1263_v35 = vshrl.u32 %v4701_v22, 16  ;;  %v1265_v37 = vshll.u32 %v4701_v22, 16  ;;  %v4725_v42 = vsel %vm1249_vm1, %v1400_v29, %v1404_v20  ;;  %1008 = vst [vmem:[#allocation2 + $0xa0] sm:$0xf] %v814_v40  ;;  %v1010_v43 = vsel %vm4657_vm9, %v815_v31, %v1009_v14  ;;  %v4381_v6 = vld [vmem:[%s5883_s1 + $0xa8] sm:$0xff]   ;;  %v4382_v14 = vld [vmem:[%s5883_s1 + $0xe0] sm:$0xff]  }
  0x3b   : > { %v615_v44 = vrot.slane %v613_v32, 7  ;;  %v621_v45 = vshrl.u32 %v3552_v16, 16  ;;  %2261 = vmatprep.mubr.bf16.mxu1 %v4725_v42  ;;  %v1272_v47 = vrot.slane %v1270_v38, 1  ;;  %1011 = vst [vmem:[#allocation2 + $0xa4] sm:$0x1] %v1010_v43  ;;  %v624_v48 = vshll.u32 %v3552_v16, 16 }
  0x3c   : > { %v1267_v46 = vrot.slane %v1265_v37, 1  ;;  %v490_v49 = vmax.f32 %v458_v1, 0.0  ;;  %2262 = vmatmul.mubr.bf16.vlgmr.msra.gmra.mxu1 %v4366_v59  ;;  %v491_v53 = vmax.f32 %v459_v12, 0.0  ;;  %v437_v60 = vadd.f32 %v4608_v26, %v399_v25  ;;  %v4401_v59 = vld [vmem:[%s5883_s1 + $0x128] sm:$0xff]   ;;  %v1016_v12 = vld [vmem:[#allocation2 + $0xb0] sm:$0x1] }
  0x3d   : > { %v618_v50 = vor.u32 %v616_v33, %v615_v44  ;;  %v619_v51 = vrot.slane %v615_v44, 4  ;;  %v623_v52 = vrot.slane %v621_v45, 7  ;;  %3900 = vmatpush3.bf16.msra.mxu1 %v4372_v30  ;;  %v468_v61 = vmax.f32 %v4707_v27, 0.0  ;;  %4016 = vmatpush3.bf16.msra.mxu0 %v4401_v59  ;;  %v4384_v40 = vld [vmem:[%s5883_s1 + $0xa0] sm:$0xff]   ;;  %v4388_v45 = vld [vmem:[%s5883_s1 + $0xd8] sm:$0xff]  }
  0x3e   : > { %v1268_v54 = vor.u32 %v1267_v46, %v1263_v35  ;;  %v3575_v58 = vpack.c.bf16 %v490_v49, %v490_v49  ;;  %3901 = vmatprep.subr.bf16.mxu1 %v4374_v39  ;;  %v3576_v4 = vpack.c.bf16 %v491_v53, %v491_v53  ;;  %v469_v9 = vmax.f32 %v437_v60, 0.0  ;;  %v939_v53 = vld [vmem:[#allocation2 + $0x2c] sm:$0x1] }
  0x3f   : > { %v626_v63 = vor.u32 %v624_v48, %v623_v52  ;;  %v628_v1 = vrot.slane %v623_v52, 4  ;;  %v929_v2 = vsel %vm4651_vm8, %v618_v50, %v928_v41  ;;  %v3553_v24 = vpack.c.bf16 %v468_v61, %v468_v61  ;;  %v935_v48 = vld [vmem:[#allocation2 + $0x24] sm:$0xf] }
  0x40   : > { %v4744_v5 = vsel %vm1249_vm1, %v1268_v54, %v1272_v47  ;;  %930 = vst [vmem:[#allocation2 + $0x18] sm:$0xf] %v929_v2  ;;  %v817_v7 = vshrl.u32 %v3575_v58, 16  ;;  %v820_v8 = vshll.u32 %v3575_v58, 16  ;;  %v825_v15 = vshrl.u32 %v3576_v4, 16  ;;  %v4391_v58 = vld [vmem:[%s5883_s1 + $0x98] sm:$0xff]  }
  0x41   : > { %2173 = vmatprep.mubr.bf16.mxu0 %v4744_v5  ;;  %v627_v11 = vsel %vm4645_vm7, %v619_v51, %v626_v63  ;;  %v933_v13 = vsel %vm4657_vm9, %v628_v1, %v932_v56  ;;  %v828_v16 = vshll.u32 %v3576_v4, 16  ;;  %3902 = vmatpush3.bf16.msra.mxu1 %v4375_v55  ;;  %v4761_v20 = vld [vmem:[#allocation2 + $0x9c] sm:$0xff]   ;;  %v3554_v25 = vpack.c.bf16 %v469_v9, %v469_v9 }
  0x42   : > { %2174 = vmatmul.mubr.bf16.gmra.mxu0 %v4701_v22  ;;  %931 = vst [vmem:[#allocation2 + $0x1c] sm:$0xf] %v627_v11  ;;  %934 = vst [vmem:[#allocation2 + $0x20] sm:$0x1] %v933_v13  ;;  %v819_v21 = vrot.slane %v817_v7, 7  ;;  %v3672_v27 = vunpack.c.h.bf16 %v4696_v17  ;;  %3903 = vmatprep.subr.bf16.mxu1 %v4378_v62  ;;  %v827_v30 = vrot.slane %v825_v15, 7  ;;  %v422_v31 = vmul.f32 %v3671_v28, %v4600_v19 }
  0x43   : > { %v4377_v29 = vld [vmem:[#allocation2 + $0xa4] ss:$0 sps:$4 sm:$0x11]   ;;  %v3627_v32 = vunpack.c.l.bf16 %v4750_v10  ;;  %v3628_v33 = vunpack.c.h.bf16 %v4750_v10  ;;  %v1407_v34 = vshrl.u32 %v4761_v20, 16  ;;  %v1409_v35 = vshll.u32 %v4761_v20, 16 }
  0x44   : > { %v822_v37 = vor.u32 %v820_v8, %v819_v21  ;;  %v823_v38 = vrot.slane %v819_v21, 4  ;;  %v1414_v39 = vshll.u32 %v4377_v29, 16  ;;  %v830_v41 = vor.u32 %v828_v16, %v827_v30  ;;  %v4392_v8 = vld [vmem:[%s5883_s1 + $0xd0] sm:$0xff]   ;;  %v4801_v11 = vld [vmem:[%s4587_s26 + $0x20] sm:$0xff]  }
  0x45   : > { %v832_v43 = vrot.slane %v827_v30, 4  ;;  %v630_v44 = vshrl.u32 %v3553_v24, 16  ;;  %v1411_v17 = vrot.slane %v1409_v35, 1  ;;  %3904 = vmatpush3.bf16.msra.mxu1 %v4381_v6  ;;  %v633_v46 = vshll.u32 %v3553_v24, 16 }
  0x46   : > { %v1013_v28 = vsel %vm4651_vm8, %v822_v37, %v1012_v18  ;;  %v638_v47 = vshrl.u32 %v3554_v25, 16  ;;  %v1416_v49 = vrot.slane %v1414_v39, 1  ;;  %3905 = vmatprep.subr.bf16.mxu1 %v4382_v14  ;;  %v831_v50 = vsel %vm4645_vm7, %v823_v38, %v830_v41  ;;  %v4408_v18 = vld [vmem:[%s5883_s1 + $0x160] sm:$0xff]  }
  0x47   : > { %1014 = vst [vmem:[#allocation2 + $0xa8] sm:$0xf] %v1013_v28  ;;  %v1017_v51 = vsel %vm4657_vm9, %v832_v43, %v1016_v12  ;;  %v632_v52 = vrot.slane %v630_v44, 7  ;;  %v1412_v54 = vor.u32 %v1411_v17, %v1407_v34  ;;  %1015 = vst [vmem:[#allocation2 + $0xac] sm:$0xf] %v831_v50  ;;  %v641_v56 = vshll.u32 %v3554_v25, 16  ;;  %4017 = vmatprep.subr.bf16.mxu0 %v4408_v18 }
  0x48   : > { %1018 = vst [vmem:[#allocation2 + $0xb0] sm:$0x1] %v1017_v51  ;;  %v640_v55 = vrot.slane %v638_v47, 7  ;;  %v423_v60 = vmul.f32 %v3672_v27, %v4600_v19  ;;  %v460_v63 = vadd.f32 %v4608_v26, %v422_v31  ;;  %v400_v1 = vmul.f32 %v3627_v32, %v4600_v19  ;;  %v4393_v25 = vld [vmem:[%s5883_s1 + $0x90] sm:$0xff]   ;;  %v4409_v34 = vld [vmem:[%s5883_s1 + $0x120] sm:$0xff]  }
  0x49   : > { %v4787_v61 = vld [vmem:[#allocation2 + $0x18] sm:$0xff]   ;;  %v635_v59 = vor.u32 %v633_v46, %v632_v52  ;;  %v636_v62 = vrot.slane %v632_v52, 4  ;;  %v4792_v2 = vsel %vm1249_vm1, %v1412_v54, %v1416_v49  ;;  %v4794_v4 = vld [vmem:[#allocation2 + $0x20] ss:$0 sps:$4 sm:$0x11]   ;;  %3906 = vmatpush3.bf16.msra.mxu1 %v4384_v40  ;;  %v401_v31 = vmul.f32 %v3628_v33, %v4600_v19  ;;  %v4833_v40 = vld [vmem:[%s4587_s26 + $0x28] sm:$0xff]   ;;  %4018 = vmatpush3.bf16.msra.mxu0 %v4409_v34 }
  0x4a   : > { %v643_v6 = vor.u32 %v641_v56, %v640_v55  ;;  %v645_v7 = vrot.slane %v640_v55, 4  ;;  %v461_v9 = vadd.f32 %v4608_v26, %v423_v60  ;;  %2269 = vmatprep.mubr.bf16.mxu1 %v4792_v2  ;;  %v1275_v13 = vshrl.u32 %v4787_v61, 16  ;;  %3907 = vmatprep.subr.bf16.mxu1 %v4388_v45  ;;  %v1019_v52 = vld [vmem:[#allocation2 + $0xb4] sm:$0xf]  ;;  %v1023_v56 = vld [vmem:[#allocation2 + $0xbc] sm:$0x1] }
  0x4b   : > { %v1277_v14 = vshll.u32 %v4787_v61, 16  ;;  %v936_v15 = vsel %vm4651_vm8, %v635_v59, %v935_v48  ;;  %v492_v16 = vmax.f32 %v460_v63, 0.0  ;;  %v1282_v21 = vshll.u32 %v4794_v4, 16  ;;  %2270 = vmatmul.mubr.bf16.gmra.mxu1 %v4761_v20  ;;  %v4396_v20 = vld [vmem:[%s5883_s1 + $0xc8] sm:$0xff]  }
  0x4c   : > { %v644_v12 = vsel %vm4645_vm7, %v636_v62, %v643_v6  ;;  %937 = vst [vmem:[#allocation2 + $0x24] sm:$0xf] %v936_v15  ;;  %v940_v24 = vsel %vm4657_vm9, %v645_v7, %v939_v53  ;;  %v493_v27 = vmax.f32 %v461_v9, 0.0  ;;  %v438_v32 = vadd.f32 %v4608_v26, %v400_v1  ;;  %v4412_v53 = vld [vmem:[%s5883_s1 + $0x158] sm:$0xff]   ;;  %v4400_v59 = vld [vmem:[%s5883_s1 + $0x88] sm:$0xff]   ;;  %v4402_v62 = vld [vmem:[%s5883_s1 + $0xc0] sm:$0xff]  }
  0x4d   : > { %v1279_v29 = vrot.slane %v1277_v14, 1  ;;  %938 = vst [vmem:[#allocation2 + $0x28] sm:$0xf] %v644_v12  ;;  %941 = vst [vmem:[#allocation2 + $0x2c] sm:$0x1] %v940_v24  ;;  %v3577_v30 = vpack.c.bf16 %v492_v16, %v492_v16  ;;  %v1284_v35 = vrot.slane %v1282_v21, 1  ;;  %3908 = vmatpush3.bf16.msra.mxu1 %v4391_v58  ;;  %v3631_v38 = vunpack.c.l.bf16 %v4801_v11  ;;  %4019 = vmatprep.subr.bf16.mxu0 %v4412_v53 }
  0x4e   : > { %v3578_v37 = vpack.c.bf16 %v493_v27, %v493_v27  ;;  %v3632_v39 = vunpack.c.h.bf16 %v4801_v11  ;;  %v4835_v43 = vld [vmem:[#allocation2 + $0xa8] sm:$0xff]   ;;  %3909 = vmatprep.subr.bf16.mxu1 %v4392_v8  ;;  %v439_v33 = vadd.f32 %v4608_v26, %v401_v31  ;;  %v3635_v44 = vunpack.c.l.bf16 %v4833_v40 }
  0x4f   : > { %v1280_v41 = vor.u32 %v1279_v29, %v1275_v13  ;;  %v834_v10 = vshrl.u32 %v3577_v30, 16  ;;  %v4387_v17 = vld [vmem:[#allocation2 + $0xb0] ss:$0 sps:$4 sm:$0x11]   ;;  %v837_v28 = vshll.u32 %v3577_v30, 16  ;;  %v402_v47 = vmul.f32 %v3631_v38, %v4600_v19  ;;  %v4403_v30 = vld [vmem:[%s5883_s1 + $0x80] sm:$0xff]  }
  0x50   : > { %v842_v45 = vshrl.u32 %v3578_v37, 16  ;;  %v845_v46 = vshll.u32 %v3578_v37, 16  ;;  %v1419_v49 = vshrl.u32 %v4835_v43, 16  ;;  %v1421_v50 = vshll.u32 %v4835_v43, 16  ;;  %v4416_v37 = vld [vmem:[%s5883_s1 + $0x118] sm:$0xff]  }
  0x51   : > { %v4841_v48 = vsel %vm1249_vm1, %v1280_v41, %v1284_v35  ;;  %v836_v51 = vrot.slane %v834_v10, 7  ;;  %v1426_v54 = vshll.u32 %v4387_v17, 16  ;;  %3910 = vmatpush3.bf16.msra.mxu1 %v4393_v25  ;;  %v470_v58 = vmax.f32 %v438_v32, 0.0  ;;  %v4404_v35 = vld [vmem:[%s5883_s1 + $0x1f8] sm:$0xff]   ;;  %v942_v17 = vld [vmem:[#allocation2 + $0x30] sm:$0xf]  ;;  %4020 = vmatpush3.bf16.msra.mxu0 %v4416_v37 }
  0x52   : > { %2181 = vmatprep.mubr.bf16.mxu0 %v4841_v48  ;;  %v844_v55 = vrot.slane %v842_v45, 7  ;;  %v471_v60 = vmax.f32 %v439_v33, 0.0  ;;  %v1423_v63 = vrot.slane %v1421_v50, 1  ;;  %3911 = vmatprep.subr.bf16.mxu1 %v4396_v20  ;;  %v403_v7 = vmul.f32 %v3632_v39, %v4600_v19 }
  0x53   : > { %2182 = vmatmul.mubr.bf16.gmra.mxu0 %v4787_v61  ;;  %v839_v1 = vor.u32 %v837_v28, %v836_v51  ;;  %v840_v6 = vrot.slane %v836_v51, 4  ;;  %v1428_v8 = vrot.slane %v1426_v54, 1  ;;  %v3555_v13 = vpack.c.bf16 %v470_v58, %v470_v58 }
  0x54   : > { %v4857_v9 = vld [vmem:[#allocation2 + $0x24] sm:$0xff]   ;;  %v847_v11 = vor.u32 %v845_v46, %v844_v55  ;;  %v3556_v14 = vpack.c.bf16 %v471_v60, %v471_v60  ;;  %v1424_v15 = vor.u32 %v1423_v63, %v1419_v49  ;;  %v4859_v16 = vld [vmem:[#allocation2 + $0x2c] ss:$0 sps:$4 sm:$0x11]   ;;  %v849_v18 = vrot.slane %v844_v55, 4  ;;  %v4898_v63 = vld [vmem:[%s4587_s26 + $0x38] sm:$0xff]  }
  0x55   : > { %v1020_v21 = vsel %vm4651_vm8, %v839_v1, %v1019_v52  ;;  %v440_v12 = vadd.f32 %v4608_v26, %v402_v47  ;;  %v1287_v24 = vshrl.u32 %v4857_v9, 16  ;;  %v1289_v25 = vshll.u32 %v4857_v9, 16  ;;  %3912 = vmatpush3.bf16.msra.mxu1 %v4400_v59  ;;  %v946_v52 = vld [vmem:[#allocation2 + $0x38] sm:$0x1]  ;;  %v4420_v1 = vld [vmem:[%s5883_s1 + $0x150] sm:$0xff]  }
  0x56   : > { %v848_v27 = vsel %vm4645_vm7, %v840_v6, %v847_v11  ;;  %1021 = vst [vmem:[#allocation2 + $0xb4] sm:$0xf] %v1020_v21  ;;  %v647_v29 = vshrl.u32 %v3555_v13, 16  ;;  %v4872_v20 = vsel %vm1249_vm1, %v1424_v15, %v1428_v8  ;;  %v1294_v31 = vshll.u32 %v4859_v16, 16  ;;  %3913 = vmatprep.subr.bf16.mxu1 %v4402_v62  ;;  %v3762_v62 = vld [vmem:[%s4587_s26 + $0x30] sm:$0xff]   ;;  %4021 = vmatprep.subr.bf16.mxu0 %v4420_v1 }
  0x57   : > { %1022 = vst [vmem:[#allocation2 + $0xb8] sm:$0xf] %v848_v27  ;;  %v1024_v32 = vsel %vm4657_vm9, %v849_v18, %v1023_v56  ;;  %v650_v34 = vshll.u32 %v3555_v13, 16  ;;  %2277 = vmatprep.mubr.bf16.mxu1 %v4872_v20  ;;  %v1291_v38 = vrot.slane %v1289_v25, 1  ;;  %v655_v41 = vshrl.u32 %v3556_v14, 16 }
  0x58   : > { %1025 = vst [vmem:[#allocation2 + $0xbc] sm:$0x1] %v1024_v32  ;;  %v649_v39 = vrot.slane %v647_v29, 7  ;;  %v658_v10 = vshll.u32 %v3556_v14, 16  ;;  %v1296_v33 = vrot.slane %v1294_v31, 1  ;;  %2278 = vmatmul.mubr.bf16.gmra.mxu1 %v4835_v43  ;;  %v441_v28 = vadd.f32 %v4608_v26, %v403_v7 }
  0x59   : > { %v472_v45 = vmax.f32 %v440_v12, 0.0  ;;  %v3636_v46 = vunpack.c.h.bf16 %v4833_v40  ;;  %v1292_v47 = vor.u32 %v1291_v38, %v1287_v24  ;;  %v657_v51 = vrot.slane %v655_v41, 7  ;;  %3914 = vmatpush3.bf16.msra.mxu1 %v4403_v30  ;;  %v949_v13 = vld [vmem:[#allocation2 + $0x3c] sm:$0xf]  ;;  %v956_v1 = vld [vmem:[#allocation2 + $0x48] sm:$0xf] }
  0x5a   : > { %v652_v49 = vor.u32 %v650_v34, %v649_v39  ;;  %v653_v50 = vrot.slane %v649_v39, 4  ;;  %4123 = vmatprep.subr.bf16.mxu1 %v4404_v35  ;;  %v473_v53 = vmax.f32 %v441_v28, 0.0  ;;  %v404_v43 = vmul.f32 %v3635_v44, %v4600_v19 }
  0x5b   : > { %v3557_v54 = vpack.c.bf16 %v472_v45, %v472_v45  ;;  %v405_v55 = vmul.f32 %v3636_v46, %v4600_v19  ;;  %v4892_v56 = vsel %vm1249_vm1, %v1292_v47, %v1296_v33  ;;  %v660_v58 = vor.u32 %v658_v10, %v657_v51  ;;  %v4921_v45 = vld [vmem:[%s5884_s2] ss:$0 sm:$0xff] }
  0x5c   : > { %v662_v60 = vrot.slane %v657_v51, 4  ;;  %v943_v59 = vsel %vm4651_vm8, %v652_v49, %v942_v17  ;;  %2189 = vmatprep.mubr.bf16.mxu0 %v4892_v56  ;;  %v3558_v40 = vpack.c.bf16 %v473_v53, %v473_v53  ;;  %v442_v6 = vadd.f32 %v4608_v26, %v404_v43  ;;  %v953_v17 = vld [vmem:[#allocation2 + $0x44] sm:$0x1] }
  0x5d   : > { %944 = vst [vmem:[#allocation2 + $0x30] sm:$0xf] %v943_v59  ;;  %v664_v19 = vshrl.u32 %v3557_v54, 16  ;;  %v667_v44 = vshll.u32 %v3557_v54, 16  ;;  %2190 = vmatmul.mubr.bf16.gmra.mxu0 %v4857_v9  ;;  %v661_v8 = vsel %vm4645_vm7, %v653_v50, %v660_v58  ;;  %v443_v14 = vadd.f32 %v4608_v26, %v405_v55  ;;  %v4421_v26 = vld [vmem:[%s5883_s1 + $0x110] sm:$0xff]  }
  0x5e   : > { %v4394_v7 = vld [vmem:[#allocation2 + $0xb4] sm:$0xff]   ;;  %v947_v11 = vsel %vm4657_vm9, %v662_v60, %v946_v52  ;;  %v1488_v15 = vrot.slane %v4701_v22, 1  ;;  %945 = vst [vmem:[#allocation2 + $0x34] sm:$0xf] %v661_v8  ;;  %v3639_v12 = vunpack.c.l.bf16 %v3762_v62  ;;  %v3640_v24 = vunpack.c.h.bf16 %v3762_v62  ;;  %4022 = vmatpush3.bf16.msra.mxu0 %v4421_v26  ;;  %v4941_v8 = vld [vmem:[%s5885_s3] ss:$0 sm:$0xff] }
  0x5f   : > { %v4395_v18 = vld [vmem:[#allocation2 + $0xbc] ss:$0 sps:$4 sm:$0x11]   ;;  %948 = vst [vmem:[#allocation2 + $0x38] sm:$0x1] %v947_v11  ;;  %v666_v21 = vrot.slane %v664_v19, 7  ;;  %v3643_v35 = vunpack.c.l.bf16 %v4898_v63 }
  0x60   : > { %v1431_v25 = vshrl.u32 %v4394_v7, 16  ;;  %v1433_v27 = vshll.u32 %v4394_v7, 16  ;;  %v672_v29 = vshrl.u32 %v3558_v40, 16  ;;  %v675_v30 = vshll.u32 %v3558_v40, 16 }
  0x61   : > { %v1438_v31 = vshll.u32 %v4395_v18, 16  ;;  %v669_v32 = vor.u32 %v667_v44, %v666_v21  ;;  %v474_v34 = vmax.f32 %v442_v6, 0.0  ;;  %v670_v38 = vrot.slane %v666_v21, 4  ;;  %v960_v6 = vld [vmem:[#allocation2 + $0x50] sm:$0x1] }
  0x62   : > { %v1435_v37 = vrot.slane %v1433_v27, 1  ;;  %v674_v39 = vrot.slane %v672_v29, 7  ;;  %v475_v41 = vmax.f32 %v443_v14, 0.0  ;;  %v406_v46 = vmul.f32 %v4921_v45, %v3639_v12  ;;  %v4426_v14 = vld [vmem:[%s5883_s1 + $0x148] sm:$0xff]  }
  0x63   : > { %v1440_v10 = vrot.slane %v1438_v31, 1  ;;  %v950_v33 = vsel %vm4651_vm8, %v669_v32, %v949_v13  ;;  %v3559_v28 = vpack.c.bf16 %v474_v34, %v474_v34  ;;  %v1489_v54 = vrot.slane %v4703_v23, 1  ;;  %4023 = vmatprep.subr.bf16.mxu0 %v4426_v14 }
  0x64   : > { %v1436_v47 = vor.u32 %v1435_v37, %v1431_v25  ;;  %v677_v49 = vor.u32 %v675_v30, %v674_v39  ;;  %v679_v50 = vrot.slane %v674_v39, 4  ;;  %951 = vst [vmem:[#allocation2 + $0x3c] sm:$0xf] %v950_v33  ;;  %v3560_v51 = vpack.c.bf16 %v475_v41, %v475_v41 }
  0x65   : > { %v681_v52 = vshrl.u32 %v3559_v28, 16  ;;  %v684_v53 = vshll.u32 %v3559_v28, 16  ;;  %v407_v43 = vmul.f32 %v4921_v45, %v3640_v24  ;;  %v4929_v58 = vld [vmem:[#allocation2 + $0x30] sm:$0xff]   ;;  %v444_v11 = vadd.f32 %v4941_v8, %v406_v46 }
  0x66   : > { %v4927_v55 = vsel %vm1249_vm1, %v1436_v47, %v1440_v10  ;;  %v678_v60 = vsel %vm4645_vm7, %v670_v38, %v677_v49  ;;  %v954_v59 = vsel %vm4657_vm9, %v679_v50, %v953_v17  ;;  %v689_v62 = vshrl.u32 %v3560_v51, 16  ;;  %v4936_v40 = vld [vmem:[#allocation2 + $0x38] ss:$0 sps:$4 sm:$0x11]   ;;  %v4413_v46 = vld [vmem:[%s5883_s1 + $0x1f0] sm:$0xff]   ;;  %v4970_v49 = vld [vmem:[%s4587_s26 + $0x40] sm:$0xff]  }
  0x67   : > { %2285 = vmatprep.mubr.bf16.mxu1 %v4927_v55  ;;  %952 = vst [vmem:[#allocation2 + $0x40] sm:$0xf] %v678_v60  ;;  %955 = vst [vmem:[#allocation2 + $0x44] sm:$0x1] %v954_v59  ;;  %v683_v19 = vrot.slane %v681_v52, 7  ;;  %v692_v44 = vshll.u32 %v3560_v51, 16  ;;  %v445_v13 = vadd.f32 %v4941_v8, %v407_v43  ;;  %v3644_v52 = vunpack.c.h.bf16 %v4898_v63 }
  0x68   : > { %v1299_v18 = vshrl.u32 %v4929_v58, 16  ;;  %v1301_v21 = vshll.u32 %v4929_v58, 16  ;;  %2286 = vmatmul.mubr.bf16.gmra.mxu1 %v4394_v7  ;;  %v691_v12 = vrot.slane %v689_v62, 7  ;;  %v1491_v24 = vrot.slane %v4787_v61, 1  ;;  %v4429_v7 = vld [vmem:[%s5883_s1 + $0x108] sm:$0xff]   ;;  %v4407_v38 = vld [vmem:[%s5883_s1 + $0x1b8] sm:$0xff]  }
  0x69   : > { %v1306_v25 = vshll.u32 %v4936_v40, 16  ;;  %2326 = vmatprep.mubr.bf16.mxu1 %v4701_v22  ;;  %v686_v27 = vor.u32 %v684_v53, %v683_v19  ;;  %v687_v29 = vrot.slane %v683_v19, 4  ;;  %v476_v30 = vmax.f32 %v444_v11, 0.0  ;;  %4024 = vmatpush3.bf16.msra.mxu0 %v4429_v7 }
  0x6a   : > { %v1303_v31 = vrot.slane %v1301_v21, 1  ;;  %v694_v32 = vor.u32 %v692_v44, %v691_v12  ;;  %v696_v34 = vrot.slane %v691_v12, 4  ;;  %v477_v26 = vmax.f32 %v445_v13, 0.0 }
  0x6b   : > { %v1308_v37 = vrot.slane %v1306_v25, 1  ;;  %v957_v39 = vsel %vm4651_vm8, %v686_v27, %v956_v1  ;;  %v3561_v41 = vpack.c.bf16 %v476_v30, %v476_v30  ;;  %v1492_v10 = vrot.slane %v4794_v4, 1  ;;  %v967_v25 = vld [vmem:[#allocation2 + $0x5c] sm:$0x1]  ;;  %v4417_v27 = vld [vmem:[%s5883_s1 + $0x1b0] sm:$0xff]  }
  0x6c   : > { %v1304_v33 = vor.u32 %v1303_v31, %v1299_v18  ;;  %v695_v17 = vsel %vm4645_vm7, %v687_v29, %v694_v32  ;;  %958 = vst [vmem:[#allocation2 + $0x48] sm:$0xf] %v957_v39  ;;  %v961_v28 = vsel %vm4657_vm9, %v696_v34, %v960_v6  ;;  %v3562_v47 = vpack.c.bf16 %v477_v26, %v477_v26  ;;  %v4434_v26 = vld [vmem:[%s5883_s1 + $0x140] sm:$0xff]  }
  0x6d   : > { %959 = vst [vmem:[#allocation2 + $0x4c] sm:$0xf] %v695_v17  ;;  %962 = vst [vmem:[#allocation2 + $0x50] sm:$0x1] %v961_v28  ;;  %v698_v50 = vshrl.u32 %v3561_v41, 16  ;;  %v701_v51 = vshll.u32 %v3561_v41, 16  ;;  %v408_v59 = vmul.f32 %v4921_v45, %v3643_v35  ;;  %v409_v44 = vmul.f32 %v4921_v45, %v3644_v52  ;;  %4025 = vmatprep.subr.bf16.mxu0 %v4434_v26 }
  0x6e   : > { %v4974_v53 = vsel %vm1249_vm1, %v1304_v33, %v1308_v37  ;;  %v4976_v43 = vld [vmem:[#allocation2 + $0x3c] sm:$0xff]   ;;  %v706_v60 = vshrl.u32 %v3562_v47, 16  ;;  %v4982_v62 = vld [vmem:[#allocation2 + $0x44] ss:$0 sps:$4 sm:$0x11]   ;;  %v709_v19 = vshll.u32 %v3562_v47, 16  ;;  %v3647_v6 = vunpack.c.l.bf16 %v4970_v49 }
  0x6f   : > { %2197 = vmatprep.mubr.bf16.mxu0 %v4974_v53  ;;  %v700_v1 = vrot.slane %v698_v50, 7  ;;  %v1311_v11 = vshrl.u32 %v4976_v43, 16  ;;  %v1313_v13 = vshll.u32 %v4976_v43, 16  ;;  %v963_v35 = vld [vmem:[#allocation2 + $0x54] sm:$0xf]  ;;  %v446_v14 = vadd.f32 %v4941_v8, %v408_v59  ;;  %v4425_v41 = vld [vmem:[%s5883_s1 + $0x1a8] sm:$0xff]  }
  0x70   : > { %2198 = vmatmul.mubr.bf16.gmra.mxu0 %v4929_v58  ;;  %2327 = vmatmul.mubr.bf16.vlgmr.msra.gmra.mxu1 %v4623_v36  ;;  %v708_v63 = vrot.slane %v706_v60, 7  ;;  %v1318_v18 = vshll.u32 %v4982_v62, 16  ;;  %v447_v29 = vadd.f32 %v4941_v8, %v409_v44  ;;  %v4422_v36 = vld [vmem:[%s5883_s1 + $0x1e8] sm:$0xff]   ;;  %v1494_v39 = vrot.slane %v4857_v9, 1  ;;  %v4435_v33 = vld [vmem:[%s5883_s1 + $0x100] sm:$0xff]  }
  0x71   : > { %4124 = vmatpush3.bf16.msra.mxu1 %v4407_v38  ;;  %2334 = vmatprep.mubr.bf16.mxu1 %v4787_v61  ;;  %v703_v21 = vor.u32 %v701_v51, %v700_v1  ;;  %v704_v12 = vrot.slane %v700_v1, 4  ;;  %v1315_v30 = vrot.slane %v1313_v13, 1  ;;  %v478_v34 = vmax.f32 %v446_v14, 0.0 }
  0x72   : > { %4125 = vmatprep.subr.bf16.mxu1 %v4413_v46  ;;  %v711_v31 = vor.u32 %v709_v19, %v708_v63  ;;  %v713_v32 = vrot.slane %v708_v63, 4  ;;  %v1320_v7 = vrot.slane %v1318_v18, 1  ;;  %v479_v38 = vmax.f32 %v447_v29, 0.0  ;;  %v4430_v19 = vld [vmem:[%s5883_s1 + $0x1e0] sm:$0xff]   ;;  %4026 = vmatpush3.bf16.msra.mxu0 %v4435_v33  ;;  %v4438_v33 = vld [vmem:[%s5883_s1 + $0x198] sm:$0xff]  }
  0x73   : > { %v964_v37 = vsel %vm4651_vm8, %v703_v21, %v963_v35  ;;  %v1316_v17 = vor.u32 %v1315_v30, %v1311_v11  ;;  %v3563_v50 = vpack.c.bf16 %v478_v34, %v478_v34  ;;  %v5025_v52 = vsel %vm1484_vm0, %v1488_v15, %v1489_v54  ;;  %v970_v63 = vld [vmem:[#allocation2 + $0x60] sm:$0xf]  ;;  %v3765_v35 = vld [vmem:[%s4587_s26 + $0x48] sm:$0xff]  }
  0x74   : > { %v5012_v28 = vld [vmem:[#allocation2 + $0x48] sm:$0xff]   ;;  %v712_v46 = vsel %vm4645_vm7, %v704_v12, %v711_v31  ;;  %965 = vst [vmem:[#allocation2 + $0x54] sm:$0xf] %v964_v37  ;;  %v968_v47 = vsel %vm4657_vm9, %v713_v32, %v967_v25  ;;  %v5018_v51 = vld [vmem:[#allocation2 + $0x50] ss:$0 sps:$4 sm:$0x11]   ;;  %v3564_v60 = vpack.c.bf16 %v479_v38, %v479_v38  ;;  %v3648_v59 = vunpack.c.h.bf16 %v4970_v49 }
  0x75   : > { %966 = vst [vmem:[#allocation2 + $0x58] sm:$0xf] %v712_v46  ;;  %969 = vst [vmem:[#allocation2 + $0x5c] sm:$0x1] %v968_v47  ;;  %4126 = vmatpush3.bf16.msra.mxu1 %v4417_v27  ;;  %v410_v1 = vmul.f32 %v4921_v45, %v3647_v6  ;;  %v5033_v23 = vsel %vm1249_vm1, %v1316_v17, %v1320_v7  ;;  %v1323_v22 = vshrl.u32 %v5012_v28, 16  ;;  %v1325_v15 = vshll.u32 %v5012_v28, 16 }
  0x76   : > { %v715_v54 = vshrl.u32 %v3563_v50, 16  ;;  %4127 = vmatprep.subr.bf16.mxu1 %v4422_v36  ;;  %v5040_v49 = vld [vmem:[%s5883_s1 + $0x238] sm:$0xff]   ;;  %2205 = vmatprep.mubr.bf16.mxu0 %v5033_v23  ;;  %v1330_v44 = vshll.u32 %v5018_v51, 16  ;;  %v718_v6 = vshll.u32 %v3563_v50, 16  ;;  %v723_v11 = vshrl.u32 %v3564_v60, 16  ;;  %v4433_v30 = vld [vmem:[%s5883_s1 + $0x1a0] sm:$0xff]  }
  0x77   : > { %v726_v13 = vshll.u32 %v3564_v60, 16  ;;  %v1327_v14 = vrot.slane %v1325_v15, 1  ;;  %v974_v21 = vld [vmem:[#allocation2 + $0x68] sm:$0x1]  ;;  %v411_v12 = vmul.f32 %v4921_v45, %v3648_v59  ;;  %v448_v25 = vadd.f32 %v4941_v8, %v410_v1  ;;  %v4436_v7 = vld [vmem:[%s5883_s1 + $0x1d8] sm:$0xff]   ;;  %4259 = vmatprep.subr.bf16.mxu0 %v5040_v49  ;;  %v4439_v1 = vld [vmem:[%s5883_s1 + $0x1d0] sm:$0xff]  }
  0x78   : > { %2206 = vmatmul.mubr.bf16.gmra.mxu0 %v4976_v43  ;;  %2335 = vmatmul.mubr.bf16.gmra.mxu1 %v5025_v52  ;;  %v717_v18 = vrot.slane %v715_v54, 7  ;;  %v1332_v27 = vrot.slane %v1330_v44, 1  ;;  %v725_v29 = vrot.slane %v723_v11, 7  ;;  %v1495_v36 = vrot.slane %v4859_v16, 1 }
  0x79   : > { %2342 = vmatprep.mubr.bf16.mxu1 %v4857_v9  ;;  %4128 = vmatpush3.bf16.msra.mxu1 %v4425_v41  ;;  %v1328_v31 = vor.u32 %v1327_v14, %v1323_v22  ;;  %v449_v26 = vadd.f32 %v4941_v8, %v411_v12  ;;  %v5064_v16 = vsel %vm1484_vm0, %v1491_v24, %v1492_v10  ;;  %v480_v41 = vmax.f32 %v448_v25, 0.0  ;;  %v3766_v12 = vld [vmem:[%s4587_s26 + $0x50] sm:$0xff]   ;;  %v4442_v9 = vld [vmem:[%s5883_s1 + $0x1c8] sm:$0xff]  }
  0x7a   : > { %v720_v32 = vor.u32 %v718_v6, %v717_v18  ;;  %v721_v34 = vrot.slane %v717_v18, 4  ;;  %4129 = vmatprep.subr.bf16.mxu1 %v4430_v19  ;;  %v728_v37 = vor.u32 %v726_v13, %v725_v29  ;;  %v730_v38 = vrot.slane %v725_v29, 4  ;;  %v977_v18 = vld [vmem:[#allocation2 + $0x6c] sm:$0xf] }
  0x7b   : > { %v5070_v17 = vsel %vm1249_vm1, %v1328_v31, %v1332_v27  ;;  %v481_v47 = vmax.f32 %v449_v26, 0.0  ;;  %v3651_v61 = vunpack.c.l.bf16 %v3765_v35  ;;  %v3565_v60 = vpack.c.bf16 %v480_v41, %v480_v41 }
  0x7c   : > { %v5072_v46 = vld [vmem:[#allocation2 + $0x54] sm:$0xff]   ;;  %v971_v4 = vsel %vm4651_vm8, %v720_v32, %v970_v63  ;;  %2213 = vmatprep.mubr.bf16.mxu0 %v5070_v17  ;;  %v5077_v24 = vld [vmem:[#allocation2 + $0x5c] ss:$0 sps:$4 sm:$0x11]   ;;  %v729_v10 = vsel %vm4645_vm7, %v721_v34, %v728_v37  ;;  %v975_v50 = vsel %vm4657_vm9, %v730_v38, %v974_v21  ;;  %v3652_v59 = vunpack.c.h.bf16 %v3765_v35 }
  0x7d   : > { %972 = vst [vmem:[#allocation2 + $0x60] sm:$0xf] %v971_v4  ;;  %4130 = vmatpush3.bf16.msra.mxu1 %v4433_v30  ;;  %v1335_v19 = vshrl.u32 %v5072_v46, 16  ;;  %v1337_v22 = vshll.u32 %v5072_v46, 16  ;;  %973 = vst [vmem:[#allocation2 + $0x64] sm:$0xf] %v729_v10  ;;  %v3566_v15 = vpack.c.bf16 %v481_v47, %v481_v47  ;;  %v412_v54 = vmul.f32 %v4921_v45, %v3651_v61 }
  0x7e   : > { %976 = vst [vmem:[#allocation2 + $0x68] sm:$0x1] %v975_v50  ;;  %4131 = vmatprep.subr.bf16.mxu1 %v4436_v7  ;;  %v1342_v44 = vshll.u32 %v5077_v24, 16  ;;  %v732_v6 = vshrl.u32 %v3565_v60, 16  ;;  %v735_v11 = vshll.u32 %v3565_v60, 16  ;;  %v413_v13 = vmul.f32 %v4921_v45, %v3652_v59  ;;  %v4441_v32 = vld [vmem:[%s5883_s1 + $0x190] sm:$0xff]  }
  0x7f   : > { %v1339_v63 = vrot.slane %v1337_v22, 1  ;;  %v740_v35 = vshrl.u32 %v3566_v15, 16  ;;  %v743_v14 = vshll.u32 %v3566_v15, 16  ;;  %v450_v21 = vadd.f32 %v4941_v8, %v412_v54  ;;  %v981_v30 = vld [vmem:[#allocation2 + $0x74] sm:$0x1] }
  0x80   : > { %2214 = vmatmul.mubr.bf16.gmra.mxu0 %v5012_v28  ;;  %2343 = vmatmul.mubr.bf16.gmra.mxu1 %v5064_v16  ;;  %v1344_v25 = vrot.slane %v1342_v44, 1  ;;  %v5099_v27 = vsel %vm1484_vm0, %v1494_v39, %v1495_v36  ;;  %v734_v29 = vrot.slane %v732_v6, 7  ;;  %v451_v31 = vadd.f32 %v4941_v8, %v413_v13  ;;  %v4445_v6 = vld [vmem:[%s5883_s1 + $0x1c0] sm:$0xff]  }
  0x81   : > { %2350 = vmatprep.mubr.bf16.mxu1 %v4929_v58  ;;  %4132 = vmatpush3.bf16.msra.mxu1 %v4438_v33  ;;  %v1340_v34 = vor.u32 %v1339_v63, %v1335_v19  ;;  %v742_v26 = vrot.slane %v740_v35, 7  ;;  %v1497_v7 = vrot.slane %v4929_v58, 1  ;;  %v482_v37 = vmax.f32 %v450_v21, 0.0  ;;  %v4444_v58 = vld [vmem:[%s5883_s1 + $0x188] sm:$0xff]   ;;  %v984_v35 = vld [vmem:[#allocation2 + $0x78] sm:$0xf] }
  0x82   : > { %4133 = vmatprep.subr.bf16.mxu1 %v4439_v1  ;;  %v737_v39 = vor.u32 %v735_v11, %v734_v29  ;;  %v738_v36 = vrot.slane %v734_v29, 4  ;;  %v483_v38 = vmax.f32 %v451_v31, 0.0  ;;  %v3655_v41 = vunpack.c.l.bf16 %v3766_v12 }
  0x83   : > { %v5110_v33 = vsel %vm1249_vm1, %v1340_v34, %v1344_v25  ;;  %v745_v4 = vor.u32 %v743_v14, %v742_v26  ;;  %v747_v47 = vrot.slane %v742_v26, 4  ;;  %v3567_v61 = vpack.c.bf16 %v482_v37, %v482_v37 }
  0x84   : > { %2221 = vmatprep.mubr.bf16.mxu0 %v5110_v33  ;;  %v5116_v10 = vld [vmem:[#allocation2 + $0x60] sm:$0xff]   ;;  %v978_v50 = vsel %vm4651_vm8, %v737_v39, %v977_v18  ;;  %v1498_v60 = vrot.slane %v4936_v40, 1  ;;  %v3568_v59 = vpack.c.bf16 %v483_v38, %v483_v38  ;;  %v3656_v1 = vunpack.c.h.bf16 %v3766_v12 }
  0x85   : > { %4134 = vmatpush3.bf16.msra.mxu1 %v4441_v32  ;;  %v5121_v19 = vld [vmem:[#allocation2 + $0x68] ss:$0 sps:$4 sm:$0x11]   ;;  %v746_v22 = vsel %vm4645_vm7, %v738_v36, %v745_v4  ;;  %979 = vst [vmem:[#allocation2 + $0x6c] sm:$0xf] %v978_v50  ;;  %v982_v15 = vsel %vm4657_vm9, %v747_v47, %v981_v30  ;;  %v749_v54 = vshrl.u32 %v3567_v61, 16  ;;  %v414_v21 = vmul.f32 %v4921_v45, %v3655_v41 }
  0x86   : > { %v752_v44 = vshll.u32 %v3567_v61, 16  ;;  %4135 = vmatprep.subr.bf16.mxu1 %v4442_v9  ;;  %v1347_v40 = vshrl.u32 %v5116_v10, 16  ;;  %v1349_v11 = vshll.u32 %v5116_v10, 16  ;;  %980 = vst [vmem:[#allocation2 + $0x70] sm:$0xf] %v746_v22  ;;  %v757_v13 = vshrl.u32 %v3568_v59, 16 }
  0x87   : > { %983 = vst [vmem:[#allocation2 + $0x74] sm:$0x1] %v982_v15  ;;  %v760_v63 = vshll.u32 %v3568_v59, 16  ;;  %v1354_v14 = vshll.u32 %v5121_v19, 16  ;;  %v751_v18 = vrot.slane %v749_v54, 7  ;;  %v415_v12 = vmul.f32 %v4921_v45, %v3656_v1 }
  0x88   : > { %2222 = vmatmul.mubr.bf16.gmra.mxu0 %v5072_v46  ;;  %2351 = vmatmul.mubr.bf16.gmra.mxu1 %v5099_v27  ;;  %v1351_v25 = vrot.slane %v1349_v11, 1  ;;  %v759_v29 = vrot.slane %v757_v13, 7  ;;  %v988_v30 = vld [vmem:[#allocation2 + $0x80] sm:$0x1]  ;;  %v452_v26 = vadd.f32 %v4941_v8, %v414_v21  ;;  %v5141_v38 = vsel %vm1484_vm0, %v1497_v7, %v1498_v60  ;;  %v3771_v21 = vld [vmem:[%s4587_s26 + $0x78] sm:$0xff]  }
  0x89   : > { %2358 = vmatprep.mubr.bf16.mxu1 %v4976_v43  ;;  %4136 = vmatpush3.bf16.msra.mxu1 %v4444_v58  ;;  %v1356_v31 = vrot.slane %v1354_v14, 1  ;;  %v754_v32 = vor.u32 %v752_v44, %v751_v18  ;;  %v755_v34 = vrot.slane %v751_v18, 4  ;;  %v453_v36 = vadd.f32 %v4941_v8, %v415_v12  ;;  %v4447_v7 = vld [vmem:[%s5883_s1 + $0x180] sm:$0xff]  }
  0x8a   : > { %4137 = vmatprep.subr.bf16.mxu1 %v4445_v6  ;;  %v1352_v37 = vor.u32 %v1351_v25, %v1347_v40  ;;  %v762_v9 = vor.u32 %v760_v63, %v759_v29  ;;  %v764_v39 = vrot.slane %v759_v29, 4  ;;  %v484_v4 = vmax.f32 %v452_v26, 0.0  ;;  %v995_v29 = vld [vmem:[#allocation2 + $0x8c] sm:$0x1] }
  0x8b   : > { %v985_v41 = vsel %vm4651_vm8, %v754_v32, %v984_v35  ;;  %v485_v50 = vmax.f32 %v453_v36, 0.0  ;;  %v1500_v22 = vrot.slane %v4976_v43, 1  ;;  %v1501_v15 = vrot.slane %v4982_v62, 1  ;;  %v991_v62 = vld [vmem:[#allocation2 + $0x84] sm:$0xf] }
  0x8c   : > { %v5146_v47 = vsel %vm1249_vm1, %v1352_v37, %v1356_v31  ;;  %v763_v61 = vsel %vm4645_vm7, %v755_v34, %v762_v9  ;;  %986 = vst [vmem:[#allocation2 + $0x78] sm:$0xf] %v985_v41  ;;  %v989_v58 = vsel %vm4657_vm9, %v764_v39, %v988_v30  ;;  %v3569_v59 = vpack.c.bf16 %v484_v4, %v484_v4 }
  0x8d   : > { %2229 = vmatprep.mubr.bf16.mxu0 %v5146_v47  ;;  %v5156_v60 = vld [vmem:[#allocation2 + $0x6c] sm:$0xff]   ;;  %987 = vst [vmem:[#allocation2 + $0x7c] sm:$0xf] %v763_v61  ;;  %990 = vst [vmem:[#allocation2 + $0x80] sm:$0x1] %v989_v58  ;;  %v3570_v54 = vpack.c.bf16 %v485_v50, %v485_v50  ;;  %4138 = vmatpush3.bf16.msra.mxu1 %v4447_v7  ;;  %v5170_v31 = vsel %vm1484_vm0, %v1500_v22, %v1501_v15  ;;  %v3675_v39 = vunpack.c.l.bf16 %v3771_v21 }
  0x8e   : > { %v5158_v1 = vld [vmem:[#allocation2 + $0x74] ss:$0 sps:$4 sm:$0x11]   ;;  %v1359_v44 = vshrl.u32 %v5156_v60, 16  ;;  %v1361_v6 = vshll.u32 %v5156_v60, 16  ;;  %v766_v40 = vshrl.u32 %v3569_v59, 16  ;;  %v3676_v36 = vunpack.c.h.bf16 %v3771_v21 }
  0x8f   : > { %v769_v11 = vshll.u32 %v3569_v59, 16  ;;  %v1366_v13 = vshll.u32 %v5158_v1, 16  ;;  %v774_v63 = vshrl.u32 %v3570_v54, 16  ;;  %v777_v35 = vshll.u32 %v3570_v54, 16 }
  0x90   : > { %2230 = vmatmul.mubr.bf16.gmra.mxu0 %v5116_v10  ;;  %2359 = vmatmul.mubr.bf16.gmra.mxu1 %v5141_v38  ;;  %v1363_v14 = vrot.slane %v1361_v6, 1  ;;  %v768_v18 = vrot.slane %v766_v40, 7  ;;  %v1503_v15 = vrot.slane %v5012_v28, 1  ;;  %v424_v6 = vmul.f32 %v4921_v45, %v3675_v39 }
  0x91   : > { %2366 = vmatprep.mubr.bf16.mxu1 %v5012_v28  ;;  %v1368_v12 = vrot.slane %v1366_v13, 1  ;;  %v776_v25 = vrot.slane %v774_v63, 7  ;;  %v425_v40 = vmul.f32 %v4921_v45, %v3676_v36  ;;  %v1510_v0 = vrot.slane %v5121_v19, 1 }
  0x92   : > { %v1364_v30 = vor.u32 %v1363_v14, %v1359_v44  ;;  %v771_v32 = vor.u32 %v769_v11, %v768_v18  ;;  %v772_v34 = vrot.slane %v768_v18, 4  ;;  %v1504_v44 = vrot.slane %v5018_v51, 1 }
  0x93   : > { %v779_v37 = vor.u32 %v777_v35, %v776_v25  ;;  %v781_v9 = vrot.slane %v776_v25, 4  ;;  %v462_v63 = vadd.f32 %v4941_v8, %v424_v6  ;;  %v463_v35 = vadd.f32 %v4941_v8, %v425_v40  ;;  %v1030_v6 = vld [vmem:[#allocation2 + $0xc8] sm:$0x1] }
  0x94   : > { %v5172_v26 = vld [vmem:[#allocation2 + $0x78] sm:$0xff]   ;;  %v5175_v41 = vsel %vm1249_vm1, %v1364_v30, %v1368_v12  ;;  %v5177_v4 = vld [vmem:[#allocation2 + $0x80] ss:$0 sps:$4 sm:$0x11]   ;;  %v992_v61 = vsel %vm4651_vm8, %v771_v32, %v991_v62  ;;  %v5202_v14 = vsel %vm1484_vm0, %v1503_v15, %v1504_v44  ;;  %v1506_v8 = vrot.slane %v5072_v46, 1 }
  0x95   : > { %2237 = vmatprep.mubr.bf16.mxu0 %v5175_v41  ;;  %v1371_v58 = vshrl.u32 %v5172_v26, 16  ;;  %v1373_v50 = vshll.u32 %v5172_v26, 16  ;;  %v780_v7 = vsel %vm4645_vm7, %v772_v34, %v779_v37  ;;  %993 = vst [vmem:[#allocation2 + $0x84] sm:$0xf] %v992_v61  ;;  %v996_v59 = vsel %vm4657_vm9, %v781_v9, %v995_v29 }
  0x96   : > { %v1378_v22 = vshll.u32 %v5177_v4, 16  ;;  %994 = vst [vmem:[#allocation2 + $0x88] sm:$0xf] %v780_v7  ;;  %997 = vst [vmem:[#allocation2 + $0x8c] sm:$0x1] %v996_v59  ;;  %v494_v18 = vmax.f32 %v462_v63, 0.0 }
  0x97   : > { %v1375_v54 = vrot.slane %v1373_v50, 1  ;;  %v495_v21 = vmax.f32 %v463_v35, 0.0  ;;  %v1507_v32 = vrot.slane %v5077_v24, 1  ;;  %v1026_v59 = vld [vmem:[#allocation2 + $0xc0] sm:$0xf]  ;;  %v1512_v3 = vrot.slane %v5156_v60, 1 }
  0x98   : > { %2238 = vmatmul.mubr.bf16.gmra.mxu0 %v5156_v60  ;;  %2367 = vmatmul.mubr.bf16.gmra.mxu1 %v5170_v31  ;;  %v1380_v11 = vrot.slane %v1378_v22, 1  ;;  %v3579_v12 = vpack.c.bf16 %v494_v18, %v494_v18  ;;  %v1509_v18 = vrot.slane %v5116_v10, 1  ;;  %v1513_v19 = vrot.slane %v5158_v1, 1 }
  0x99   : > { %2374 = vmatprep.mubr.bf16.mxu1 %v5072_v46  ;;  %v1376_v13 = vor.u32 %v1375_v54, %v1371_v58  ;;  %v3580_v45 = vpack.c.bf16 %v495_v21, %v495_v21  ;;  %v5218_v15 = vsel %vm1484_vm0, %v1506_v8, %v1507_v32  ;;  %v1516_v1 = vrot.slane %v5177_v4, 1  ;;  %v5275_v4 = vld [vmem:[#allocation2 + $0x90] sm:$0xff]  }
  0x9a   : > { %v851_v34 = vshrl.u32 %v3579_v12, 16  ;;  %v854_v9 = vshll.u32 %v3579_v12, 16  ;;  %v5237_v21 = vsel %vm1484_vm0, %v1509_v18, %v1510_v0  ;;  %v5253_v12 = vsel %vm1484_vm0, %v1512_v3, %v1513_v19  ;;  %v4465_v18 = vld [vmem:[#allocation2 + $0xbc] ss:$0 sps:$4 sm:$0x11]  }
  0x9b   : > { %v5199_v62 = vsel %vm1249_vm1, %v1376_v13, %v1380_v11  ;;  %v859_v39 = vshrl.u32 %v3580_v45, 16  ;;  %v862_v58 = vshll.u32 %v3580_v45, 16  ;;  %v4449_v45 = vld [vmem:[%s5883_s1 + $0x218] sm:$0xff]   ;;  %v1531_v0 = vrot.slane %v4465_v18, 1 }
  0x9c   : > { %2245 = vmatprep.mubr.bf16.mxu0 %v5199_v62  ;;  %v853_v61 = vrot.slane %v851_v34, 7  ;;  %v4451_v34 = vld [vmem:[%s5883_s1 + $0x208] sm:$0xff]  }
  0x9d   : > { %v5205_v51 = vld [vmem:[#allocation2 + $0x84] sm:$0xff]   ;;  %v5208_v25 = vld [vmem:[#allocation2 + $0x8c] ss:$0 sps:$4 sm:$0x11]   ;;  %v861_v7 = vrot.slane %v859_v39, 7  ;;  %v1521_v39 = vrot.slane %v5275_v4, 1 }
  0x9e   : > { %v1383_v29 = vshrl.u32 %v5205_v51, 16  ;;  %v1385_v30 = vshll.u32 %v5205_v51, 16  ;;  %v1390_v37 = vshll.u32 %v5208_v25, 16  ;;  %v856_v54 = vor.u32 %v854_v9, %v853_v61  ;;  %v4452_v9 = vld [vmem:[%s5883_s1 + $0x200] sm:$0xff]  }
  0x9f   : > { %v857_v44 = vrot.slane %v853_v61, 4  ;;  %v864_v40 = vor.u32 %v862_v58, %v861_v7  ;;  %v866_v24 = vrot.slane %v861_v7, 4  ;;  %v1519_v32 = vrot.slane %v5208_v25, 1  ;;  %v5292_v25 = vld [vmem:[#allocation2 + $0x9c] sm:$0xff]  }
  0xa0   : > { %2246 = vmatmul.mubr.bf16.gmra.mxu0 %v5172_v26  ;;  %2375 = vmatmul.mubr.bf16.gmra.mxu1 %v5202_v14  ;;  %v1387_v36 = vrot.slane %v1385_v30, 1  ;;  %v1392_v50 = vrot.slane %v1390_v37, 1  ;;  %v1027_v13 = vsel %vm4651_vm8, %v856_v54, %v1026_v59  ;;  %v1518_v30 = vrot.slane %v5205_v51, 1  ;;  %v4462_v59 = vld [vmem:[#allocation2 + $0xa4] ss:$0 sps:$4 sm:$0x11]  }
  0xa1   : > { %2382 = vmatprep.mubr.bf16.mxu1 %v5116_v10  ;;  %v865_v63 = vsel %vm4645_vm7, %v857_v44, %v864_v40  ;;  %1028 = vst [vmem:[#allocation2 + $0xc0] sm:$0xf] %v1027_v13  ;;  %v1031_v35 = vsel %vm4657_vm9, %v866_v24, %v1030_v6  ;;  %v1524_v7 = vrot.slane %v5292_v25, 1  ;;  %v5312_v44 = vld [vmem:[#allocation2 + $0xb4] sm:$0xff]  }
  0xa2   : > { %v1388_v22 = vor.u32 %v1387_v36, %v1383_v29  ;;  %1029 = vst [vmem:[#allocation2 + $0xc4] sm:$0xf] %v865_v63  ;;  %1032 = vst [vmem:[#allocation2 + $0xc8] sm:$0x1] %v1031_v35  ;;  %v4450_v29 = vld [vmem:[%s5883_s1 + $0x210] sm:$0xff]   ;;  %v5285_v37 = vsel %vm1484_vm0, %v1518_v30, %v1519_v32  ;;  %v1530_v35 = vrot.slane %v5312_v44, 1 }
  0xa3   : > { %v4460_v36 = vld [vmem:[#allocation2 + $0x98] ss:$0 sps:$4 sm:$0x11]   ;;  %v4464_v40 = vld [vmem:[#allocation2 + $0xb0] ss:$0 sps:$4 sm:$0x11]  }
  0xa4   : > { %v5221_v11 = vsel %vm1249_vm1, %v1388_v22, %v1392_v50  ;;  %v1522_v61 = vrot.slane %v4460_v36, 1  ;;  %v5302_v50 = vld [vmem:[#allocation2 + $0xa8] sm:$0xff]   ;;  %v1525_v22 = vrot.slane %v4462_v59, 1  ;;  %v1528_v24 = vrot.slane %v4464_v40, 1  ;;  %v4468_v30 = vld [vmem:[#allocation2 + $0x30] sm:$0xff]  }
  0xa5   : > { %2253 = vmatprep.mubr.bf16.mxu0 %v5221_v11  ;;  %v1527_v6 = vrot.slane %v5302_v50, 1 }
  0xa6   : > { %v5298_v58 = vsel %vm1484_vm0, %v1521_v39, %v1522_v61  ;;  %v5308_v54 = vsel %vm1484_vm0, %v1524_v7, %v1525_v22 }
  0xa7   : > { %v5318_v13 = vsel %vm1484_vm0, %v1527_v6, %v1528_v24 }
  0xa8   : > { %2383 = vmatmul.mubr.bf16.gmra.mxu1 %v5218_v15  ;;  %2254 = vmatmul.mubr.bf16.gmra.mxu0 %v5205_v51 }
  0xa9   : > { %2390 = vmatprep.mubr.bf16.mxu1 %v5156_v60  ;;  %2487 = vmatprep.mubr.bf16.mxu0 %v5025_v52  ;;  %v4443_v52 = vld [vmem:[%s5883_s1 + $0x228] sm:$0xff]   ;;  %v5320_v63 = vld [vmem:[#allocation2 + $0xc0] sm:$0xff]  }
  0xb0   : > { %2391 = vmatmul.mubr.bf16.gmra.mxu1 %v5237_v21  ;;  %2488 = vmatmul.mubr.bf16.vlgmr.msra.gmra.mxu0 %v4744_v5  ;;  %v4446_v5 = vld [vmem:[%s5883_s1 + $0x220] sm:$0xff]  }
  0xb1   : > { %2398 = vmatprep.mubr.bf16.mxu1 %v5172_v26  ;;  %2495 = vmatprep.mubr.bf16.mxu0 %v5064_v16 }
  0xb2   : > { %4260 = vmatpush3.bf16.msra.mxu0 %v5040_v49  ;;  %v1515_v49 = vrot.slane %v5172_v26, 1 }
  0xb3   : > { %4261 = vmatprep.subr.bf16.mxu0 %v4440_v57 }
  0xb4   : > { %v5268_v8 = vsel %vm1484_vm0, %v1515_v49, %v1516_v1  ;;  %v4467_v49 = vld [vmem:[#allocation2 + $0x24] sm:$0xff]  }
  0xb6   : > { %4262 = vmatpush3.bf16.msra.mxu0 %v4440_v57  ;;  %v5328_v57 = vsel %vm1484_vm0, %v1530_v35, %v1531_v0 }
  0xb7   : > { %4263 = vmatprep.subr.bf16.mxu0 %v4443_v52 }
  0xb8   : > { %2399 = vmatmul.mubr.bf16.gmra.mxu1 %v5253_v12  ;;  %2496 = vmatmul.mubr.bf16.gmra.mxu0 %v4841_v48 }
  0xb9   : > { %2406 = vmatprep.mubr.bf16.mxu1 %v5205_v51  ;;  %2503 = vmatprep.mubr.bf16.mxu0 %v5099_v27 }
  0xba   : > { %4264 = vmatpush3.bf16.msra.mxu0 %v4443_v52 }
  0xbb   : > { %4265 = vmatprep.subr.bf16.mxu0 %v4446_v5 }
  0xbe   : > { %4266 = vmatpush3.bf16.msra.mxu0 %v4446_v5  ;;  %v4466_v5 = vld [vmem:[#allocation2 + $0x18] sm:$0xff]  }
  0xbf   : > { %4267 = vmatprep.subr.bf16.mxu0 %v4449_v45 }
  0xc0   : > { %2407 = vmatmul.mubr.bf16.gmra.mxu1 %v5268_v8  ;;  %2504 = vmatmul.mubr.bf16.gmra.mxu0 %v4892_v56 }
  0xc1   : > { %2414 = vmatprep.mubr.bf16.mxu1 %v5275_v4  ;;  %2511 = vmatprep.mubr.bf16.mxu0 %v5141_v38 }
  0xc2   : > { %4268 = vmatpush3.bf16.msra.mxu0 %v4449_v45 }
  0xc3   : > { %4269 = vmatprep.subr.bf16.mxu0 %v4450_v29 }
  0xc6   : > { %4270 = vmatpush3.bf16.msra.mxu0 %v4450_v29 }
  0xc7   : > { %4271 = vmatprep.subr.bf16.mxu0 %v4451_v34 }
  0xc8   : > { %2415 = vmatmul.mubr.bf16.gmra.mxu1 %v5285_v37  ;;  %2512 = vmatmul.mubr.bf16.gmra.mxu0 %v4974_v53 }
  0xc9   : > { %2422 = vmatprep.mubr.bf16.mxu1 %v5292_v25  ;;  %2519 = vmatprep.mubr.bf16.mxu0 %v5170_v31 }
  0xca   : > { %4272 = vmatpush3.bf16.msra.mxu0 %v4451_v34 }
  0xcb   : > { %4273 = vmatprep.subr.bf16.mxu0 %v4452_v9 }
  0xce   : > { %4274 = vmatpush3.bf16.msra.mxu0 %v4452_v9 }
  0xd0   : > { %2423 = vmatmul.mubr.bf16.gmra.mxu1 %v5298_v58  ;;  %2520 = vmatmul.mubr.bf16.gmra.mxu0 %v5033_v23 }
  0xd1   : > { %2430 = vmatprep.mubr.bf16.mxu1 %v5302_v50  ;;  %2527 = vmatprep.mubr.bf16.mxu0 %v5202_v14 }
  0xd8   : > { %2431 = vmatmul.mubr.bf16.gmra.mxu1 %v5308_v54  ;;  %2528 = vmatmul.mubr.bf16.gmra.mxu0 %v5070_v17 }
  0xd9   : > { %2438 = vmatprep.mubr.bf16.mxu1 %v5312_v44  ;;  %2535 = vmatprep.mubr.bf16.mxu0 %v5218_v15 }
  0xe0   : > { %2439 = vmatmul.mubr.bf16.gmra.mxu1 %v5318_v13  ;;  %2536 = vmatmul.mubr.bf16.gmra.mxu0 %v5110_v33 }
  0xe1   : > { %2446 = vmatprep.mubr.bf16.mxu1 %v5320_v63  ;;  %2543 = vmatprep.mubr.bf16.mxu0 %v5237_v21 }
  0xe8   : > { %2447 = vmatmul.mubr.bf16.gmra.mxu1 %v5328_v57  ;;  %2544 = vmatmul.mubr.bf16.gmra.mxu0 %v5146_v47 }
  0xe9   : > { %2648 = vmatprep.mubr.bf16.mxu1 %v4841_v48  ;;  %2551 = vmatprep.mubr.bf16.mxu0 %v5253_v12 }
  0xef   : > { %v3803_v3 = vpop.f32.mrf.mxu0 }
  0xf0   : > { %2649 = vmatmul.mubr.bf16.vlgmr.msra.gmra.mxu1 %v4466_v5  ;;  %2552 = vmatmul.mubr.bf16.gmra.mxu0 %v5175_v41  ;;  %v1445_v5 = vshll.u32 %v5320_v63, 16 }
  0xf1   : > { %v3804_v19 = vpop.f32.mrf.mxu0  ;;  %2656 = vmatprep.mubr.bf16.mxu1 %v4892_v56  ;;  %2559 = vmatprep.mubr.bf16.mxu0 %v5268_v8 }
  0xf2   : > { %v5334_v52 = vadd.f32 %v3804_v19, %v3803_v3  ;;  %v4453_v3 = vld [vmem:[#allocation2 + $0xc8] ss:$0 sps:$4 sm:$0x11]  }
  0xf3   : > { %v5342_v48 = vpop.f32.mrf.mxu0 }
  0xf5   : > { %v5344_v45 = vpop.f32.mrf.mxu0 }
  0xf8   : > { %2657 = vmatmul.mubr.bf16.gmra.mxu1 %v4467_v49  ;;  %2560 = vmatmul.mubr.bf16.gmra.mxu0 %v5199_v62  ;;  %v1533_v49 = vrot.slane %v5320_v63, 1 }
  0xf9   : > { %2664 = vmatprep.mubr.bf16.mxu1 %v4974_v53  ;;  %2567 = vmatprep.mubr.bf16.mxu0 %v5285_v37 }
  0xfc   : > { %v3875_v1 = vpop.f32.mrf.mxu1 }
  0xfe   : > { %v3876_v29 = vpop.f32.mrf.mxu1 }
  0xff   : > { %v5346_v32 = vadd.f32 %v3876_v29, %v3875_v1  ;;  %v1534_v1 = vrot.slane %v4453_v3, 1 }
 0x100   : > { %2665 = vmatmul.mubr.bf16.gmra.mxu1 %v4468_v30  ;;  %2568 = vmatmul.mubr.bf16.gmra.mxu0 %v5221_v11  ;;  %v3878_v56 = vpop.f32.mrf.mxu1 }
 0x101   : > { %2672 = vmatprep.mubr.bf16.mxu1 %v5033_v23  ;;  %2575 = vmatprep.mubr.bf16.mxu0 %v5298_v58 }
 0x102   : > { %v3809_v53 = vpop.f32.mrf.mxu0  ;;  %v3879_v34 = vpop.f32.mrf.mxu1 }
 0x103   : > { %v5351_v39 = vadd.f32 %v3879_v34, %v3878_v56  ;;  %v1447_v34 = vrot.slane %v1445_v5, 1 }
 0x104   : > { %v3810_v9 = vpop.f32.mrf.mxu0 }
 0x105   : > { %v5353_v36 = vadd.f32 %v3810_v9, %v3809_v53  ;;  %v1443_v53 = vshrl.u32 %v5320_v63, 16  ;;  %v1450_v9 = vshll.u32 %v4453_v3, 16 }
 0x106   : > { %v3812_v61 = vpop.f32.mrf.mxu0 }
 0x108   : > { %2673 = vmatmul.mubr.bf16.gmra.mxu1 %v4976_v43  ;;  %v3813_v7 = vpop.f32.mrf.mxu0  ;;  %2576 = vmatmul.mubr.bf16.gmra.mxu0 %v4725_v42 }
 0x109   : > { %2680 = vmatprep.mubr.bf16.mxu1 %v5070_v17  ;;  %v5358_v59 = vadd.f32 %v3813_v7, %v3812_v61  ;;  %2583 = vmatprep.mubr.bf16.mxu0 %v5308_v54 }
 0x10b   : > { %v3881_v23 = vpop.f32.mrf.mxu1 }
 0x10d   : > { %v3882_v22 = vpop.f32.mrf.mxu1 }
 0x10e   : > { %v5361_v6 = vadd.f32 %v3882_v22, %v3881_v23 }
 0x10f   : > { %v3884_v40 = vpop.f32.mrf.mxu1 }
 0x110   : > { %2681 = vmatmul.mubr.bf16.gmra.mxu1 %v5012_v28  ;;  %2584 = vmatmul.mubr.bf16.gmra.mxu0 %v4792_v2 }
 0x111   : > { %2688 = vmatprep.mubr.bf16.mxu1 %v5110_v33  ;;  %2591 = vmatprep.mubr.bf16.mxu0 %v5318_v13  ;;  %v3885_v43 = vpop.f32.mrf.mxu1 }
 0x112   : > { %v5367_v17 = vadd.f32 %v3885_v43, %v3884_v40  ;;  %v1448_v40 = vor.u32 %v1447_v34, %v1443_v53  ;;  %v1452_v43 = vrot.slane %v1450_v9, 1 }
 0x113   : > { %v3815_v24 = vpop.f32.mrf.mxu0 }
 0x114   : > { %v5396_v3 = vsel %vm1249_vm1, %v1448_v40, %v1452_v43 }
 0x115   : > { %v3816_v35 = vpop.f32.mrf.mxu0 }
 0x116   : > { %v5369_v18 = vadd.f32 %v3816_v35, %v3815_v24 }
 0x117   : > { %v3818_v0 = vpop.f32.mrf.mxu0 }
 0x118   : > { %2689 = vmatmul.mubr.bf16.gmra.mxu1 %v5072_v46  ;;  %2592 = vmatmul.mubr.bf16.gmra.mxu0 %v4872_v20  ;;  %v3887_v19 = vpop.f32.mrf.mxu1 }
 0x119   : > { %v3819_v28 = vpop.f32.mrf.mxu0  ;;  %2696 = vmatprep.mubr.bf16.mxu1 %v5146_v47  ;;  %2599 = vmatprep.mubr.bf16.mxu0 %v5328_v57  ;;  %v5383_v47 = vsel %vm1484_vm0, %v1533_v49, %v1534_v1 }
 0x11a   : > { %v5375_v33 = vadd.f32 %v3819_v28, %v3818_v0  ;;  %v3888_v29 = vpop.f32.mrf.mxu1 }
 0x11b   : > { %v5379_v30 = vadd.f32 %v3888_v29, %v3887_v19 }
 0x11c   : > { %v3890_v56 = vpop.f32.mrf.mxu1 }
 0x11d   : > { %v3821_v46 = vpop.f32.mrf.mxu0 }
 0x11e   : > { %v3891_v61 = vpop.f32.mrf.mxu1 }
 0x11f   : > { %v3822_v7 = vpop.f32.mrf.mxu0  ;;  %v5386_v23 = vadd.f32 %v3891_v61, %v3890_v56 }
 0x120   : > { %2697 = vmatmul.mubr.bf16.gmra.mxu1 %v5116_v10  ;;  %2600 = vmatmul.mubr.bf16.gmra.mxu0 %v4927_v55  ;;  %v5389_v22 = vadd.f32 %v3822_v7, %v3821_v46 }
 0x121   : > { %2704 = vmatprep.mubr.bf16.mxu1 %v5175_v41  ;;  %2607 = vmatprep.mubr.bf16.mxu0 %v5383_v47  ;;  %v3824_v24 = vpop.f32.mrf.mxu0 }
 0x123   : > { %v3825_v35 = vpop.f32.mrf.mxu0 }
 0x124   : > { %v5393_v0 = vadd.f32 %v3825_v35, %v3824_v24 }
 0x128   : > { %v3893_v10 = vpop.f32.mrf.mxu1  ;;  %2705 = vmatmul.mubr.bf16.gmra.mxu1 %v5156_v60  ;;  %2608 = vmatmul.mubr.bf16.gmra.mxu0 %v5396_v3 }
 0x129   : > { %2712 = vmatprep.mubr.bf16.mxu1 %v5199_v62  ;;  %4275 = vmatprep.mubr.bf16.mxu0 %v5064_v16 }
 0x12a   : > { %v3894_v41 = vpop.f32.mrf.mxu1 }
 0x12b   : > { %v5402_v28 = vadd.f32 %v3894_v41, %v3893_v10 }
 0x12c   : > { %v3896_v19 = vpop.f32.mrf.mxu1 }
 0x12e   : > { %v3897_v5 = vpop.f32.mrf.mxu1 }
 0x12f   : > { %v5404_v49 = vadd.f32 %v3897_v5, %v3896_v19 }
 0x130   : > { %v3827_v1 = vpop.f32.mrf.mxu0  ;;  %v3915_v29 = vpop.f32.mrf.mxu1  ;;  %2713 = vmatmul.mubr.bf16.gmra.mxu1 %v5172_v26  ;;  %4276 = vmatmul.mubr.bf16.vlgmr.msra.gmra.mxu0 %v5099_v27  ;;  %v3808_v26 = vadd.f32 %v5344_v45, %v5342_v48 }
 0x131   : > { %2720 = vmatprep.mubr.bf16.mxu1 %v5221_v11  ;;  %4279 = vmatprep.mubr.bf16.mxu0 %v5141_v38 }
 0x132   : > { %v3828_v60 = vpop.f32.mrf.mxu0  ;;  %v3916_v62 = vpop.f32.mrf.mxu1 }
 0x133   : > { %v5410_v16 = vadd.f32 %v3828_v60, %v3827_v1  ;;  %v3917_v56 = vadd.f32 %v3916_v62, %v3915_v29 }
 0x134   : > { %v3830_v46 = vpop.f32.mrf.mxu0  ;;  %v3918_v53 = vpop.f32.mrf.mxu1 }
 0x135   : > { %v5413_v34 = vadd.f32 %v3917_v56, %v5334_v52 }
 0x136   : > { %v3831_v9 = vpop.f32.mrf.mxu0  ;;  %v3919_v61 = vpop.f32.mrf.mxu1 }
 0x137   : > { %v5417_v27 = vadd.f32 %v3831_v9, %v3830_v46  ;;  %v3920_v11 = vadd.f32 %v3919_v61, %v3918_v53 }
 0x138   : > { %v3833_v7 = vpop.f32.mrf.mxu0  ;;  %v3921_v40 = vpop.f32.mrf.mxu1  ;;  %2721 = vmatmul.mubr.bf16.gmra.mxu1 %v5205_v51  ;;  %4280 = vmatmul.mubr.bf16.gmra.mxu0 %v5170_v31 }
 0x139   : > { %v5421_v38 = vadd.f32 %v3920_v11, %v3808_v26  ;;  %2728 = vmatprep.mubr.bf16.mxu1 %v4725_v42  ;;  %4283 = vmatprep.mubr.bf16.mxu0 %v5202_v14 }
 0x13a   : > { %v3834_v52 = vpop.f32.mrf.mxu0  ;;  %v3922_v43 = vpop.f32.mrf.mxu1 }
 0x13b   : > { %v5425_v24 = vadd.f32 %v3834_v52, %v3833_v7  ;;  %v3923_v48 = vadd.f32 %v3922_v43, %v3921_v40 }
 0x13c   : > { %v3836_v45 = vpop.f32.mrf.mxu0  ;;  %v3924_v35 = vpop.f32.mrf.mxu1 }
 0x13d   : > { %v5428_v10 = vadd.f32 %v3923_v48, %v5353_v36 }
 0x13e   : > { %v3837_v41 = vpop.f32.mrf.mxu0  ;;  %v3925_v51 = vpop.f32.mrf.mxu1 }
 0x13f   : > { %v5430_v19 = vadd.f32 %v3837_v41, %v3836_v45  ;;  %v3926_v31 = vadd.f32 %v3925_v51, %v3924_v35 }
 0x140   : > { %v3839_v5 = vpop.f32.mrf.mxu0  ;;  %v3927_v1 = vpop.f32.mrf.mxu1  ;;  %2729 = vmatmul.mubr.bf16.gmra.mxu1 %v5275_v4  ;;  %4284 = vmatmul.mubr.bf16.gmra.mxu0 %v5218_v15 }
 0x141   : > { %v5435_v42 = vadd.f32 %v3926_v31, %v5358_v59  ;;  %2736 = vmatprep.mubr.bf16.mxu1 %v4792_v2  ;;  %4287 = vmatprep.mubr.bf16.mxu0 %v5237_v21 }
 0x142   : > { %v3840_v14 = vpop.f32.mrf.mxu0  ;;  %v3928_v36 = vpop.f32.mrf.mxu1 }
 0x143   : > { %v5439_v29 = vadd.f32 %v3840_v14, %v3839_v5  ;;  %v3929_v60 = vadd.f32 %v3928_v36, %v3927_v1  ;;  %v4455_v14 = vld [vmem:[#allocation2 + $0xd4] ss:$0 sps:$4 sm:$0x11]  }
 0x144   : > { %v3842_v62 = vpop.f32.mrf.mxu0  ;;  %v3930_v56 = vpop.f32.mrf.mxu1 }
 0x145   : > { %v5442_v46 = vadd.f32 %v3929_v60, %v5369_v18  ;;  %v1462_v60 = vshll.u32 %v4455_v14, 16 }
 0x146   : > { %v3843_v4 = vpop.f32.mrf.mxu0  ;;  %v3931_v53 = vpop.f32.mrf.mxu1 }
 0x147   : > { %v5444_v15 = vadd.f32 %v3843_v4, %v3842_v62  ;;  %v3932_v59 = vadd.f32 %v3931_v53, %v3930_v56 }
 0x148   : > { %v3845_v9 = vpop.f32.mrf.mxu0  ;;  %v3933_v61 = vpop.f32.mrf.mxu1  ;;  %2737 = vmatmul.mubr.bf16.gmra.mxu1 %v5292_v25  ;;  %4288 = vmatmul.mubr.bf16.gmra.mxu0 %v5253_v12  ;;  %v5458_v12 = vld [vmem:[#allocation2 + $0xcc] sm:$0xff]  }
 0x149   : > { %v5449_v2 = vadd.f32 %v3932_v59, %v5375_v33  ;;  %2744 = vmatprep.mubr.bf16.mxu1 %v4872_v20  ;;  %4291 = vmatprep.mubr.bf16.mxu0 %v5268_v8  ;;  %v1457_v41 = vshll.u32 %v5458_v12, 16  ;;  %v1455_v36 = vshrl.u32 %v5458_v12, 16 }
 0x14a   : > { %v3846_v21 = vpop.f32.mrf.mxu0  ;;  %v3934_v18 = vpop.f32.mrf.mxu1 }
 0x14b   : > { %v5453_v26 = vadd.f32 %v3846_v21, %v3845_v9  ;;  %v3935_v11 = vadd.f32 %v3934_v18, %v3933_v61  ;;  %v1464_v61 = vrot.slane %v1462_v60, 1 }
 0x14c   : > { %v3848_v7 = vpop.f32.mrf.mxu0  ;;  %v3936_v40 = vpop.f32.mrf.mxu1 }
 0x14d   : > { %v5456_v52 = vadd.f32 %v3935_v11, %v5389_v22 }
 0x14e   : > { %v3849_v25 = vpop.f32.mrf.mxu0  ;;  %v3937_v43 = vpop.f32.mrf.mxu1 }
 0x14f   : > { %v5460_v33 = vadd.f32 %v3849_v25, %v3848_v7  ;;  %v3938_v48 = vadd.f32 %v3937_v43, %v3936_v40 }
 0x150   : > { %v3851_v20 = vpop.f32.mrf.mxu0  ;;  %v3939_v45 = vpop.f32.mrf.mxu1  ;;  %2745 = vmatmul.mubr.bf16.gmra.mxu1 %v5302_v50  ;;  %4292 = vmatmul.mubr.bf16.gmra.mxu0 %v5285_v37 }
 0x151   : > { %v5465_v8 = vadd.f32 %v3938_v48, %v5393_v0  ;;  %2752 = vmatprep.mubr.bf16.mxu1 %v4927_v55  ;;  %4295 = vmatprep.mubr.bf16.mxu0 %v5298_v58  ;;  %v1459_v55 = vrot.slane %v1457_v41, 1 }
 0x152   : > { %v3852_v22 = vpop.f32.mrf.mxu0  ;;  %v3940_v35 = vpop.f32.mrf.mxu1 }
 0x153   : > { %v5470_v51 = vadd.f32 %v3852_v22, %v3851_v20  ;;  %v3941_v31 = vadd.f32 %v3940_v35, %v3939_v45  ;;  %v1460_v9 = vor.u32 %v1459_v55, %v1455_v36  ;;  %v1536_v45 = vrot.slane %v5458_v12, 1 }
 0x154   : > { %v3854_v5 = vpop.f32.mrf.mxu0  ;;  %v3942_v1 = vpop.f32.mrf.mxu1  ;;  %v1537_v22 = vrot.slane %v4455_v14, 1 }
 0x155   : > { %v5473_v50 = vadd.f32 %v3941_v31, %v5410_v16 }
 0x156   : > { %v3855_v37 = vpop.f32.mrf.mxu0  ;;  %v3943_v0 = vpop.f32.mrf.mxu1 }
 0x157   : > { %v5476_v62 = vadd.f32 %v3855_v37, %v3854_v5  ;;  %v3944_v58 = vadd.f32 %v3943_v0, %v3942_v1 }
 0x158   : > { %v3857_v56 = vpop.f32.mrf.mxu0  ;;  %v3945_v4 = vpop.f32.mrf.mxu1  ;;  %2753 = vmatmul.mubr.bf16.gmra.mxu1 %v5312_v44  ;;  %4296 = vmatmul.mubr.bf16.gmra.mxu0 %v5308_v54 }
 0x159   : > { %v5481_v53 = vadd.f32 %v3944_v58, %v5417_v27  ;;  %2760 = vmatprep.mubr.bf16.mxu1 %v5396_v3  ;;  %4299 = vmatprep.mubr.bf16.mxu0 %v5318_v13  ;;  %v1465_v27 = vsel %vm1249_vm1, %v1460_v9, %v1464_v61 }
 0x15a   : > { %v3858_v16 = vpop.f32.mrf.mxu0  ;;  %v3946_v59 = vpop.f32.mrf.mxu1 }
 0x15b   : > { %v5485_v21 = vadd.f32 %v3858_v16, %v3857_v56  ;;  %v3947_v18 = vadd.f32 %v3946_v59, %v3945_v4 }
 0x15c   : > { %v3860_v11 = vpop.f32.mrf.mxu0  ;;  %v3948_v7 = vpop.f32.mrf.mxu1 }
 0x15d   : > { %v5488_v44 = vadd.f32 %v3947_v18, %v5425_v24 }
 0x15e   : > { %v3861_v54 = vpop.f32.mrf.mxu0  ;;  %v3949_v40 = vpop.f32.mrf.mxu1 }
 0x15f   : > { %v5491_v25 = vadd.f32 %v3861_v54, %v3860_v11  ;;  %v3950_v3 = vadd.f32 %v3949_v40, %v3948_v7 }
 0x160   : > { %v3863_v43 = vpop.f32.mrf.mxu0  ;;  %v3951_v13 = vpop.f32.mrf.mxu1  ;;  %2761 = vmatmul.mubr.bf16.gmra.mxu1 %v5320_v63  ;;  %4300 = vmatmul.mubr.bf16.gmra.mxu0 %v5328_v57 }
 0x161   : > { %v5496_v48 = vadd.f32 %v3950_v3, %v5430_v19  ;;  %2768 = vmatprep.mubr.bf16.mxu1 %v1465_v27  ;;  %4303 = vmatprep.mubr.bf16.mxu0 %v5383_v47  ;;  %v1538_v19 = vsel %vm1484_vm0, %v1536_v45, %v1537_v22 }
 0x162   : > { %v3864_v20 = vpop.f32.mrf.mxu0  ;;  %v3952_v24 = vpop.f32.mrf.mxu1 }
 0x163   : > { %v5500_v35 = vadd.f32 %v3864_v20, %v3863_v43  ;;  %v3953_v41 = vadd.f32 %v3952_v24, %v3951_v13 }
 0x164   : > { %v3866_v31 = vpop.f32.mrf.mxu0  ;;  %v3954_v5 = vpop.f32.mrf.mxu1 }
 0x165   : > { %v5503_v63 = vadd.f32 %v3953_v41, %v5439_v29 }
 0x166   : > { %v3867_v57 = vpop.f32.mrf.mxu0  ;;  %v3955_v1 = vpop.f32.mrf.mxu1 }
 0x167   : > { %v5506_v37 = vadd.f32 %v3867_v57, %v3866_v31  ;;  %v3956_v0 = vadd.f32 %v3955_v1, %v3954_v5 }
 0x168   : > { %v3957_v47 = vpop.f32.mrf.mxu1  ;;  %2769 = vmatmul.mubr.bf16.gmra.mxu1 %v5458_v12  ;;  %v3869_v36 = vpop.f32.mrf.mxu0  ;;  %4304 = vmatmul.mubr.bf16.gmra.mxu0 %v1538_v19 }
 0x169   : > { %v5510_v14 = vadd.f32 %v3956_v0, %v5444_v15 }
 0x16a   : > { %v3958_v55 = vpop.f32.mrf.mxu1  ;;  %v3870_v60 = vpop.f32.mrf.mxu0 }
 0x16b   : > { %v3959_v58 = vadd.f32 %v3958_v55, %v3957_v47  ;;  %v5512_v29 = vadd.f32 %v3870_v60, %v3869_v36 }
 0x16c   : > { %v3960_v56 = vpop.f32.mrf.mxu1  ;;  %v3872_v4 = vpop.f32.mrf.mxu0 }
 0x16d   : > { %v5515_v16 = vadd.f32 %v3959_v58, %v5453_v26 }
 0x16e   : > { %v3961_v59 = vpop.f32.mrf.mxu1  ;;  %v3873_v9 = vpop.f32.mrf.mxu0 }
 0x16f   : > { %v3962_v61 = vadd.f32 %v3961_v59, %v3960_v56  ;;  %v5517_v18 = vadd.f32 %v3873_v9, %v3872_v4 }
 0x170   : > { %v3963_v12 = vpop.f32.mrf.mxu1  ;;  %v4027_v11 = vpop.f32.mrf.mxu0 }
 0x171   : > { %v5520_v15 = vadd.f32 %v3962_v61, %v5460_v33 }
 0x172   : > { %v3964_v7 = vpop.f32.mrf.mxu1  ;;  %v4028_v54 = vpop.f32.mrf.mxu0 }
 0x173   : > { %v3965_v40 = vadd.f32 %v3964_v7, %v3963_v12  ;;  %v4029_v27 = vadd.f32 %v4028_v54, %v4027_v11 }
 0x174   : > { %v3966_v3 = vpop.f32.mrf.mxu1  ;;  %v4030_v43 = vpop.f32.mrf.mxu0 }
 0x175   : > { %v5523_v13 = vadd.f32 %v3965_v40, %v5470_v51  ;;  %v5526_v26 = vadd.f32 %v4029_v27, %v5413_v34 }
 0x176   : > { %v3967_v20 = vpop.f32.mrf.mxu1  ;;  %v4031_v24 = vpop.f32.mrf.mxu0 }
 0x177   : > { %v3968_v45 = vadd.f32 %v3967_v20, %v3966_v3  ;;  %v4032_v22 = vadd.f32 %v4031_v24, %v4030_v43 }
 0x178   : > { %v3969_v41 = vpop.f32.mrf.mxu1  ;;  %v4033_v31 = vpop.f32.mrf.mxu0 }
 0x179   : > { %v5529_v33 = vadd.f32 %v3968_v45, %v5476_v62  ;;  %v5532_v5 = vadd.f32 %v4032_v22, %v5421_v38 }
 0x17a   : > { %v3970_v57 = vpop.f32.mrf.mxu1  ;;  %v4034_v19 = vpop.f32.mrf.mxu0 }
 0x17b   : > { %v3971_v1 = vadd.f32 %v3970_v57, %v3969_v41  ;;  %v4035_v51 = vadd.f32 %v4034_v19, %v4033_v31 }
 0x17c   : > { %v3972_v0 = vpop.f32.mrf.mxu1  ;;  %v4036_v47 = vpop.f32.mrf.mxu0 }
 0x17d   : > { %v5535_v34 = vadd.f32 %v3971_v1, %v5485_v21  ;;  %v5538_v36 = vadd.f32 %v4035_v51, %v5428_v10 }
 0x17e   : > { %v3973_v55 = vpop.f32.mrf.mxu1  ;;  %v4037_v60 = vpop.f32.mrf.mxu0 }
 0x17f   : > { %v3974_v58 = vadd.f32 %v3973_v55, %v3972_v0  ;;  %v4038_v62 = vadd.f32 %v4037_v60, %v4036_v47 }
 0x180   : > { %v3975_v56 = vpop.f32.mrf.mxu1  ;;  %v4039_v4 = vpop.f32.mrf.mxu0 }
 0x181   : > { %v5541_v38 = vadd.f32 %v3974_v58, %v5491_v25  ;;  %v5544_v59 = vadd.f32 %v4038_v62, %v5435_v42 }
 0x182   : > { %v3976_v9 = vpop.f32.mrf.mxu1  ;;  %v4040_v61 = vpop.f32.mrf.mxu0 }
 0x183   : > { %v3977_v12 = vadd.f32 %v3976_v9, %v3975_v56  ;;  %v4041_v21 = vadd.f32 %v4040_v61, %v4039_v4 }
 0x184   : > { %v3978_v11 = vpop.f32.mrf.mxu1  ;;  %v4042_v7 = vpop.f32.mrf.mxu0 }
 0x185   : > { %v5547_v10 = vadd.f32 %v3977_v12, %v5500_v35  ;;  %v5550_v54 = vadd.f32 %v4041_v21, %v5442_v46 }
 0x186   : > { %v3979_v40 = vpop.f32.mrf.mxu1  ;;  %v4043_v27 = vpop.f32.mrf.mxu0 }
 0x187   : > { %v3980_v3 = vadd.f32 %v3979_v40, %v3978_v11  ;;  %v4044_v25 = vadd.f32 %v4043_v27, %v4042_v7 }
 0x188   : > { %v3981_v43 = vpop.f32.mrf.mxu1  ;;  %v4045_v20 = vpop.f32.mrf.mxu0 }
 0x189   : > { %v5553_v42 = vadd.f32 %v3980_v3, %v5506_v37  ;;  %v5556_v24 = vadd.f32 %v4044_v25, %v5449_v2 }
 0x18a   : > { %v3982_v45 = vpop.f32.mrf.mxu1  ;;  %v4046_v22 = vpop.f32.mrf.mxu0 }
 0x18b   : > { %v3983_v41 = vadd.f32 %v3982_v45, %v3981_v43  ;;  %v4047_v35 = vadd.f32 %v4046_v22, %v4045_v20 }
 0x18c   : > { %v3984_v31 = vpop.f32.mrf.mxu1  ;;  %v4048_v57 = vpop.f32.mrf.mxu0 }
 0x18d   : > { %v5559_v46 = vadd.f32 %v3983_v41, %v5512_v29  ;;  %v5562_v19 = vadd.f32 %v4047_v35, %v5456_v52 }
 0x18e   : > { %v3985_v1 = vpop.f32.mrf.mxu1  ;;  %v4049_v51 = vpop.f32.mrf.mxu0 }
 0x18f   : > { %v3986_v0 = vadd.f32 %v3985_v1, %v3984_v31  ;;  %v4050_v37 = vadd.f32 %v4049_v51, %v4048_v57 }
 0x190   : > { %v3987_v47 = vpop.f32.mrf.mxu1  ;;  %v4051_v55 = vpop.f32.mrf.mxu0 }
 0x191   : > { %v5565_v2 = vadd.f32 %v3986_v0, %v5517_v18  ;;  %v5568_v60 = vadd.f32 %v4050_v37, %v5465_v8 }
 0x192   : > { %v3988_v58 = vpop.f32.mrf.mxu1  ;;  %v4052_v62 = vpop.f32.mrf.mxu0 }
 0x193   : > { %v3989_v56 = vadd.f32 %v3988_v58, %v3987_v47  ;;  %v4053_v29 = vadd.f32 %v4052_v62, %v4051_v55 }
 0x194   : > { %v3990_v4 = vpop.f32.mrf.mxu1  ;;  %v4054_v9 = vpop.f32.mrf.mxu0 }
 0x195   : > { %v5571_v52 = vadd.f32 %v3989_v56, %v5346_v32  ;;  %v5574_v61 = vadd.f32 %v4053_v29, %v5473_v50 }
 0x196   : > { %v3991_v12 = vpop.f32.mrf.mxu1  ;;  %v4055_v21 = vpop.f32.mrf.mxu0 }
 0x197   : > { %v3992_v11 = vadd.f32 %v3991_v12, %v3990_v4  ;;  %v4056_v18 = vadd.f32 %v4055_v21, %v4054_v9 }
 0x198   : > { %v3993_v7 = vpop.f32.mrf.mxu1  ;;  %v4057_v40 = vpop.f32.mrf.mxu0 }
 0x199   : > { %v5577_v8 = vadd.f32 %v3992_v11, %v5351_v39  ;;  %v5580_v27 = vadd.f32 %v4056_v18, %v5481_v53 }
 0x19a   : > { %v3994_v3 = vpop.f32.mrf.mxu1  ;;  %v4058_v25 = vpop.f32.mrf.mxu0 }
 0x19b   : > { %v3995_v43 = vadd.f32 %v3994_v3, %v3993_v7  ;;  %v4059_v32 = vadd.f32 %v4058_v25, %v4057_v40 }
 0x19c   : > { %v3996_v20 = vpop.f32.mrf.mxu1  ;;  %v4060_v45 = vpop.f32.mrf.mxu0 }
 0x19d   : > { %v5583_v50 = vadd.f32 %v3995_v43, %v5361_v6  ;;  %v5586_v22 = vadd.f32 %v4059_v32, %v5488_v44 }
 0x19e   : > { %v3997_v41 = vpop.f32.mrf.mxu1  ;;  %v4061_v35 = vpop.f32.mrf.mxu0 }
 0x19f   : > { %v3998_v31 = vadd.f32 %v3997_v41, %v3996_v20  ;;  %v4062_v39 = vadd.f32 %v4061_v35, %v4060_v45 }
 0x1a0   : > { %v3999_v57 = vpop.f32.mrf.mxu1  ;;  %v4063_v1 = vpop.f32.mrf.mxu0 }
 0x1a1   : > { %v5589_v53 = vadd.f32 %v3998_v31, %v5367_v17  ;;  %v5592_v51 = vadd.f32 %v4062_v39, %v5496_v48 }
 0x1a2   : > { %v4000_v0 = vpop.f32.mrf.mxu1  ;;  %v4064_v37 = vpop.f32.mrf.mxu0 }
 0x1a3   : > { %v4001_v47 = vadd.f32 %v4000_v0, %v3999_v57  ;;  %v4065_v6 = vadd.f32 %v4064_v37, %v4063_v1 }
 0x1a4   : > { %v4002_v55 = vpop.f32.mrf.mxu1  ;;  %v4066_v58 = vpop.f32.mrf.mxu0 }
 0x1a5   : > { %v5595_v44 = vadd.f32 %v4001_v47, %v5379_v30  ;;  %v5598_v62 = vadd.f32 %v4065_v6, %v5503_v63 }
 0x1a6   : > { %v4003_v56 = vpop.f32.mrf.mxu1  ;;  %v4067_v29 = vpop.f32.mrf.mxu0 }
 0x1a7   : > { %v4004_v4 = vadd.f32 %v4003_v56, %v4002_v55  ;;  %v4068_v17 = vadd.f32 %v4067_v29, %v4066_v58 }
 0x1a8   : > { %v4005_v9 = vpop.f32.mrf.mxu1  ;;  %v4069_v12 = vpop.f32.mrf.mxu0 }
 0x1a9   : > { %v5601_v48 = vadd.f32 %v4004_v4, %v5386_v23  ;;  %v5604_v21 = vadd.f32 %v4068_v17, %v5510_v14 }
 0x1aa   : > { %v4006_v11 = vpop.f32.mrf.mxu1  ;;  %v4070_v18 = vpop.f32.mrf.mxu0 }
 0x1ab   : > { %v4007_v7 = vadd.f32 %v4006_v11, %v4005_v9  ;;  %v4071_v30 = vadd.f32 %v4070_v18, %v4069_v12 }
 0x1ac   : > { %v4008_v40 = vpop.f32.mrf.mxu1  ;;  %v4072_v3 = vpop.f32.mrf.mxu0 }
 0x1ad   : > { %v5607_v63 = vadd.f32 %v4007_v7, %v5402_v28  ;;  %v5610_v25 = vadd.f32 %v4071_v30, %v5515_v16 }
 0x1ae   : > { %v4009_v43 = vpop.f32.mrf.mxu1  ;;  %v4073_v32 = vpop.f32.mrf.mxu0 }
 0x1af   : > { %v4010_v20 = vadd.f32 %v4009_v43, %v4008_v40  ;;  %v4074_v23 = vadd.f32 %v4073_v32, %v4072_v3 }
 0x1b0   : > { %v4139_v45 = vpop.f32.mrf.mxu1  ;;  %v4075_v41 = vpop.f32.mrf.mxu0 }
 0x1b1   : > { %v5613_v14 = vadd.f32 %v4010_v20, %v5404_v49  ;;  %v5616_v35 = vadd.f32 %v4074_v23, %v5520_v15 }
 0x1b2   : > { %v4140_v31 = vpop.f32.mrf.mxu1  ;;  %v4076_v39 = vpop.f32.mrf.mxu0 }
 0x1b3   : > { %5894 = vst [vmem:[#allocation3_spill] sm:$0xff] %v5613_v14  ;;  %v4141_v57 = vadd.f32 %v4140_v31, %v4139_v45  ;;  %v4077_v28 = vadd.f32 %v4076_v39, %v4075_v41 }
 0x1b4   : > { %v5618_v1 = vpop.f32.mrf.mxu1  ;;  %v4078_v16 = vpop.f32.mrf.mxu0 }
 0x1b5   : > { %v5621_v0 = vadd.f32 %v4141_v57, %v5526_v26  ;;  %v5624_v37 = vadd.f32 %v4077_v28, %v5523_v13 }
 0x1b6   : > { %v5626_v47 = vpop.f32.mrf.mxu1  ;;  %v4079_v49 = vpop.f32.mrf.mxu0 }
 0x1b7   : > { %v4080_v6 = vadd.f32 %v4079_v49, %v4078_v16 }
 0x1b8   : > { %v5628_v55 = vpop.f32.mrf.mxu1  ;;  %v4081_v15 = vpop.f32.mrf.mxu0 }
 0x1b9   : > { %v5631_v58 = vadd.f32 %v4080_v6, %v5529_v33 }
 0x1ba   : > { %v5633_v56 = vpop.f32.mrf.mxu1  ;;  %v4082_v29 = vpop.f32.mrf.mxu0 }
 0x1bb   : > { %v4083_v4 = vadd.f32 %v4082_v29, %v4081_v15 }
 0x1bc   : > { %v5635_v17 = vpop.f32.mrf.mxu1  ;;  %v4084_v26 = vpop.f32.mrf.mxu0 }
 0x1bd   : > { %v5638_v13 = vadd.f32 %v4083_v4, %v5535_v34 }
 0x1be   : > { %v5640_v9 = vpop.f32.mrf.mxu1  ;;  %v4085_v12 = vpop.f32.mrf.mxu0 }
 0x1bf   : > { %v4086_v11 = vadd.f32 %v4085_v12, %v4084_v26 }
 0x1c0   : > { %v5642_v18 = vpop.f32.mrf.mxu1  ;;  %v4087_v7 = vpop.f32.mrf.mxu0 }
 0x1c1   : > { %v5645_v33 = vadd.f32 %v4086_v11, %v5541_v38 }
 0x1c2   : > { %v5647_v30 = vpop.f32.mrf.mxu1  ;;  %v4088_v40 = vpop.f32.mrf.mxu0 }
 0x1c3   : > { %v4089_v3 = vadd.f32 %v4088_v40, %v4087_v7 }
 0x1c4   : > { %v5649_v43 = vpop.f32.mrf.mxu1  ;;  %v4090_v32 = vpop.f32.mrf.mxu0 }
 0x1c5   : > { %v5652_v34 = vadd.f32 %v4089_v3, %v5547_v10 }
 0x1c6   : > { %v5654_v20 = vpop.f32.mrf.mxu1  ;;  %v4091_v23 = vpop.f32.mrf.mxu0 }
 0x1c7   : > { %v4092_v45 = vadd.f32 %v4091_v23, %v4090_v32 }
 0x1c8   : > { %v5656_v41 = vpop.f32.mrf.mxu1  ;;  %v4093_v31 = vpop.f32.mrf.mxu0 }
 0x1c9   : > { %v5659_v38 = vadd.f32 %v4092_v45, %v5553_v42 }
 0x1ca   : > { %v5661_v39 = vpop.f32.mrf.mxu1  ;;  %v4094_v57 = vpop.f32.mrf.mxu0 }
 0x1cb   : > { %5895 = vst [vmem:[#allocation4_spill] sm:$0xff] %v5659_v38  ;;  %v4095_v28 = vadd.f32 %v4094_v57, %v4093_v31 }
 0x1cc   : > { %v5663_v16 = vpop.f32.mrf.mxu1  ;;  %v4096_v49 = vpop.f32.mrf.mxu0 }
 0x1cd   : > { %v5666_v10 = vadd.f32 %v4095_v28, %v5559_v46 }
 0x1ce   : > { %v5668_v6 = vpop.f32.mrf.mxu1  ;;  %v4097_v15 = vpop.f32.mrf.mxu0 }
 0x1cf   : > { %v4098_v29 = vadd.f32 %v4097_v15, %v4096_v49 }
 0x1d0   : > { %v5670_v4 = vpop.f32.mrf.mxu1  ;;  %v4099_v26 = vpop.f32.mrf.mxu0 }
 0x1d1   : > { %v5673_v42 = vadd.f32 %v4098_v29, %v5565_v2 }
 0x1d2   : > { %v5675_v12 = vpop.f32.mrf.mxu1  ;;  %v4100_v11 = vpop.f32.mrf.mxu0 }
 0x1d3   : > { %5896 = vst [vmem:[#allocation5_spill] sm:$0xff] %v5673_v42  ;;  %v4101_v7 = vadd.f32 %v4100_v11, %v4099_v26 }
 0x1d4   : > { %v5677_v40 = vpop.f32.mrf.mxu1  ;;  %v4102_v3 = vpop.f32.mrf.mxu0 }
 0x1d5   : > { %v5680_v46 = vadd.f32 %v4101_v7, %v5571_v52 }
 0x1d6   : > { %v5682_v32 = vpop.f32.mrf.mxu1  ;;  %v4103_v23 = vpop.f32.mrf.mxu0 }
 0x1d7   : > { %5897 = vst [vmem:[#allocation6_spill] sm:$0xff] %v5680_v46  ;;  %v4104_v45 = vadd.f32 %v4103_v23, %v4102_v3 }
 0x1d8   : > { %v5684_v31 = vpop.f32.mrf.mxu1  ;;  %v4105_v57 = vpop.f32.mrf.mxu0 }
 0x1d9   : > { %v5687_v2 = vadd.f32 %v4104_v45, %v5577_v8 }
 0x1da   : > { %v5689_v28 = vpop.f32.mrf.mxu1  ;;  %v4106_v49 = vpop.f32.mrf.mxu0 }
 0x1db   : > { %5898 = vst [vmem:[#allocation7_spill] sm:$0xff] %v5687_v2  ;;  %v4107_v15 = vadd.f32 %v4106_v49, %v4105_v57 }
 0x1dc   : > { %v5691_v29 = vpop.f32.mrf.mxu1  ;;  %v4108_v26 = vpop.f32.mrf.mxu0 }
 0x1dd   : > { %v5694_v52 = vadd.f32 %v4107_v15, %v5583_v50 }
 0x1de   : > { %v5696_v11 = vpop.f32.mrf.mxu1  ;;  %v4109_v7 = vpop.f32.mrf.mxu0 }
 0x1df   : > { %5899 = vst [vmem:[#allocation8_spill] sm:$0xff] %v5694_v52  ;;  %v4110_v3 = vadd.f32 %v4109_v7, %v4108_v26 }
 0x1e0   : > { %v5698_v23 = vpop.f32.mrf.mxu1  ;;  %v4111_v14 = vpop.f32.mrf.mxu0 }
 0x1e1   : > { %v5701_v8 = vadd.f32 %v4110_v3, %v5589_v53 }
 0x1e2   : > { %v5703_v45 = vpop.f32.mrf.mxu1  ;;  %v4112_v2 = vpop.f32.mrf.mxu0 }
 0x1e3   : > { %5900 = vst [vmem:[#allocation9_spill] sm:$0xff] %v5701_v8  ;;  %v4113_v57 = vadd.f32 %v4112_v2, %v4111_v14 }
 0x1e4   : > { %v5705_v49 = vpop.f32.mrf.mxu1  ;;  %v4114_v46 = vpop.f32.mrf.mxu0 }
 0x1e5   : > { %v5708_v50 = vadd.f32 %v4113_v57, %v5595_v44 }
 0x1e6   : > { %v5710_v15 = vpop.f32.mrf.mxu1  ;;  %v4115_v52 = vpop.f32.mrf.mxu0 }
 0x1e7   : > { %5901 = vst [vmem:[#allocation10_spill] sm:$0xff] %v5708_v50  ;;  %v4116_v26 = vadd.f32 %v4115_v52, %v4114_v46  ;;  %v4147_v52 = vadd.f32 %v5633_v56, %v5628_v55 }
 0x1e8   : > { %v5712_v7 = vpop.f32.mrf.mxu1  ;;  %v4117_v38 = vpop.f32.mrf.mxu0 }
 0x1e9   : > { %v5715_v53 = vadd.f32 %v4116_v26, %v5601_v48  ;;  %v4150_v48 = vadd.f32 %v5640_v9, %v5635_v17 }
 0x1ea   : > { %v5717_v3 = vpop.f32.mrf.mxu1  ;;  %v4118_v8 = vpop.f32.mrf.mxu0 }
 0x1eb   : > { %5902 = vst [vmem:[#allocation11_spill] sm:$0xff] %v5715_v53  ;;  %v4119_v14 = vadd.f32 %v4118_v8, %v4117_v38  ;;  %v4144_v8 = vadd.f32 %v5626_v47, %v5618_v1  ;;  %v4159_v1 = vadd.f32 %v5661_v39, %v5656_v41 }
 0x1ec   : > { %v5719_v2 = vpop.f32.mrf.mxu1  ;;  %v5721_v42 = vpop.f32.mrf.mxu0 }
 0x1ed   : > { %5903 = vst [vmem:[#allocation12_spill] sm:$0xff] %v5721_v42  ;;  %v5724_v44 = vadd.f32 %v4119_v14, %v5607_v63  ;;  %v2659_v14 = vadd.f32 %v4147_v52, %v5538_v36  ;;  %v2654_v17 = vadd.f32 %v4144_v8, %v5532_v5  ;;  %v4153_v42 = vadd.f32 %v5647_v30, %v5642_v18 }
 0x1ee   : > { %v5726_v57 = vpop.f32.mrf.mxu1  ;;  %v5728_v46 = vpop.f32.mrf.mxu0  ;;  %v4162_v5 = vadd.f32 %v5668_v6, %v5663_v16  ;;  %v4156_v30 = vadd.f32 %v5654_v20, %v5649_v43  ;;  %v4165_v43 = vadd.f32 %v5675_v12, %v5670_v4  ;;  %v4171_v20 = vadd.f32 %v5689_v28, %v5684_v31 }
 0x1ef   : > { %5904 = vst [vmem:[#allocation13_spill] sm:$0xff] %v5724_v44  ;;  %5905 = vst [vmem:[#allocation14_spill] sm:$0xff] %v5728_v46  ;;  %v2662_v44 = vadd.f32 %v4150_v48, %v5544_v59 }
 0x1f0   : > { %v5734_v26 = vpop.f32.mrf.mxu1  ;;  %v4277_v38 = vpop.f32.mrf.mxu0 }
 0x1f1   : > { %v2820_v56 = vadd.f32 %v4277_v38, %v2659_v14  ;;  %v2675_v38 = vadd.f32 %v4159_v1, %v5562_v19  ;;  %v2670_v19 = vadd.f32 %v4156_v30, %v5556_v24  ;;  %v4168_v30 = vadd.f32 %v5682_v32, %v5677_v40 }
 0x1f2   : > { %v5738_v53 = vpop.f32.mrf.mxu1  ;;  %v2811_v63 = vpop.f32.mrf.mxu0  ;;  %v4177_v40 = vadd.f32 %v5703_v45, %v5698_v23 }
 0x1f3   : > { %v2812_v59 = vadd.f32 %v2811_v63, %v5621_v0  ;;  %v2667_v0 = vadd.f32 %v4153_v42, %v5550_v54 }
 0x1f4   : > { %v5742_v50 = vpop.f32.mrf.mxu1  ;;  %v4278_v55 = vpop.f32.mrf.mxu0 }
 0x1f5   : > { %v2823_v46 = vadd.f32 %v4278_v55, %v2662_v44 }
 0x1f6   : > { %v5745_v9 = vpop.f32.mrf.mxu1  ;;  %v2814_v36 = vpop.f32.mrf.mxu0 }
 0x1f7   : > { %v2939_v47 = vpack.c.bf16 %v2823_v46, %v2820_v56  ;;  %v2815_v44 = vadd.f32 %v2814_v36, %v2654_v17  ;;  %v2678_v46 = vadd.f32 %v4162_v5, %v5568_v60  ;;  %v4174_v60 = vadd.f32 %v5696_v11, %v5691_v29 }
 0x1f8   : > { %v5761_v18 = vpop.f32.mrf.mxu1  ;;  %v4281_v41 = vpop.f32.mrf.mxu0 }
 0x1f9   : > { %3772 = vst [vmem:[%s5756_s24 + $0x8] sm:$0xff] %v2939_v47   ;;  %v2938_v39 = vpack.c.bf16 %v2815_v44, %v2812_v59  ;;  %v3100_v48 = vunpack.c.l.bf16 %v2939_v47  ;;  %v2836_v14 = vadd.f32 %v4281_v41, %v2675_v38  ;;  %v3101_v42 = vunpack.c.h.bf16 %v2939_v47 }
 0x1fa   : > { %v5766_v52 = vpop.f32.mrf.mxu1  ;;  %v2827_v8 = vpop.f32.mrf.mxu0  ;;  %v2683_v47 = vadd.f32 %v4165_v43, %v5574_v61 }
 0x1fb   : > { %3681 = vst [vmem:[%s5756_s24] sm:$0xff] %v2938_v39   ;;  %v3098_v16 = vunpack.c.l.bf16 %v2938_v39  ;;  %v3099_v6 = vunpack.c.h.bf16 %v2938_v39  ;;  %v3169_v5 = vmul.f32 %v3100_v48, %v3100_v48  ;;  %v2828_v4 = vadd.f32 %v2827_v8, %v2667_v0 }
 0x1fc   : > { %v5772_v63 = vpop.f32.mrf.mxu1  ;;  %v4282_v55 = vpop.f32.mrf.mxu0  ;;  %v3170_v29 = vmul.f32 %v3101_v42, %v3101_v42  ;;  %v2691_v0 = vadd.f32 %v4171_v20, %v5586_v22  ;;  %v4183_v22 = vadd.f32 %v5717_v3, %v5712_v7 }
 0x1fd   : > { %v3130_v56 = vadd.f32 %v3099_v6, %v3098_v16  ;;  %v3167_v17 = vmul.f32 %v3098_v16, %v3098_v16  ;;  %v3168_v1 = vmul.f32 %v3099_v6, %v3099_v6  ;;  %v2839_v36 = vadd.f32 %v4282_v55, %v2678_v46 }
 0x1fe   : > { %v5779_v54 = vpop.f32.mrf.mxu1  ;;  %v2830_v12 = vpop.f32.mrf.mxu0  ;;  %v2694_v46 = vadd.f32 %v4174_v60, %v5592_v51  ;;  %v4186_v51 = vadd.f32 %v5726_v57, %v5719_v2 }
 0x1ff   : > { %v3131_v31 = vadd.f32 %v3130_v56, %v3100_v48  ;;  %v3199_v28 = vadd.f32 %v3168_v1, %v3167_v17  ;;  %v2941_v59 = vpack.c.bf16 %v2839_v36, %v2836_v14  ;;  %v2831_v44 = vadd.f32 %v2830_v12, %v2670_v19 }
 0x200   : > { %v5783_v24 = vpop.f32.mrf.mxu1  ;;  %v4285_v41 = vpop.f32.mrf.mxu0  ;;  %v2686_v56 = vadd.f32 %v4168_v30, %v5580_v27  ;;  %v4180_v12 = vadd.f32 %v5710_v15, %v5705_v49  ;;  %v2699_v30 = vadd.f32 %v4177_v40, %v5598_v62  ;;  %v2710_v49 = vadd.f32 %v4186_v51, %v5616_v35 }
 0x201   : > { %v3200_v39 = vadd.f32 %v3199_v28, %v3169_v5  ;;  %3774 = vst [vmem:[%s5756_s24 + $0x18] sm:$0xff] %v2941_v59   ;;  %v2940_v38 = vpack.c.bf16 %v2831_v44, %v2828_v4  ;;  %v3132_v11 = vadd.f32 %v3131_v31, %v3101_v42  ;;  %v3104_v32 = vunpack.c.l.bf16 %v2941_v59 }
 0x202   : > { %v5788_v16 = vpop.f32.mrf.mxu1  ;;  %v2843_v8 = vpop.f32.mrf.mxu0  ;;  %v2852_v43 = vadd.f32 %v4285_v41, %v2691_v0  ;;  %v3105_v20 = vunpack.c.h.bf16 %v2941_v59  ;;  %v2707_v59 = vadd.f32 %v4183_v22, %v5610_v25  ;;  %v4192_v25 = vadd.f32 %v5745_v9, %v5742_v50 }
 0x203   : > { %3773 = vst [vmem:[%s5756_s24 + $0x10] sm:$0xff] %v2940_v38   ;;  %v3102_v48 = vunpack.c.l.bf16 %v2940_v38  ;;  %v3103_v6 = vunpack.c.h.bf16 %v2940_v38  ;;  %v3201_v55 = vadd.f32 %v3200_v39, %v3170_v29  ;;  %v2844_v31 = vadd.f32 %v2843_v8, %v2683_v47 }
 0x204   : > { %v5794_v14 = vpop.f32.mrf.mxu1  ;;  %v4286_v19 = vpop.f32.mrf.mxu0  ;;  %v3173_v7 = vmul.f32 %v3104_v32, %v3104_v32  ;;  %v3174_v39 = vmul.f32 %v3105_v20, %v3105_v20  ;;  %v4195_v35 = vadd.f32 %v5766_v52, %v5761_v18 }
 0x205   : > { %v3133_v17 = vadd.f32 %v3132_v11, %v3102_v48  ;;  %v3171_v61 = vmul.f32 %v3102_v48, %v3102_v48  ;;  %v2855_v1 = vadd.f32 %v4286_v19, %v2694_v46  ;;  %v3172_v23 = vmul.f32 %v3103_v6, %v3103_v6 }
 0x206   : > { %v5799_v36 = vpop.f32.mrf.mxu1  ;;  %v2846_v45 = vpop.f32.mrf.mxu0  ;;  %v4189_v11 = vadd.f32 %v5738_v53, %v5734_v26  ;;  %v4198_v19 = vadd.f32 %v5779_v54, %v5772_v63 }
 0x207   : > { %v3134_v60 = vadd.f32 %v3133_v17, %v3103_v6  ;;  %v3202_v42 = vadd.f32 %v3201_v55, %v3171_v61  ;;  %v2943_v5 = vpack.c.bf16 %v2855_v1, %v2852_v43  ;;  %v2847_v27 = vadd.f32 %v2846_v45, %v2686_v56 }
 0x208   : > { %v5805_v4 = vpop.f32.mrf.mxu1  ;;  %v4289_v28 = vpop.f32.mrf.mxu0  ;;  %v2702_v6 = vadd.f32 %v4180_v12, %v5604_v21  ;;  %v2715_v52 = vadd.f32 %v4189_v11, %v5624_v37  ;;  %v2718_v45 = vadd.f32 %v4192_v25, %v5631_v58 }
 0x209   : > { %v3135_v3 = vadd.f32 %v3134_v60, %v3104_v32  ;;  %v3203_v44 = vadd.f32 %v3202_v42, %v3172_v23  ;;  %3776 = vst [vmem:[%s5756_s24 + $0x28] sm:$0xff] %v2943_v5   ;;  %v2942_v57 = vpack.c.bf16 %v2847_v27, %v2844_v31  ;;  %v2868_v0 = vadd.f32 %v4289_v28, %v2707_v59 }
 0x20a   : > { %v5810_v2 = vpop.f32.mrf.mxu1  ;;  %v2859_v41 = vpop.f32.mrf.mxu0  ;;  %v3108_v32 = vunpack.c.l.bf16 %v2943_v5  ;;  %v3109_v50 = vunpack.c.h.bf16 %v2943_v5  ;;  %v4201_v60 = vadd.f32 %v5788_v16, %v5783_v24  ;;  %v2723_v5 = vadd.f32 %v4195_v35, %v5638_v13 }
 0x20b   : > { %v3204_v38 = vadd.f32 %v3203_v44, %v3173_v7  ;;  %v3136_v29 = vadd.f32 %v3135_v3, %v3105_v20  ;;  %3775 = vst [vmem:[%s5756_s24 + $0x20] sm:$0xff] %v2942_v57   ;;  %v3106_v47 = vunpack.c.l.bf16 %v2942_v57  ;;  %v3107_v8 = vunpack.c.h.bf16 %v2942_v57 }
 0x20c   : > { %v4208_v15 = vpop.f32.mrf.mxu1  ;;  %v4290_v48 = vpop.f32.mrf.mxu0  ;;  %v2860_v56 = vadd.f32 %v2859_v41, %v2699_v30  ;;  %v3177_v20 = vmul.f32 %v3108_v32, %v3108_v32  ;;  %v2726_v27 = vadd.f32 %v4198_v19, %v5645_v33  ;;  %v3178_v37 = vmul.f32 %v3109_v50, %v3109_v50 }
 0x20d   : > { %v3205_v62 = vadd.f32 %v3204_v38, %v3174_v39  ;;  %v2871_v46 = vadd.f32 %v4290_v48, %v2710_v49  ;;  %v3137_v55 = vadd.f32 %v3136_v29, %v3106_v47  ;;  %v3175_v53 = vmul.f32 %v3106_v47, %v3106_v47 }
 0x20e   : > { %v4209_v40 = vpop.f32.mrf.mxu1  ;;  %v2862_v26 = vpop.f32.mrf.mxu0  ;;  %v3176_v43 = vmul.f32 %v3107_v8, %v3107_v8  ;;  %v4204_v44 = vadd.f32 %v5799_v36, %v5794_v14  ;;  %v4207_v33 = vadd.f32 %v5810_v2, %v5805_v4  ;;  %v2731_v4 = vadd.f32 %v4201_v60, %v5652_v34 }
 0x20f   : > { %v2945_v21 = vpack.c.bf16 %v2871_v46, %v2868_v0  ;;  %v2863_v17 = vadd.f32 %v2862_v26, %v2702_v6  ;;  %v3138_v9 = vadd.f32 %v3137_v55, %v3107_v8  ;;  %v3206_v1 = vadd.f32 %v3205_v62, %v3175_v53  ;;  %v5907_v55 = vld [vmem:[#allocation4_spill] sm:$0xff] }
 0x210   : > { %v5825_v61 = vpop.f32.mrf.mxu1  ;;  %v4293_v22 = vpop.f32.mrf.mxu0  ;;  %v4210_v29 = vadd.f32 %v4209_v40, %v4208_v15  ;;  %v2739_v15 = vadd.f32 %v4207_v33, %v5666_v10  ;;  %v5906_v40 = vld [vmem:[#allocation5_spill] sm:$0xff]  ;;  %v2734_v53 = vadd.f32 %v4204_v44, %v5907_v55  ;;  %v5908_v44 = vld [vmem:[#allocation8_spill] sm:$0xff] }
 0x211   : > { %3778 = vst [vmem:[%s5756_s24 + $0x38] sm:$0xff] %v2945_v21   ;;  %v2944_v18 = vpack.c.bf16 %v2863_v17, %v2860_v56  ;;  %v3139_v23 = vadd.f32 %v3138_v9, %v3108_v32  ;;  %v3207_v63 = vadd.f32 %v3206_v1, %v3176_v43  ;;  %v2884_v57 = vadd.f32 %v4293_v22, %v2723_v5 }
 0x212   : > { %v5829_v51 = vpop.f32.mrf.mxu1  ;;  %v2875_v54 = vpop.f32.mrf.mxu0  ;;  %v3112_v16 = vunpack.c.l.bf16 %v2945_v21  ;;  %v3113_v47 = vunpack.c.h.bf16 %v2945_v21  ;;  %v2742_v32 = vadd.f32 %v4210_v29, %v5906_v40 }
 0x213   : > { %3777 = vst [vmem:[%s5756_s24 + $0x30] sm:$0xff] %v2944_v18   ;;  %v3110_v42 = vunpack.c.l.bf16 %v2944_v18  ;;  %v3208_v31 = vadd.f32 %v3207_v63, %v3177_v20  ;;  %v3111_v28 = vunpack.c.h.bf16 %v2944_v18  ;;  %v3140_v7 = vadd.f32 %v3139_v23, %v3109_v50 }
 0x214   : > { %v5837_v12 = vpop.f32.mrf.mxu1  ;;  %v4294_v3 = vpop.f32.mrf.mxu0  ;;  %v2876_v39 = vadd.f32 %v2875_v54, %v2715_v52  ;;  %v3181_v62 = vmul.f32 %v3112_v16, %v3112_v16  ;;  %v3182_v19 = vmul.f32 %v3113_v47, %v3113_v47  ;;  %v4213_v63 = vadd.f32 %v5829_v51, %v5825_v61 }
 0x215   : > { %v3179_v58 = vmul.f32 %v3110_v42, %v3110_v42  ;;  %v2887_v59 = vadd.f32 %v4294_v3, %v2726_v27  ;;  %v3141_v30 = vadd.f32 %v3140_v7, %v3110_v42  ;;  %v3209_v13 = vadd.f32 %v3208_v31, %v3178_v37 }
 0x216   : > { %v4215_v24 = vpop.f32.mrf.mxu1  ;;  %v2878_v41 = vpop.f32.mrf.mxu0  ;;  %v3180_v36 = vmul.f32 %v3111_v28, %v3111_v28 }
 0x217   : > { %v2947_v38 = vpack.c.bf16 %v2887_v59, %v2884_v57  ;;  %v2879_v49 = vadd.f32 %v2878_v41, %v2718_v45  ;;  %v3142_v14 = vadd.f32 %v3141_v30, %v3111_v28  ;;  %v3210_v8 = vadd.f32 %v3209_v13, %v3179_v58  ;;  %v5909_v57 = vld [vmem:[#allocation9_spill] sm:$0xff]  ;;  %v5910_v41 = vld [vmem:[#allocation6_spill] sm:$0xff] }
 0x218   : > { %v4217_v11 = vpop.f32.mrf.mxu1  ;;  %v4297_v48 = vpop.f32.mrf.mxu0  ;;  %v4216_v7 = vadd.f32 %v4215_v24, %v5837_v12 }
 0x219   : > { %3780 = vst [vmem:[%s5756_s24 + $0x48] sm:$0xff] %v2947_v38   ;;  %v2946_v6 = vpack.c.bf16 %v2879_v49, %v2876_v39  ;;  %v3143_v0 = vadd.f32 %v3142_v14, %v3112_v16  ;;  %v3211_v46 = vadd.f32 %v3210_v8, %v3180_v36  ;;  %v2900_v43 = vadd.f32 %v4297_v48, %v2739_v15  ;;  %v5911_v8 = vld [vmem:[#allocation7_spill] sm:$0xff] }
 0x21a   : > { %v4218_v25 = vpop.f32.mrf.mxu1  ;;  %v2891_v2 = vpop.f32.mrf.mxu0  ;;  %v3116_v18 = vunpack.c.l.bf16 %v2947_v38  ;;  %v3117_v5 = vunpack.c.h.bf16 %v2947_v38  ;;  %v2747_v39 = vadd.f32 %v4213_v63, %v5910_v41  ;;  %v2750_v48 = vadd.f32 %v4216_v7, %v5911_v8 }
 0x21b   : > { %3779 = vst [vmem:[%s5756_s24 + $0x40] sm:$0xff] %v2946_v6   ;;  %v3114_v35 = vunpack.c.l.bf16 %v2946_v6  ;;  %v3212_v56 = vadd.f32 %v3211_v46, %v3181_v62  ;;  %v3115_v21 = vunpack.c.h.bf16 %v2946_v6  ;;  %v3144_v17 = vadd.f32 %v3143_v0, %v3113_v47 }
 0x21c   : > { %v4220_v26 = vpop.f32.mrf.mxu1  ;;  %v4298_v50 = vpop.f32.mrf.mxu0  ;;  %v4219_v22 = vadd.f32 %v4218_v25, %v4217_v11  ;;  %v2892_v54 = vadd.f32 %v2891_v2, %v2731_v4  ;;  %v3185_v61 = vmul.f32 %v3116_v18, %v3116_v18  ;;  %v3186_v29 = vmul.f32 %v3117_v5, %v3117_v5 }
 0x21d   : > { %v3183_v9 = vmul.f32 %v3114_v35, %v3114_v35  ;;  %v2903_v1 = vadd.f32 %v4298_v50, %v2742_v32  ;;  %v3145_v52 = vadd.f32 %v3144_v17, %v3114_v35  ;;  %v3213_v20 = vadd.f32 %v3212_v56, %v3182_v19  ;;  %v5913_v17 = vld [vmem:[#allocation14_spill] sm:$0xff] }
 0x21e   : > { %v4221_v34 = vpop.f32.mrf.mxu1  ;;  %v2894_v10 = vpop.f32.mrf.mxu0  ;;  %v3184_v37 = vmul.f32 %v3115_v21, %v3115_v21  ;;  %v2755_v58 = vadd.f32 %v4219_v22, %v5908_v44 }
 0x21f   : > { %v4222_v23 = vadd.f32 %v4221_v34, %v4220_v26  ;;  %v2949_v45 = vpack.c.bf16 %v2903_v1, %v2900_v43  ;;  %v2895_v60 = vadd.f32 %v2894_v10, %v2734_v53  ;;  %v3146_v27 = vadd.f32 %v3145_v52, %v3115_v21  ;;  %v5912_v21 = vld [vmem:[#allocation12_spill] sm:$0xff] }
 0x220   : > { %v4223_v42 = vpop.f32.mrf.mxu1  ;;  %v3214_v31 = vadd.f32 %v3213_v20, %v3183_v9  ;;  %v4301_v28 = vpop.f32.mrf.mxu0  ;;  %v4122_v50 = vadd.f32 %v5913_v17, %v5912_v21 }
 0x221   : > { %3782 = vst [vmem:[%s5756_s24 + $0x58] sm:$0xff] %v2949_v45   ;;  %v2948_v3 = vpack.c.bf16 %v2895_v60, %v2892_v54  ;;  %v2758_v59 = vadd.f32 %v4222_v23, %v5909_v57  ;;  %v3147_v51 = vadd.f32 %v3146_v27, %v3116_v18  ;;  %v2916_v14 = vadd.f32 %v4301_v28, %v2755_v58  ;;  %v5914_v23 = vld [vmem:[#allocation10_spill] sm:$0xff]  ;;  %v5915_v54 = vld [vmem:[#allocation11_spill] sm:$0xff] }
 0x222   : > { %v4224_v16 = vpop.f32.mrf.mxu1  ;;  %v3215_v30 = vadd.f32 %v3214_v31, %v3184_v37  ;;  %v2907_v13 = vpop.f32.mrf.mxu0  ;;  %v3120_v25 = vunpack.c.l.bf16 %v2949_v45  ;;  %v3121_v55 = vunpack.c.h.bf16 %v2949_v45  ;;  %v5916_v28 = vld [vmem:[#allocation3_spill] sm:$0xff] }
 0x223   : > { %3781 = vst [vmem:[%s5756_s24 + $0x50] sm:$0xff] %v2948_v3   ;;  %v3118_v33 = vunpack.c.l.bf16 %v2948_v3  ;;  %v3119_v11 = vunpack.c.h.bf16 %v2948_v3  ;;  %v3148_v47 = vadd.f32 %v3147_v51, %v3117_v5  ;;  %v4225_v4 = vadd.f32 %v4224_v16, %v4223_v42  ;;  %v5917_v16 = vld [vmem:[#allocation13_spill] sm:$0xff] }
 0x224   : > { %v4226_v38 = vpop.f32.mrf.mxu1  ;;  %v3216_v49 = vadd.f32 %v3215_v30, %v3185_v61  ;;  %v4302_v12 = vpop.f32.mrf.mxu0  ;;  %v2908_v2 = vadd.f32 %v2907_v13, %v2747_v39  ;;  %v3189_v1 = vmul.f32 %v3120_v25, %v3120_v25  ;;  %v3190_v42 = vmul.f32 %v3121_v55, %v3121_v55 }
 0x225   : > { %v3187_v24 = vmul.f32 %v3118_v33, %v3118_v33  ;;  %v2919_v36 = vadd.f32 %v4302_v12, %v2758_v59  ;;  %v3149_v62 = vadd.f32 %v3148_v47, %v3118_v33  ;;  %v3188_v26 = vmul.f32 %v3119_v11, %v3119_v11 }
 0x226   : > { %v4227_v6 = vpop.f32.mrf.mxu1  ;;  %v3217_v0 = vadd.f32 %v3216_v49, %v3186_v29  ;;  %v2910_v46 = vpop.f32.mrf.mxu0  ;;  %v2763_v63 = vadd.f32 %v4225_v4, %v5914_v23  ;;  %v2613_v7 = vadd.f32 %v4122_v50, %v5916_v28 }
 0x227   : > { %v2951_v35 = vpack.c.bf16 %v2919_v36, %v2916_v14  ;;  %v2911_v15 = vadd.f32 %v2910_v46, %v2750_v48  ;;  %v4228_v40 = vadd.f32 %v4227_v6, %v4226_v38  ;;  %v3150_v53 = vadd.f32 %v3149_v62, %v3119_v11 }
 0x228   : > { %v4229_v32 = vpop.f32.mrf.mxu1  ;;  %v3218_v19 = vadd.f32 %v3217_v0, %v3187_v24  ;;  %v4305_v56 = vpop.f32.mrf.mxu0 }
 0x229   : > { %3784 = vst [vmem:[%s5756_s24 + $0x68] sm:$0xff] %v2951_v35   ;;  %v2950_v9 = vpack.c.bf16 %v2911_v15, %v2908_v2  ;;  %v3151_v22 = vadd.f32 %v3150_v53, %v3120_v25  ;;  %v3124_v20 = vunpack.c.l.bf16 %v2951_v35  ;;  %v2766_v45 = vadd.f32 %v4228_v40, %v5915_v54 }
 0x22a   : > { %v4230_v43 = vpop.f32.mrf.mxu1  ;;  %v3219_v34 = vadd.f32 %v3218_v19, %v3188_v26  ;;  %v2923_v18 = vpop.f32.mrf.mxu0  ;;  %v3125_v30 = vunpack.c.h.bf16 %v2951_v35 }
 0x22b   : > { %v4231_v52 = vadd.f32 %v4230_v43, %v4229_v32  ;;  %3783 = vst [vmem:[%s5756_s24 + $0x60] sm:$0xff] %v2950_v9   ;;  %v3122_v10 = vunpack.c.l.bf16 %v2950_v9  ;;  %v3123_v27 = vunpack.c.h.bf16 %v2950_v9  ;;  %v3152_v37 = vadd.f32 %v3151_v22, %v3121_v55 }
 0x22c   : > { %v4232_v60 = vpop.f32.mrf.mxu1  ;;  %v3220_v5 = vadd.f32 %v3219_v34, %v3189_v1  ;;  %v4306_v31 = vpop.f32.mrf.mxu0  ;;  %v3193_v13 = vmul.f32 %v3124_v20, %v3124_v20  ;;  %v2924_v33 = vadd.f32 %v2923_v18, %v2763_v63  ;;  %v3194_v48 = vmul.f32 %v3125_v30, %v3125_v30 }
 0x22d   : > { %v3191_v3 = vmul.f32 %v3122_v10, %v3122_v10  ;;  %v3153_v58 = vadd.f32 %v3152_v37, %v3122_v10  ;;  %v2771_v61 = vadd.f32 %v4231_v52, %v5917_v16  ;;  %v3192_v38 = vmul.f32 %v3123_v27, %v3123_v27 }
 0x22e   : > { %v4233_v44 = vpop.f32.mrf.mxu1  ;;  %v3221_v57 = vadd.f32 %v3220_v5, %v3190_v42  ;;  %v2926_v59 = vpop.f32.mrf.mxu0 }
 0x22f   : > { %v4234_v51 = vadd.f32 %v4233_v44, %v4232_v60  ;;  %v2927_v41 = vadd.f32 %v2926_v59, %v2766_v45  ;;  %v3154_v39 = vadd.f32 %v3153_v58, %v3123_v27  ;;  %v2932_v24 = vadd.f32 %v4305_v56, %v2771_v61 }
 0x230   : > { %v3222_v29 = vadd.f32 %v3221_v57, %v3191_v3 }
 0x231   : > { %v2774_v49 = vadd.f32 %v4234_v51, %v2613_v7  ;;  %v2952_v11 = vpack.c.bf16 %v2927_v41, %v2924_v33  ;;  %v3155_v47 = vadd.f32 %v3154_v39, %v3124_v20 }
 0x232   : > { %v3223_v12 = vadd.f32 %v3222_v29, %v3192_v38 }
 0x233   : > { %v2935_v14 = vadd.f32 %v4306_v31, %v2774_v49  ;;  %3785 = vst [vmem:[%s5756_s24 + $0x70] sm:$0xff] %v2952_v11   ;;  %v3126_v36 = vunpack.c.l.bf16 %v2952_v11  ;;  %v3127_v8 = vunpack.c.h.bf16 %v2952_v11  ;;  %v3156_v25 = vadd.f32 %v3155_v47, %v3125_v30 }
 0x234   : > { %v3224_v6 = vadd.f32 %v3223_v12, %v3193_v13 }
 0x235   : > { %v2953_v62 = vpack.c.bf16 %v2935_v14, %v2932_v24  ;;  %v3195_v0 = vmul.f32 %v3126_v36, %v3126_v36  ;;  %v3157_v46 = vadd.f32 %v3156_v25, %v3126_v36  ;;  %v3196_v35 = vmul.f32 %v3127_v8, %v3127_v8 }
 0x236   : > { %v3225_v4 = vadd.f32 %v3224_v6, %v3194_v48 }
 0x237   : > { %3786 = vst [vmem:[%s5756_s24 + $0x78] sm:$0xff] %v2953_v62   ;;  %v3128_v2 = vunpack.c.l.bf16 %v2953_v62  ;;  %v3158_v15 = vadd.f32 %v3157_v46, %v3127_v8  ;;  %v3129_v32 = vunpack.c.h.bf16 %v2953_v62 }
 0x238   : > { %v3226_v40 = vadd.f32 %v3225_v4, %v3195_v0 }
 0x239   : > { %v3197_v55 = vmul.f32 %v3128_v2, %v3128_v2  ;;  %v3159_v26 = vadd.f32 %v3158_v15, %v3128_v2  ;;  %v3198_v56 = vmul.f32 %v3129_v32, %v3129_v32 }
 0x23a   : > { %v3227_v53 = vadd.f32 %v3226_v40, %v3196_v35 }
 0x23b   : > { %v3160_v19 = vadd.f32 %v3159_v26, %v3129_v32 }
 0x23c   : > { %v3228_v21 = vadd.f32 %v3227_v53, %v3197_v55 }
 0x23d   : > { %v3161_v17 = vrot.slane %v3160_v19, 4 }
 0x23e   : > { %v3229_v50 = vadd.f32 %v3228_v21, %v3198_v56 }
 0x23f   : > { %v3162_v9 = vadd.f32 %v3161_v17, %v3160_v19 }
 0x240   : > { %v3230_v43 = vrot.slane %v3229_v50, 4 }
 0x241   : > { %v3163_v1 = vrot.slane %v3162_v9, 2 }
 0x242   : > { %v3231_v22 = vadd.f32 %v3230_v43, %v3229_v50 }
 0x243   : > { %v3164_v34 = vadd.f32 %v3163_v1, %v3162_v9 }
 0x244   : > { %v3232_v18 = vrot.slane %v3231_v22, 2 }
 0x245   : > { %v3165_v52 = vrot.slane %v3164_v34, 1 }
 0x246   : > { %v3233_v20 = vadd.f32 %v3232_v18, %v3231_v22 }
 0x247   : > { %v3166_v23 = vadd.f32 %v3165_v52, %v3164_v34 }
 0x248   : > { %v3234_v10 = vrot.slane %v3233_v20, 1 }
 0x24a   : > { %v3235_v63 = vadd.f32 %v3234_v10, %v3233_v20 }
 0x24c   : > { %v3237_v54 = vsel %vm923_vm6, %v3166_v23, %v3235_v63 }
 0x24d   : > { %3238 = vst [vmem:[%s266_s28] sm:$0x3] %v3237_v54 }
 0x24e PF: > { %s16_s20 = sadd.s32 1, %s4491_s20   ;;  %s5918_s18 = smov %s4487_s19 }
 0x24f   : > { %p13_p5 = scmp.ge.s32.totalorder %s16_s20, 4   ;;  %s5919_s19 = smov %s5921_s21 }
 0x251   :  { %15 = sbr.rel (!%p13_p5) target bundleno = 2 (0x2), region = 79 }

</bundles_post_ra>
